<compile_context>
chip_gen: v5e
topology: v5e:2x2
jax: 0.10.0
libtpu: 0.0.40
codegen_flags: <defaults>
</compile_context>

<pallas_src>
import functools
import numpy as np

import jax
import jax.numpy as jnp
from jax.experimental import pallas as pl
from jax.experimental.pallas import tpu as pltpu


HP = 128  # lane-dense padded feature width (hidden_nf=4 padded to a full vreg lane)

# weight-slab block indices (each block = HP rows of the [16*HP, HP] bf16 slab)
(W_EMB, W_E1S, W_E1T, W_E2, W_A1, W_A2, W_C1, W_C2,
 W_N1H, W_N1G, W_N1A, W_N2, W_ENC1, W_ENC2, W_D1, W_D2) = range(16)
N_WBLK = 16

# bias/row-slab row indices ([16, HP] f32; B_E1R is the radial row of the edge-MLP weight)
(B_EMB, B_E1R, B_E2, B_A1, B_A2, B_C1, B_C2,
 B_N1, B_N2, B_ENC1, B_ENC2, B_D1, B_D2) = range(13)
N_BROW = 16


# ----------------------------- Pallas kernel --------------------------------

def _silu(x):
    return x * jax.nn.sigmoid(x)


def egnn_kernel(nvalid_ref, ids_ref, eproj_ref,
                nodes_ref, coord_ref, nattr_ref, batch_ref,
                w_ref, b_ref,
                out_ref, coord_out_ref,
                h_s, hsht_s, cpm_s, agg_s, cacc_s):
    i = pl.program_id(0)
    last = pl.num_programs(0) - 1
    N = nodes_ref.shape[0]
    TE = ids_ref.shape[0]
    G = out_ref.shape[0]

    def W(k):                                    # [HP, HP] bf16 weight block (static slice)
        return w_ref[k * HP:(k + 1) * HP, :]

    def B(k):                                    # [1, HP] f32 bias / weight-row
        return b_ref[k:k + 1, :]

    def mm(x, w):                                # bf16 MXU matmul, f32 accumulation
        return jnp.dot(x.astype(jnp.bfloat16), w, preferred_element_type=jnp.float32)

    # ---- step 0: node-level precompute + accumulator init ----
    @pl.when(i == 0)
    def _():
        h = _silu(mm(nodes_ref[...], W(W_EMB)) + B(B_EMB))            # Embedding
        h_s[...] = h
        # edge-MLP layer-1 node tables, reassociated to node level, stacked & bf16 (cast once)
        hsht_s[0:N, :] = mm(h, W(W_E1S)).astype(jnp.bfloat16)
        hsht_s[N:2 * N, :] = mm(h, W(W_E1T)).astype(jnp.bfloat16)
        # stacked [coord; -coord] so rij is one gather matmul
        cpm_s[0:N, :] = coord_ref[...]
        cpm_s[N:2 * N, :] = -coord_ref[...]
        agg_s[...] = jnp.zeros_like(agg_s)
        cacc_s[...] = jnp.zeros_like(cacc_s)

    # ---- per edge-block work (skipped for fully padded blocks) ----
    @pl.when(i < nvalid_ref[0])
    def _():
        ids = ids_ref[...]                                            # [TE, 2] int32
        row = ids[:, 0:1]
        col = ids[:, 1:2]
        lane2 = jax.lax.broadcasted_iota(jnp.int32, (TE, 2 * N), 1)
        sel = (lane2 == row) | (lane2 == col + N)                     # fused [row | col] one-hot
        sel_bf = sel.astype(jnp.bfloat16)
        sel_f = sel.astype(jnp.float32)

        # src+tgt gather of the node tables: one bf16 MXU matmul, K = 2N
        srctgt = jnp.dot(sel_bf, hsht_s[...], preferred_element_type=jnp.float32)
        # rij = coord[row] - coord[col]: one f32 matmul against [coord; -coord]
        rij = jnp.dot(sel_f, cpm_s[...], preferred_element_type=jnp.float32)
        radial = jnp.sum(rij * rij, axis=1, keepdims=True)            # [TE, 1]

        # EdgeOperation (edge_attr projection + layer-1 bias pre-folded into eproj stream)
        e_h = _silu(srctgt + radial * B(B_E1R) + eproj_ref[...].astype(jnp.float32))
        e_h = _silu(mm(e_h, W(W_E2)) + B(B_E2))
        att = jax.nn.sigmoid(mm(_silu(mm(e_h, W(W_A1)) + B(B_A1)), W(W_A2)) + B(B_A2))
        edge_feat = e_h * att                                         # att is lane-replicated

        # CoordinateOperation (edge part)
        phi = mm(_silu(mm(edge_feat, W(W_C1)) + B(B_C1)), W(W_C2)) + B(B_C2)
        trans = rij * phi                                             # phi is lane-replicated

        # segment-sum over `row`: contract the row half of the selector over the edge axis
        scat_bf = sel_bf[:, 0:N]                                      # [TE, N] (exact 0/1)
        scat_f = sel_f[:, 0:N]
        dn = (((0,), (0,)), ((), ()))
        agg_s[...] += jax.lax.dot_general(scat_bf, edge_feat.astype(jnp.bfloat16), dn,
                                          preferred_element_type=jnp.float32)
        cacc_s[...] += jax.lax.dot_general(scat_f, trans, dn,
                                           preferred_element_type=jnp.float32)

    # ---- last step: node update, encoding, pooling, decoding ----
    @pl.when(i == last)
    def _():
        h = h_s[...]
        coord_out_ref[...] = coord_ref[...] + cacc_s[...]

        # NodeOperation: one concatenated K=3*HP matmul (W_N1H/W_N1G/W_N1A are consecutive)
        n_in = jnp.concatenate([h, agg_s[...], nattr_ref[...]], axis=1)     # [N, 3*HP]
        wn1 = w_ref[W_N1H * HP:(W_N1A + 1) * HP, :]                          # [3*HP, HP]
        n_h = mm(n_in, wn1) + B(B_N1)
        h = h + (mm(_silu(n_h), W(W_N2)) + B(B_N2))

        # Encoding
        h = mm(_silu(mm(h, W(W_ENC1)) + B(B_ENC1)), W(W_ENC2)) + B(B_ENC2)

        # global_add_pool over batch (on-chip one-hot, f32 for final accuracy) + Decoding
        pool = (jax.lax.broadcasted_iota(jnp.int32, (G, N), 0)
                == batch_ref[...]).astype(jnp.float32)
        g = jnp.dot(pool, h, preferred_element_type=jnp.float32)
        out_ref[...] = mm(_silu(mm(g, W(W_D1)) + B(B_D1)), W(W_D2)) + B(B_D2)


# ----------------------------- wrapper / glue --------------------------------

@functools.partial(jax.jit, static_argnames=("num_graphs", "edge_tile"))
def egnn_pallas(nvalid, ids, eproj, nodes_p, coord_p, nattr_p, batch_l,
                w_slab, b_slab, *, num_graphs, edge_tile):
    N = nodes_p.shape[0]
    E_pad = ids.shape[0]
    TE = edge_tile
    nb = E_pad // TE
    G = num_graphs

    # VMEM budget derived from actual shapes (double-buffered pipeline bufs + scratch),
    # clamped to the v7x per-core capacity.
    stream = 2 * (TE * 2 * 4 + TE * HP * 2)
    resident = 2 * (3 * N * HP * 4 + N * 4
                    + N_WBLK * HP * HP * 2 + N_BROW * HP * 4
                    + G * HP * 4 + N * HP * 4)
    scratch = 3 * N * HP * 4 + 2 * N * HP * 2 + 2 * N * HP * 4
    vmem_limit = int(min(64 * 1024 * 1024,
                         max(8 * 1024 * 1024, 2 * (stream + resident + scratch))))

    # advisory cost estimate so XLA schedules around the custom call sensibly
    flops = int(2 * E_pad * (2 * N) * HP * 2          # fused gather + rij gather
                + 2 * E_pad * HP * HP * 5             # edge MLP / attention / phi
                + 2 * N * E_pad * HP * 2              # agg + cacc segment sums
                + 2 * N * HP * HP * 7 + 2 * N * (3 * HP) * HP
                + 2 * G * N * HP + 2 * G * HP * HP * 2)
    transc = int(E_pad * HP * 5 + N * HP * 4 + G * HP)
    nbytes = sum(int(a.size) * a.dtype.itemsize
                 for a in (nvalid, ids, eproj, nodes_p, coord_p, nattr_p,
                           batch_l, w_slab, b_slab))
    nbytes += (G * HP + N * HP) * 4

    grid_spec = pltpu.PrefetchScalarGridSpec(
        num_scalar_prefetch=1,                               # nvalid (SMEM)
        grid=(nb,),
        in_specs=[
            pl.BlockSpec((TE, 2), lambda i, nv: (i, 0)),         # merged row/col ids
            pl.BlockSpec((TE, HP), lambda i, nv: (i, 0)),        # eattr@We1_attr + b_e1 (bf16)
            pl.BlockSpec((N, HP), lambda i, nv: (0, 0)),         # nodes     (resident)
            pl.BlockSpec((N, HP), lambda i, nv: (0, 0)),         # coord     (resident)
            pl.BlockSpec((N, HP), lambda i, nv: (0, 0)),         # node_attr (resident)
            pl.BlockSpec((1, N), lambda i, nv: (0, 0)),          # batch ids (lane-major)
            pl.BlockSpec((N_WBLK * HP, HP), lambda i, nv: (0, 0)),   # bf16 weight slab
            pl.BlockSpec((N_BROW, HP), lambda i, nv: (0, 0)),        # f32 bias/row slab
        ],
        out_specs=(pl.BlockSpec((G, HP), lambda i, nv: (0, 0)),  # lane-dense output slabs
                   pl.BlockSpec((N, HP), lambda i, nv: (0, 0))),
        scratch_shapes=[
            pltpu.VMEM((N, HP), jnp.float32),          # h
            pltpu.VMEM((2 * N, HP), jnp.bfloat16),     # [h@We1_src ; h@We1_tgt]
            pltpu.VMEM((2 * N, HP), jnp.float32),      # [coord ; -coord]
            pltpu.VMEM((N, HP), jnp.float32),          # agg  (segment-sum of edge_feat)
            pltpu.VMEM((N, HP), jnp.float32),          # cacc (segment-sum of rij*phi)
        ],
    )

    out_p, coord_out_p = pl.pallas_call(
        egnn_kernel,
        out_shape=(jax.ShapeDtypeStruct((G, HP), jnp.float32),
                   jax.ShapeDtypeStruct((N, HP), jnp.float32)),
        grid_spec=grid_spec,
        compiler_params=pltpu.CompilerParams(
            dimension_semantics=("arbitrary",),        # edge axis is a reduction
            vmem_limit_bytes=vmem_limit),
        cost_estimate=pl.CostEstimate(flops=flops, transcendentals=transc,
                                      bytes_accessed=int(nbytes)),
    )(nvalid, ids, eproj, nodes_p, coord_p, nattr_p, batch_l, w_slab, b_slab)

    return out_p[:, :1], coord_out_p[:, :3]


# ----------------------------- host-side packing ------------------------------

def pad2d(x, rows, cols):
    out = np.zeros((rows, cols), np.float32)
    x = np.asarray(x, np.float32)
    out[:x.shape[0], :x.shape[1]] = x
    return out


def pack_params(p):
    """Pack the Linear layers into one bf16 weight slab [16*HP,HP] + one f32 bias slab [16,HP]."""
    H = p["w_emb"].shape[1]

    def wpad(w):
        return pad2d(w, HP, HP)

    def wrep(w):  # single-output column replicated across all HP lanes (lane-dense heads)
        out = np.zeros((HP, HP), np.float32)
        w = np.asarray(w, np.float32)
        out[:w.shape[0], :] = w
        return out

    def bpad(b):
        out = np.zeros((1, HP), np.float32)
        b = np.asarray(b, np.float32).reshape(-1)
        out[0, :b.shape[0]] = b
        return out

    def brep(b):
        return np.full((1, HP), float(np.asarray(b).reshape(-1)[0]), np.float32)

    we1 = np.asarray(p["w_e1"], np.float32)   # rows: [src(H), tgt(H), radial(1), edge_attr(nf)]
    wn1 = np.asarray(p["w_n1"], np.float32)   # rows: [nodes(H), agg(H), node_attr(nf)]

    wblocks = [None] * N_WBLK
    wblocks[W_EMB] = wpad(p["w_emb"])
    wblocks[W_E1S] = wpad(we1[:H])
    wblocks[W_E1T] = wpad(we1[H:2 * H])
    wblocks[W_E2] = wpad(p["w_e2"])
    wblocks[W_A1] = wpad(p["w_a1"])
    wblocks[W_A2] = wrep(p["w_a2"])           # attention head -> lane-replicated
    wblocks[W_C1] = wpad(p["w_c1"])
    wblocks[W_C2] = wrep(p["w_c2"])           # coord-phi head -> lane-replicated
    wblocks[W_N1H] = wpad(wn1[:H])
    wblocks[W_N1G] = wpad(wn1[H:2 * H])
    wblocks[W_N1A] = wpad(wn1[2 * H:])
    wblocks[W_N2] = wpad(p["w_n2"])
    wblocks[W_ENC1] = wpad(p["w_enc1"])
    wblocks[W_ENC2] = wpad(p["w_enc2"])
    wblocks[W_D1] = wpad(p["w_d1"])
    wblocks[W_D2] = wpad(p["w_d2"])           # decoder output lives in lane 0
    w_slab = np.concatenate(wblocks, axis=0)

    brows = [np.zeros((1, HP), np.float32) for _ in range(N_BROW)]
    brows[B_EMB] = bpad(p["b_emb"])
    brows[B_E1R] = bpad(we1[2 * H:2 * H + 1])  # radial row of the edge-MLP weight (kept f32)
    brows[B_E2] = bpad(p["b_e2"])
    brows[B_A1] = bpad(p["b_a1"])
    brows[B_A2] = brep(p["b_a2"])
    brows[B_C1] = bpad(p["b_c1"])
    brows[B_C2] = brep(p["b_c2"])
    brows[B_N1] = bpad(p["b_n1"])
    brows[B_N2] = bpad(p["b_n2"])
    brows[B_ENC1] = bpad(p["b_enc1"])
    brows[B_ENC2] = bpad(p["b_enc2"])
    brows[B_D1] = bpad(p["b_d1"])
    brows[B_D2] = bpad(p["b_d2"])
    b_slab = np.concatenate(brows, axis=0)

    return jnp.asarray(w_slab, jnp.bfloat16), jnp.asarray(b_slab, jnp.float32)


def prepare_graph(nodes, coord, edge_attr, node_attr, row, col, batch, params, edge_tile):
    """Pad feature axes to HP lanes, merge/pad edge ids, precompute the edge_attr
    part of the edge-MLP first layer (+ bias) as a lean bf16 stream."""
    H = np.asarray(params["w_emb"]).shape[1]
    nodes = np.asarray(nodes, np.float32)
    N = nodes.shape[0]
    N_pad = ((N + 15) // 16) * 16                  # bf16 sublane-slice friendly
    E = np.asarray(row).shape[0]
    TE = edge_tile
    E_pad = max(TE, ((E + TE - 1) // TE) * TE)
    n_valid_blocks = (E + TE - 1) // TE

    SENT = 2 * N_pad                               # sentinel: matches no selector lane
    ids = np.full((E_pad, 2), SENT, np.int32)
    ids[:E, 0] = np.asarray(row, np.int32)
    ids[:E, 1] = np.asarray(col, np.int32)

    we1 = np.asarray(params["w_e1"], np.float32)
    b_e1 = np.asarray(params["b_e1"], np.float32)
    eproj = np.asarray(edge_attr, np.float32) @ we1[2 * H + 1:] + b_e1   # (E, H)
    eproj_p = pad2d(eproj, E_pad, HP)

    nodes_p = pad2d(nodes, N_pad, HP)
    coord_p = pad2d(coord, N_pad, HP)
    nattr_p = pad2d(node_attr, N_pad, HP)
    batch_l = np.full((1, N_pad), -1, np.int32)    # padded nodes never match any graph id
    batch_l[0, :N] = np.asarray(batch, np.int32)

    nvalid = np.asarray([n_valid_blocks], np.int32)

    return (jnp.asarray(nvalid), jnp.asarray(ids),
            jnp.asarray(eproj_p, jnp.bfloat16),
            jnp.asarray(nodes_p), jnp.asarray(coord_p), jnp.asarray(nattr_p),
            jnp.asarray(batch_l))


# ----------------------------- parameter init --------------------------------

def xavier_linear(key, fan_in, fan_out, gain=0.01):
    std = float(gain * np.sqrt(2.0 / (fan_in + fan_out)))
    w = std * jax.random.normal(key, (fan_in, fan_out), dtype=jnp.float32)  # stored as x @ W
    b = jnp.ones((fan_out,), dtype=jnp.float32)                             # constant bias = 1.0
    return w, b


def build_params(key, node_dim=2, edge_nf=2, node_nf=2, H=4):
    ks = jax.random.split(key, 13)
    layout = [("w_emb", "b_emb", node_dim, H),
              ("w_e1", "b_e1", 2 * H + 1 + edge_nf, H),
              ("w_e2", "b_e2", H, H),
              ("w_a1", "b_a1", H, H), ("w_a2", "b_a2", H, 1),
              ("w_c1", "b_c1", H, H), ("w_c2", "b_c2", H, 1),
              ("w_n1", "b_n1", 2 * H + node_nf, H),
              ("w_n2", "b_n2", H, H),
              ("w_enc1", "b_enc1", H, H), ("w_enc2", "b_enc2", H, H),
              ("w_d1", "b_d1", H, H), ("w_d2", "b_d2", H, 1)]
    p = {}
    for k, (wn, bn, fi, fo) in zip(ks, layout):
        w, b = xavier_linear(k, fi, fo)
        p[wn], p[bn] = w, b
    return p


# ----------------------------- pure-JAX reference -----------------------------

def reference(nodes, coord, row, col, eattr, nattr, batch, size, p):
    silu = jax.nn.silu
    h = silu(nodes @ p["w_emb"] + p["b_emb"])
    rij = coord[row] - coord[col]
    radial = jnp.sum(rij * rij, axis=1, keepdims=True)
    e_in = jnp.concatenate([h[row], h[col], radial, eattr], axis=1)
    m = silu(e_in @ p["w_e1"] + p["b_e1"])
    m = silu(m @ p["w_e2"] + p["b_e2"])
    att = jax.nn.sigmoid(silu(m @ p["w_a1"] + p["b_a1"]) @ p["w_a2"] + p["b_a2"])
    edge_feat = m * att
    phi = silu(edge_feat @ p["w_c1"] + p["b_c1"]) @ p["w_c2"] + p["b_c2"]
    coord_new = coord + jax.ops.segment_sum(rij * phi, row, num_segments=nodes.shape[0])
    agg = jax.ops.segment_sum(edge_feat, row, num_segments=nodes.shape[0])
    n_in = jnp.concatenate([h, agg, nattr], axis=1)
    h = h + (silu(n_in @ p["w_n1"] + p["b_n1"]) @ p["w_n2"] + p["b_n2"])
    h = silu(h @ p["w_enc1"] + p["b_enc1"]) @ p["w_enc2"] + p["b_enc2"]
    g = jax.ops.segment_sum(h, batch, num_segments=size)
    out = silu(g @ p["w_d1"] + p["b_d1"]) @ p["w_d2"] + p["b_d2"]
    return out, coord_new


# ----------------------------- main ------------------------------------------

if __name__ == "__main__":
    key = jax.random.PRNGKey(0)
    k_nodes, k_coord, k_eattr, k_nattr, k_params = jax.random.split(key, 5)

    # module defaults: nodes(feat)=2, edge_nf=2, node_nf=2, hidden_nf=4
    NODE_DIM, EDGE_NF, NODE_NF, H = 2, 2, 2, 4
    N_PER_GRAPH, N_GRAPHS = 8, 4
    N = N_PER_GRAPH * N_GRAPHS
    EDGE_TILE = 128                    # default edge-block size (>=128 fills the MXU M dim)

    # fully-connected edges (no self loops) inside each graph
    row_l, col_l = [], []
    for g in range(N_GRAPHS):
        for a in range(N_PER_GRAPH):
            for b in range(N_PER_GRAPH):
                if a != b:
                    row_l.append(g * N_PER_GRAPH + a)
                    col_l.append(g * N_PER_GRAPH + b)
    row = np.asarray(row_l, np.int32)
    col = np.asarray(col_l, np.int32)
    E = row.shape[0]
    batch = np.repeat(np.arange(N_GRAPHS, dtype=np.int32), N_PER_GRAPH)

    nodes = jax.random.normal(k_nodes, (N, NODE_DIM), jnp.float32)
    coord = jax.random.normal(k_coord, (N, 3), jnp.float32)
    edge_attr = jax.random.normal(k_eattr, (E, EDGE_NF), jnp.float32)
    node_attr = jax.random.normal(k_nattr, (N, NODE_NF), jnp.float32)

    params = build_params(k_params, NODE_DIM, EDGE_NF, NODE_NF, H)
    w_slab, b_slab = pack_params(params)
    graph_in = prepare_graph(np.asarray(nodes), np.asarray(coord), np.asarray(edge_attr),
                             np.asarray(node_attr), row, col, batch, params, EDGE_TILE)

    out, coord_new = egnn_pallas(*graph_in, w_slab, b_slab,
                                 num_graphs=N_GRAPHS, edge_tile=EDGE_TILE)
    out = jax.block_until_ready(out)
    coord_new = jax.block_until_ready(coord_new)
    out = np.asarray(out)
    coord_new = np.asarray(coord_new)[:N]          # drop node padding rows

    # sanity check vs. pure-JAX reference of the PyTorch forward
    out_ref, coord_ref = reference(nodes, coord, jnp.asarray(row), jnp.asarray(col),
                                   edge_attr, node_attr, jnp.asarray(batch),
                                   N_GRAPHS, params)
    assert out.shape == (N_GRAPHS, 1) and coord_new.shape == (N, 3)
    # bf16 weights/activations (edge MLP, gathers, agg scatter) introduce ~1e-3..1e-2
    # relative error; the coord residual path itself stays f32.
    err_out = float(np.max(np.abs(out - np.asarray(out_ref))))
    err_coord = float(np.max(np.abs(coord_new - np.asarray(coord_ref))))
    assert np.allclose(out, np.asarray(out_ref), rtol=2e-2, atol=1e-2), err_out
    assert np.allclose(coord_new, np.asarray(coord_ref), rtol=2e-2, atol=2e-2), err_coord

    print("KERNEL_OK")
</pallas_src>

<mosaic_0001>
module attributes {stable_mosaic.version = 11 : i64} {
  func.func @egnn_kernel(%arg0: i32, %arg1: memref<1xi32, #tpu.memory_space<smem>>, %arg2: memref<128x2xi32, #tpu.memory_space<vmem>>, %arg3: memref<128x128xbf16, #tpu.memory_space<vmem>>, %arg4: memref<32x128xf32, #tpu.memory_space<vmem>>, %arg5: memref<32x128xf32, #tpu.memory_space<vmem>>, %arg6: memref<32x128xf32, #tpu.memory_space<vmem>>, %arg7: memref<1x32xi32, #tpu.memory_space<vmem>>, %arg8: memref<2048x128xbf16, #tpu.memory_space<vmem>>, %arg9: memref<16x128xf32, #tpu.memory_space<vmem>>, %arg10: memref<4x128xf32, #tpu.memory_space<vmem>>, %arg11: memref<32x128xf32, #tpu.memory_space<vmem>>, %arg12: memref<32x128xf32, #tpu.memory_space<vmem>>, %arg13: memref<64x128xbf16, #tpu.memory_space<vmem>>, %arg14: memref<64x128xf32, #tpu.memory_space<vmem>>, %arg15: memref<32x128xf32, #tpu.memory_space<vmem>>, %arg16: memref<32x128xf32, #tpu.memory_space<vmem>>) attributes {dimension_semantics = [#tpu.dimension_semantics<arbitrary>], iteration_bounds = array<i64: 2>, scalar_prefetch = 1 : i64, scratch_operands = 5 : i64, tpu.core_type = #tpu.core_type<tc>, window_params = [{transform_indices = @transform_0, window_bounds = array<i64: 128, 2>}, {transform_indices = @transform_1, window_bounds = array<i64: 128, 128>}, {pipeline_mode = #tpu.pipeline_mode<synchronous>, transform_indices = @transform_2, window_bounds = array<i64: 32, 128>}, {pipeline_mode = #tpu.pipeline_mode<synchronous>, transform_indices = @transform_3, window_bounds = array<i64: 32, 128>}, {pipeline_mode = #tpu.pipeline_mode<synchronous>, transform_indices = @transform_4, window_bounds = array<i64: 32, 128>}, {pipeline_mode = #tpu.pipeline_mode<synchronous>, transform_indices = @transform_5, window_bounds = array<i64: 1, 32>}, {pipeline_mode = #tpu.pipeline_mode<synchronous>, transform_indices = @transform_6, window_bounds = array<i64: 2048, 128>}, {pipeline_mode = #tpu.pipeline_mode<synchronous>, transform_indices = @transform_7, window_bounds = array<i64: 16, 128>}, {pipeline_mode = #tpu.pipeline_mode<synchronous>, transform_indices = @transform_8, window_bounds = array<i64: 4, 128>}, {pipeline_mode = #tpu.pipeline_mode<synchronous>, transform_indices = @transform_9, window_bounds = array<i64: 32, 128>}]} {
    %c0_i32 = arith.constant 0 : i32
    %0 = arith.cmpi eq, %arg0, %c0_i32 : i32
    %1 = arith.extui %0 : i1 to i32
    %c0_i32_0 = arith.constant 0 : i32
    %2 = arith.cmpi ne, %1, %c0_i32_0 : i32
    scf.if %2 {
      %c0_3 = arith.constant 0 : index
      %c0_4 = arith.constant 0 : index
      %10 = vector.load %arg4[%c0_3, %c0_4] : memref<32x128xf32, #tpu.memory_space<vmem>>, vector<32x128xf32>
      %c0_5 = arith.constant 0 : index
      %c0_6 = arith.constant 0 : index
      %11 = vector.load %arg8[%c0_5, %c0_6] : memref<2048x128xbf16, #tpu.memory_space<vmem>>, vector<128x128xbf16>
      %12 = arith.truncf %10 : vector<32x128xf32> to vector<32x128xbf16>
      %cst = arith.constant dense<0.000000e+00> : vector<32x128xf32>
      %13 = tpu.matmul %12, %11, %cst {dimension_numbers = #tpu.dot_dimension_numbers<[1], [0], [0], [1], [0, 0, 1, 1], [], []>} : vector<32x128xbf16>, vector<128x128xbf16>, vector<32x128xf32> -> vector<32x128xf32>
      %c0_7 = arith.constant 0 : index
      %c0_8 = arith.constant 0 : index
      %14 = vector.load %arg9[%c0_7, %c0_8] : memref<16x128xf32, #tpu.memory_space<vmem>>, vector<1x128xf32>
      %15 = vector.broadcast %14 : vector<1x128xf32> to vector<32x128xf32>
      %16 = arith.addf %13, %15 : vector<32x128xf32>
      %17 = arith.negf %16 : vector<32x128xf32>
      %18 = math.exp %17 : vector<32x128xf32>
      %cst_9 = arith.constant 1.000000e+00 : f32
      %19 = vector.broadcast %cst_9 : f32 to vector<32x128xf32>
      %20 = arith.addf %19, %18 : vector<32x128xf32>
      %21 = arith.divf %19, %20 : vector<32x128xf32>
      %22 = arith.mulf %16, %21 : vector<32x128xf32>
      %c0_10 = arith.constant 0 : index
      %c0_11 = arith.constant 0 : index
      %23 = vector.load %arg12[%c0_10, %c0_11] : memref<32x128xf32, #tpu.memory_space<vmem>>, vector<32x128xf32>
      tpu.vector_store %arg12[%c0_10, %c0_11], %22 {strides = array<i32>} : memref<32x128xf32, #tpu.memory_space<vmem>>, vector<32x128xf32>,
      %c128 = arith.constant 128 : index
      %c0_12 = arith.constant 0 : index
      %24 = vector.load %arg8[%c128, %c0_12] : memref<2048x128xbf16, #tpu.memory_space<vmem>>, vector<128x128xbf16>
      %25 = arith.truncf %22 : vector<32x128xf32> to vector<32x128xbf16>
      %cst_13 = arith.constant dense<0.000000e+00> : vector<32x128xf32>
      %26 = tpu.matmul %25, %24, %cst_13 {dimension_numbers = #tpu.dot_dimension_numbers<[1], [0], [0], [1], [0, 0, 1, 1], [], []>} : vector<32x128xbf16>, vector<128x128xbf16>, vector<32x128xf32> -> vector<32x128xf32>
      %27 = arith.truncf %26 : vector<32x128xf32> to vector<32x128xbf16>
      %c0_14 = arith.constant 0 : index
      %c0_15 = arith.constant 0 : index
      %28 = vector.load %arg13[%c0_14, %c0_15] : memref<64x128xbf16, #tpu.memory_space<vmem>>, vector<32x128xbf16>
      tpu.vector_store %arg13[%c0_14, %c0_15], %27 {strides = array<i32>} : memref<64x128xbf16, #tpu.memory_space<vmem>>, vector<32x128xbf16>,
      %c256 = arith.constant 256 : index
      %c0_16 = arith.constant 0 : index
      %29 = vector.load %arg8[%c256, %c0_16] : memref<2048x128xbf16, #tpu.memory_space<vmem>>, vector<128x128xbf16>
      %30 = arith.truncf %22 : vector<32x128xf32> to vector<32x128xbf16>
      %cst_17 = arith.constant dense<0.000000e+00> : vector<32x128xf32>
      %31 = tpu.matmul %30, %29, %cst_17 {dimension_numbers = #tpu.dot_dimension_numbers<[1], [0], [0], [1], [0, 0, 1, 1], [], []>} : vector<32x128xbf16>, vector<128x128xbf16>, vector<32x128xf32> -> vector<32x128xf32>
      %32 = arith.truncf %31 : vector<32x128xf32> to vector<32x128xbf16>
      %c32 = arith.constant 32 : index
      %c0_18 = arith.constant 0 : index
      %33 = vector.load %arg13[%c32, %c0_18] : memref<64x128xbf16, #tpu.memory_space<vmem>>, vector<32x128xbf16>
      tpu.vector_store %arg13[%c32, %c0_18], %32 {strides = array<i32>} : memref<64x128xbf16, #tpu.memory_space<vmem>>, vector<32x128xbf16>,
      %c0_19 = arith.constant 0 : index
      %c0_20 = arith.constant 0 : index
      %34 = vector.load %arg5[%c0_19, %c0_20] : memref<32x128xf32, #tpu.memory_space<vmem>>, vector<32x128xf32>
      %c0_21 = arith.constant 0 : index
      %c0_22 = arith.constant 0 : index
      %35 = vector.load %arg14[%c0_21, %c0_22] : memref<64x128xf32, #tpu.memory_space<vmem>>, vector<32x128xf32>
      tpu.vector_store %arg14[%c0_21, %c0_22], %34 {strides = array<i32>} : memref<64x128xf32, #tpu.memory_space<vmem>>, vector<32x128xf32>,
      %c0_23 = arith.constant 0 : index
      %c0_24 = arith.constant 0 : index
      %36 = vector.load %arg5[%c0_23, %c0_24] : memref<32x128xf32, #tpu.memory_space<vmem>>, vector<32x128xf32>
      %cst_25 = arith.constant 0.000000e+00 : f32
      %37 = vector.broadcast %cst_25 : f32 to vector<32x128xf32>
      %38 = arith.subf %37, %36 : vector<32x128xf32>
      %c32_26 = arith.constant 32 : index
      %c0_27 = arith.constant 0 : index
      %39 = vector.load %arg14[%c32_26, %c0_27] : memref<64x128xf32, #tpu.memory_space<vmem>>, vector<32x128xf32>
      tpu.vector_store %arg14[%c32_26, %c0_27], %38 {strides = array<i32>} : memref<64x128xf32, #tpu.memory_space<vmem>>, vector<32x128xf32>,
      %cst_28 = arith.constant 0.000000e+00 : f32
      %40 = vector.broadcast %cst_28 : f32 to vector<32x128xf32>
      %c0_29 = arith.constant 0 : index
      %c0_30 = arith.constant 0 : index
      %41 = vector.load %arg15[%c0_29, %c0_30] : memref<32x128xf32, #tpu.memory_space<vmem>>, vector<32x128xf32>
      tpu.vector_store %arg15[%c0_29, %c0_30], %40 {strides = array<i32>} : memref<32x128xf32, #tpu.memory_space<vmem>>, vector<32x128xf32>,
      %cst_31 = arith.constant 0.000000e+00 : f32
      %42 = vector.broadcast %cst_31 : f32 to vector<32x128xf32>
      %c0_32 = arith.constant 0 : index
      %c0_33 = arith.constant 0 : index
      %43 = vector.load %arg16[%c0_32, %c0_33] : memref<32x128xf32, #tpu.memory_space<vmem>>, vector<32x128xf32>
      tpu.vector_store %arg16[%c0_32, %c0_33], %42 {strides = array<i32>} : memref<32x128xf32, #tpu.memory_space<vmem>>, vector<32x128xf32>,
    } else {
    }
    %c0 = arith.constant 0 : index
    %3 = memref.load %arg1[%c0] : memref<1xi32, #tpu.memory_space<smem>>
    %4 = arith.cmpi slt, %arg0, %3 : i32
    %5 = arith.extui %4 : i1 to i32
    %c0_i32_1 = arith.constant 0 : i32
    %6 = arith.cmpi ne, %5, %c0_i32_1 : i32
    scf.if %6 {
      %c0_3 = arith.constant 0 : index
      %c0_4 = arith.constant 0 : index
      %10 = vector.load %arg2[%c0_3, %c0_4] : memref<128x2xi32, #tpu.memory_space<vmem>>, vector<128x2xi32>
      %11 = vector.extract_strided_slice %10 {offsets = [0, 0], sizes = [128, 1], strides = [1, 1]} : vector<128x2xi32> to vector<128x1xi32>
      %12 = vector.extract_strided_slice %10 {offsets = [0, 1], sizes = [128, 1], strides = [1, 1]} : vector<128x2xi32> to vector<128x1xi32>
      %13 = tpu.iota {dimensions = array<i32: 1>} : vector<128x64xi32>
      %14 = vector.broadcast %11 : vector<128x1xi32> to vector<128x64xi32>
      %15 = arith.cmpi eq, %13, %14 : vector<128x64xi32>
      %c32_i32 = arith.constant 32 : i32
      %16 = vector.broadcast %c32_i32 : i32 to vector<128x1xi32>
      %17 = arith.addi %12, %16 : vector<128x1xi32>
      %18 = vector.broadcast %17 : vector<128x1xi32> to vector<128x64xi32>
      %19 = arith.cmpi eq, %13, %18 : vector<128x64xi32>
      %20 = arith.ori %15, %19 : vector<128x64xi1>
      %21 = arith.extui %20 : vector<128x64xi1> to vector<128x64xi32>
      %22 = arith.sitofp %21 : vector<128x64xi32> to vector<128x64xf32>
      %23 = arith.truncf %22 : vector<128x64xf32> to vector<128x64xbf16>
      %24 = arith.extui %20 : vector<128x64xi1> to vector<128x64xi32>
      %25 = arith.sitofp %24 : vector<128x64xi32> to vector<128x64xf32>
      %c0_5 = arith.constant 0 : index
      %c0_6 = arith.constant 0 : index
      %26 = vector.load %arg13[%c0_5, %c0_6] : memref<64x128xbf16, #tpu.memory_space<vmem>>, vector<64x128xbf16>
      %cst = arith.constant dense<0.000000e+00> : vector<128x128xf32>
      %27 = tpu.matmul %23, %26, %cst {dimension_numbers = #tpu.dot_dimension_numbers<[1], [0], [0], [1], [0, 0, 1, 1], [], []>} : vector<128x64xbf16>, vector<64x128xbf16>, vector<128x128xf32> -> vector<128x128xf32>
      %c0_7 = arith.constant 0 : index
      %c0_8 = arith.constant 0 : index
      %28 = vector.load %arg14[%c0_7, %c0_8] : memref<64x128xf32, #tpu.memory_space<vmem>>, vector<64x128xf32>
      %cst_9 = arith.constant dense<0.000000e+00> : vector<128x128xf32>
      %29 = tpu.matmul %25, %28, %cst_9 {dimension_numbers = #tpu.dot_dimension_numbers<[1], [0], [0], [1], [0, 0, 1, 1], [], []>} : vector<128x64xf32>, vector<64x128xf32>, vector<128x128xf32> -> vector<128x128xf32>
      %30 = arith.mulf %29, %29 : vector<128x128xf32>
      %cst_10 = arith.constant dense<0.000000e+00> : vector<128xf32>
      %31 = vector.multi_reduction <add>, %30, %cst_10 [1] : vector<128x128xf32> to vector<128xf32>
      %32 = vector.shape_cast %31 : vector<128xf32> to vector<128x1xf32>
      %c1 = arith.constant 1 : index
      %c0_11 = arith.constant 0 : index
      %33 = vector.load %arg9[%c1, %c0_11] : memref<16x128xf32, #tpu.memory_space<vmem>>, vector<1x128xf32>
      %34 = vector.broadcast %32 : vector<128x1xf32> to vector<128x128xf32>
      %35 = vector.broadcast %33 : vector<1x128xf32> to vector<128x128xf32>
      %36 = arith.mulf %34, %35 : vector<128x128xf32>
      %37 = arith.addf %27, %36 : vector<128x128xf32>
      %c0_12 = arith.constant 0 : index
      %c0_13 = arith.constant 0 : index
      %38 = vector.load %arg3[%c0_12, %c0_13] : memref<128x128xbf16, #tpu.memory_space<vmem>>, vector<128x128xbf16>
      %39 = arith.extf %38 : vector<128x128xbf16> to vector<128x128xf32>
      %40 = arith.addf %37, %39 : vector<128x128xf32>
      %41 = arith.negf %40 : vector<128x128xf32>
      %42 = math.exp %41 : vector<128x128xf32>
      %cst_14 = arith.constant 1.000000e+00 : f32
      %43 = vector.broadcast %cst_14 : f32 to vector<128x128xf32>
      %44 = arith.addf %43, %42 : vector<128x128xf32>
      %45 = arith.divf %43, %44 : vector<128x128xf32>
      %46 = arith.mulf %40, %45 : vector<128x128xf32>
      %c384 = arith.constant 384 : index
      %c0_15 = arith.constant 0 : index
      %47 = vector.load %arg8[%c384, %c0_15] : memref<2048x128xbf16, #tpu.memory_space<vmem>>, vector<128x128xbf16>
      %48 = arith.truncf %46 : vector<128x128xf32> to vector<128x128xbf16>
      %cst_16 = arith.constant dense<0.000000e+00> : vector<128x128xf32>
      %49 = tpu.matmul %48, %47, %cst_16 {dimension_numbers = #tpu.dot_dimension_numbers<[1], [0], [0], [1], [0, 0, 1, 1], [], []>} : vector<128x128xbf16>, vector<128x128xbf16>, vector<128x128xf32> -> vector<128x128xf32>
      %c2 = arith.constant 2 : index
      %c0_17 = arith.constant 0 : index
      %50 = vector.load %arg9[%c2, %c0_17] : memref<16x128xf32, #tpu.memory_space<vmem>>, vector<1x128xf32>
      %51 = vector.broadcast %50 : vector<1x128xf32> to vector<128x128xf32>
      %52 = arith.addf %49, %51 : vector<128x128xf32>
      %53 = arith.negf %52 : vector<128x128xf32>
      %54 = math.exp %53 : vector<128x128xf32>
      %cst_18 = arith.constant 1.000000e+00 : f32
      %55 = vector.broadcast %cst_18 : f32 to vector<128x128xf32>
      %56 = arith.addf %55, %54 : vector<128x128xf32>
      %57 = arith.divf %55, %56 : vector<128x128xf32>
      %58 = arith.mulf %52, %57 : vector<128x128xf32>
      %c512 = arith.constant 512 : index
      %c0_19 = arith.constant 0 : index
      %59 = vector.load %arg8[%c512, %c0_19] : memref<2048x128xbf16, #tpu.memory_space<vmem>>, vector<128x128xbf16>
      %60 = arith.truncf %58 : vector<128x128xf32> to vector<128x128xbf16>
      %cst_20 = arith.constant dense<0.000000e+00> : vector<128x128xf32>
      %61 = tpu.matmul %60, %59, %cst_20 {dimension_numbers = #tpu.dot_dimension_numbers<[1], [0], [0], [1], [0, 0, 1, 1], [], []>} : vector<128x128xbf16>, vector<128x128xbf16>, vector<128x128xf32> -> vector<128x128xf32>
      %c3 = arith.constant 3 : index
      %c0_21 = arith.constant 0 : index
      %62 = vector.load %arg9[%c3, %c0_21] : memref<16x128xf32, #tpu.memory_space<vmem>>, vector<1x128xf32>
      %63 = vector.broadcast %62 : vector<1x128xf32> to vector<128x128xf32>
      %64 = arith.addf %61, %63 : vector<128x128xf32>
      %65 = arith.negf %64 : vector<128x128xf32>
      %66 = math.exp %65 : vector<128x128xf32>
      %cst_22 = arith.constant 1.000000e+00 : f32
      %67 = vector.broadcast %cst_22 : f32 to vector<128x128xf32>
      %68 = arith.addf %67, %66 : vector<128x128xf32>
      %69 = arith.divf %67, %68 : vector<128x128xf32>
      %70 = arith.mulf %64, %69 : vector<128x128xf32>
      %c640 = arith.constant 640 : index
      %c0_23 = arith.constant 0 : index
      %71 = vector.load %arg8[%c640, %c0_23] : memref<2048x128xbf16, #tpu.memory_space<vmem>>, vector<128x128xbf16>
      %72 = arith.truncf %70 : vector<128x128xf32> to vector<128x128xbf16>
      %cst_24 = arith.constant dense<0.000000e+00> : vector<128x128xf32>
      %73 = tpu.matmul %72, %71, %cst_24 {dimension_numbers = #tpu.dot_dimension_numbers<[1], [0], [0], [1], [0, 0, 1, 1], [], []>} : vector<128x128xbf16>, vector<128x128xbf16>, vector<128x128xf32> -> vector<128x128xf32>
      %c4 = arith.constant 4 : index
      %c0_25 = arith.constant 0 : index
      %74 = vector.load %arg9[%c4, %c0_25] : memref<16x128xf32, #tpu.memory_space<vmem>>, vector<1x128xf32>
      %75 = vector.broadcast %74 : vector<1x128xf32> to vector<128x128xf32>
      %76 = arith.addf %73, %75 : vector<128x128xf32>
      %77 = arith.negf %76 : vector<128x128xf32>
      %78 = math.exp %77 : vector<128x128xf32>
      %cst_26 = arith.constant 1.000000e+00 : f32
      %79 = vector.broadcast %cst_26 : f32 to vector<128x128xf32>
      %80 = arith.addf %79, %78 : vector<128x128xf32>
      %81 = arith.divf %79, %80 : vector<128x128xf32>
      %82 = arith.mulf %58, %81 : vector<128x128xf32>
      %c768 = arith.constant 768 : index
      %c0_27 = arith.constant 0 : index
      %83 = vector.load %arg8[%c768, %c0_27] : memref<2048x128xbf16, #tpu.memory_space<vmem>>, vector<128x128xbf16>
      %84 = arith.truncf %82 : vector<128x128xf32> to vector<128x128xbf16>
      %cst_28 = arith.constant dense<0.000000e+00> : vector<128x128xf32>
      %85 = tpu.matmul %84, %83, %cst_28 {dimension_numbers = #tpu.dot_dimension_numbers<[1], [0], [0], [1], [0, 0, 1, 1], [], []>} : vector<128x128xbf16>, vector<128x128xbf16>, vector<128x128xf32> -> vector<128x128xf32>
      %c5 = arith.constant 5 : index
      %c0_29 = arith.constant 0 : index
      %86 = vector.load %arg9[%c5, %c0_29] : memref<16x128xf32, #tpu.memory_space<vmem>>, vector<1x128xf32>
      %87 = vector.broadcast %86 : vector<1x128xf32> to vector<128x128xf32>
      %88 = arith.addf %85, %87 : vector<128x128xf32>
      %89 = arith.negf %88 : vector<128x128xf32>
      %90 = math.exp %89 : vector<128x128xf32>
      %cst_30 = arith.constant 1.000000e+00 : f32
      %91 = vector.broadcast %cst_30 : f32 to vector<128x128xf32>
      %92 = arith.addf %91, %90 : vector<128x128xf32>
      %93 = arith.divf %91, %92 : vector<128x128xf32>
      %94 = arith.mulf %88, %93 : vector<128x128xf32>
      %c896 = arith.constant 896 : index
      %c0_31 = arith.constant 0 : index
      %95 = vector.load %arg8[%c896, %c0_31] : memref<2048x128xbf16, #tpu.memory_space<vmem>>, vector<128x128xbf16>
      %96 = arith.truncf %94 : vector<128x128xf32> to vector<128x128xbf16>
      %cst_32 = arith.constant dense<0.000000e+00> : vector<128x128xf32>
      %97 = tpu.matmul %96, %95, %cst_32 {dimension_numbers = #tpu.dot_dimension_numbers<[1], [0], [0], [1], [0, 0, 1, 1], [], []>} : vector<128x128xbf16>, vector<128x128xbf16>, vector<128x128xf32> -> vector<128x128xf32>
      %c6 = arith.constant 6 : index
      %c0_33 = arith.constant 0 : index
      %98 = vector.load %arg9[%c6, %c0_33] : memref<16x128xf32, #tpu.memory_space<vmem>>, vector<1x128xf32>
      %99 = vector.broadcast %98 : vector<1x128xf32> to vector<128x128xf32>
      %100 = arith.addf %97, %99 : vector<128x128xf32>
      %101 = arith.mulf %29, %100 : vector<128x128xf32>
      %102 = vector.extract_strided_slice %23 {offsets = [0, 0], sizes = [128, 32], strides = [1, 1]} : vector<128x64xbf16> to vector<128x32xbf16>
      %103 = vector.extract_strided_slice %25 {offsets = [0, 0], sizes = [128, 32], strides = [1, 1]} : vector<128x64xf32> to vector<128x32xf32>
      %c0_34 = arith.constant 0 : index
      %c0_35 = arith.constant 0 : index
      %104 = vector.load %arg15[%c0_34, %c0_35] : memref<32x128xf32, #tpu.memory_space<vmem>>, vector<32x128xf32>
      %105 = arith.truncf %82 : vector<128x128xf32> to vector<128x128xbf16>
      %cst_36 = arith.constant dense<0.000000e+00> : vector<32x128xf32>
      %106 = tpu.matmul %102, %105, %cst_36 {dimension_numbers = #tpu.dot_dimension_numbers<[0], [0], [1], [1], [0, 1, 1, 1], [], []>} : vector<128x32xbf16>, vector<128x128xbf16>, vector<32x128xf32> -> vector<32x128xf32>
      %107 = arith.addf %104, %106 : vector<32x128xf32>
      %c0_37 = arith.constant 0 : index
      %c0_38 = arith.constant 0 : index
      %108 = vector.load %arg15[%c0_37, %c0_38] : memref<32x128xf32, #tpu.memory_space<vmem>>, vector<32x128xf32>
      tpu.vector_store %arg15[%c0_37, %c0_38], %107 {strides = array<i32>} : memref<32x128xf32, #tpu.memory_space<vmem>>, vector<32x128xf32>,
      %c0_39 = arith.constant 0 : index
      %c0_40 = arith.constant 0 : index
      %109 = vector.load %arg16[%c0_39, %c0_40] : memref<32x128xf32, #tpu.memory_space<vmem>>, vector<32x128xf32>
      %cst_41 = arith.constant dense<0.000000e+00> : vector<32x128xf32>
      %110 = tpu.matmul %103, %101, %cst_41 {dimension_numbers = #tpu.dot_dimension_numbers<[0], [0], [1], [1], [0, 1, 1, 1], [], []>} : vector<128x32xf32>, vector<128x128xf32>, vector<32x128xf32> -> vector<32x128xf32>
      %111 = arith.addf %109, %110 : vector<32x128xf32>
      %c0_42 = arith.constant 0 : index
      %c0_43 = arith.constant 0 : index
      %112 = vector.load %arg16[%c0_42, %c0_43] : memref<32x128xf32, #tpu.memory_space<vmem>>, vector<32x128xf32>
      tpu.vector_store %arg16[%c0_42, %c0_43], %111 {strides = array<i32>} : memref<32x128xf32, #tpu.memory_space<vmem>>, vector<32x128xf32>,
    } else {
    }
    %c1_i32 = arith.constant 1 : i32
    %7 = arith.cmpi eq, %arg0, %c1_i32 : i32
    %8 = arith.extui %7 : i1 to i32
    %c0_i32_2 = arith.constant 0 : i32
    %9 = arith.cmpi ne, %8, %c0_i32_2 : i32
    scf.if %9 {
      %c0_3 = arith.constant 0 : index
      %c0_4 = arith.constant 0 : index
      %10 = vector.load %arg12[%c0_3, %c0_4] : memref<32x128xf32, #tpu.memory_space<vmem>>, vector<32x128xf32>
      %c0_5 = arith.constant 0 : index
      %c0_6 = arith.constant 0 : index
      %11 = vector.load %arg5[%c0_5, %c0_6] : memref<32x128xf32, #tpu.memory_space<vmem>>, vector<32x128xf32>
      %c0_7 = arith.constant 0 : index
      %c0_8 = arith.constant 0 : index
      %12 = vector.load %arg16[%c0_7, %c0_8] : memref<32x128xf32, #tpu.memory_space<vmem>>, vector<32x128xf32>
      %13 = arith.addf %11, %12 : vector<32x128xf32>
      %c0_9 = arith.constant 0 : index
      %c0_10 = arith.constant 0 : index
      %14 = vector.load %arg11[%c0_9, %c0_10] : memref<32x128xf32, #tpu.memory_space<vmem>>, vector<32x128xf32>
      tpu.vector_store %arg11[%c0_9, %c0_10], %13 {strides = array<i32>} : memref<32x128xf32, #tpu.memory_space<vmem>>, vector<32x128xf32>,
      %c0_11 = arith.constant 0 : index
      %c0_12 = arith.constant 0 : index
      %15 = vector.load %arg15[%c0_11, %c0_12] : memref<32x128xf32, #tpu.memory_space<vmem>>, vector<32x128xf32>
      %c0_13 = arith.constant 0 : index
      %c0_14 = arith.constant 0 : index
      %16 = vector.load %arg6[%c0_13, %c0_14] : memref<32x128xf32, #tpu.memory_space<vmem>>, vector<32x128xf32>
      %17 = tpu.concatenate %10, %15, %16 in 1 : vector<32x128xf32>, vector<32x128xf32>, vector<32x128xf32> -> vector<32x384xf32>
      %c1024 = arith.constant 1024 : index
      %c0_15 = arith.constant 0 : index
      %18 = vector.load %arg8[%c1024, %c0_15] : memref<2048x128xbf16, #tpu.memory_space<vmem>>, vector<384x128xbf16>
      %19 = arith.truncf %17 : vector<32x384xf32> to vector<32x384xbf16>
      %cst = arith.constant dense<0.000000e+00> : vector<32x128xf32>
      %20 = tpu.matmul %19, %18, %cst {dimension_numbers = #tpu.dot_dimension_numbers<[1], [0], [0], [1], [0, 0, 1, 1], [], []>} : vector<32x384xbf16>, vector<384x128xbf16>, vector<32x128xf32> -> vector<32x128xf32>
      %c7 = arith.constant 7 : index
      %c0_16 = arith.constant 0 : index
      %21 = vector.load %arg9[%c7, %c0_16] : memref<16x128xf32, #tpu.memory_space<vmem>>, vector<1x128xf32>
      %22 = vector.broadcast %21 : vector<1x128xf32> to vector<32x128xf32>
      %23 = arith.addf %20, %22 : vector<32x128xf32>
      %24 = arith.negf %23 : vector<32x128xf32>
      %25 = math.exp %24 : vector<32x128xf32>
      %cst_17 = arith.constant 1.000000e+00 : f32
      %26 = vector.broadcast %cst_17 : f32 to vector<32x128xf32>
      %27 = arith.addf %26, %25 : vector<32x128xf32>
      %28 = arith.divf %26, %27 : vector<32x128xf32>
      %29 = arith.mulf %23, %28 : vector<32x128xf32>
      %c1408 = arith.constant 1408 : index
      %c0_18 = arith.constant 0 : index
      %30 = vector.load %arg8[%c1408, %c0_18] : memref<2048x128xbf16, #tpu.memory_space<vmem>>, vector<128x128xbf16>
      %31 = arith.truncf %29 : vector<32x128xf32> to vector<32x128xbf16>
      %cst_19 = arith.constant dense<0.000000e+00> : vector<32x128xf32>
      %32 = tpu.matmul %31, %30, %cst_19 {dimension_numbers = #tpu.dot_dimension_numbers<[1], [0], [0], [1], [0, 0, 1, 1], [], []>} : vector<32x128xbf16>, vector<128x128xbf16>, vector<32x128xf32> -> vector<32x128xf32>
      %c8 = arith.constant 8 : index
      %c0_20 = arith.constant 0 : index
      %33 = vector.load %arg9[%c8, %c0_20] : memref<16x128xf32, #tpu.memory_space<vmem>>, vector<1x128xf32>
      %34 = vector.broadcast %33 : vector<1x128xf32> to vector<32x128xf32>
      %35 = arith.addf %32, %34 : vector<32x128xf32>
      %36 = arith.addf %10, %35 : vector<32x128xf32>
      %c1536 = arith.constant 1536 : index
      %c0_21 = arith.constant 0 : index
      %37 = vector.load %arg8[%c1536, %c0_21] : memref<2048x128xbf16, #tpu.memory_space<vmem>>, vector<128x128xbf16>
      %38 = arith.truncf %36 : vector<32x128xf32> to vector<32x128xbf16>
      %cst_22 = arith.constant dense<0.000000e+00> : vector<32x128xf32>
      %39 = tpu.matmul %38, %37, %cst_22 {dimension_numbers = #tpu.dot_dimension_numbers<[1], [0], [0], [1], [0, 0, 1, 1], [], []>} : vector<32x128xbf16>, vector<128x128xbf16>, vector<32x128xf32> -> vector<32x128xf32>
      %c9 = arith.constant 9 : index
      %c0_23 = arith.constant 0 : index
      %40 = vector.load %arg9[%c9, %c0_23] : memref<16x128xf32, #tpu.memory_space<vmem>>, vector<1x128xf32>
      %41 = vector.broadcast %40 : vector<1x128xf32> to vector<32x128xf32>
      %42 = arith.addf %39, %41 : vector<32x128xf32>
      %43 = arith.negf %42 : vector<32x128xf32>
      %44 = math.exp %43 : vector<32x128xf32>
      %cst_24 = arith.constant 1.000000e+00 : f32
      %45 = vector.broadcast %cst_24 : f32 to vector<32x128xf32>
      %46 = arith.addf %45, %44 : vector<32x128xf32>
      %47 = arith.divf %45, %46 : vector<32x128xf32>
      %48 = arith.mulf %42, %47 : vector<32x128xf32>
      %c1664 = arith.constant 1664 : index
      %c0_25 = arith.constant 0 : index
      %49 = vector.load %arg8[%c1664, %c0_25] : memref<2048x128xbf16, #tpu.memory_space<vmem>>, vector<128x128xbf16>
      %50 = arith.truncf %48 : vector<32x128xf32> to vector<32x128xbf16>
      %cst_26 = arith.constant dense<0.000000e+00> : vector<32x128xf32>
      %51 = tpu.matmul %50, %49, %cst_26 {dimension_numbers = #tpu.dot_dimension_numbers<[1], [0], [0], [1], [0, 0, 1, 1], [], []>} : vector<32x128xbf16>, vector<128x128xbf16>, vector<32x128xf32> -> vector<32x128xf32>
      %c10 = arith.constant 10 : index
      %c0_27 = arith.constant 0 : index
      %52 = vector.load %arg9[%c10, %c0_27] : memref<16x128xf32, #tpu.memory_space<vmem>>, vector<1x128xf32>
      %53 = vector.broadcast %52 : vector<1x128xf32> to vector<32x128xf32>
      %54 = arith.addf %51, %53 : vector<32x128xf32>
      %55 = tpu.iota {dimensions = array<i32: 0>} : vector<4x32xi32>
      %c0_28 = arith.constant 0 : index
      %c0_29 = arith.constant 0 : index
      %56 = vector.load %arg7[%c0_28, %c0_29] : memref<1x32xi32, #tpu.memory_space<vmem>>, vector<1x32xi32>
      %57 = vector.broadcast %56 : vector<1x32xi32> to vector<4x32xi32>
      %58 = arith.cmpi eq, %55, %57 : vector<4x32xi32>
      %59 = arith.extui %58 : vector<4x32xi1> to vector<4x32xi32>
      %60 = arith.sitofp %59 : vector<4x32xi32> to vector<4x32xf32>
      %cst_30 = arith.constant dense<0.000000e+00> : vector<4x128xf32>
      %61 = tpu.matmul %60, %54, %cst_30 {dimension_numbers = #tpu.dot_dimension_numbers<[1], [0], [0], [1], [0, 0, 1, 1], [], []>} : vector<4x32xf32>, vector<32x128xf32>, vector<4x128xf32> -> vector<4x128xf32>
      %c1792 = arith.constant 1792 : index
      %c0_31 = arith.constant 0 : index
      %62 = vector.load %arg8[%c1792, %c0_31] : memref<2048x128xbf16, #tpu.memory_space<vmem>>, vector<128x128xbf16>
      %63 = arith.truncf %61 : vector<4x128xf32> to vector<4x128xbf16>
      %cst_32 = arith.constant dense<0.000000e+00> : vector<4x128xf32>
      %64 = tpu.matmul %63, %62, %cst_32 {dimension_numbers = #tpu.dot_dimension_numbers<[1], [0], [0], [1], [0, 0, 1, 1], [], []>} : vector<4x128xbf16>, vector<128x128xbf16>, vector<4x128xf32> -> vector<4x128xf32>
      %c11 = arith.constant 11 : index
      %c0_33 = arith.constant 0 : index
      %65 = vector.load %arg9[%c11, %c0_33] : memref<16x128xf32, #tpu.memory_space<vmem>>, vector<1x128xf32>
      %66 = vector.broadcast %65 : vector<1x128xf32> to vector<4x128xf32>
      %67 = arith.addf %64, %66 : vector<4x128xf32>
      %68 = arith.negf %67 : vector<4x128xf32>
      %69 = math.exp %68 : vector<4x128xf32>
      %cst_34 = arith.constant 1.000000e+00 : f32
      %70 = vector.broadcast %cst_34 : f32 to vector<4x128xf32>
      %71 = arith.addf %70, %69 : vector<4x128xf32>
      %72 = arith.divf %70, %71 : vector<4x128xf32>
      %73 = arith.mulf %67, %72 : vector<4x128xf32>
      %c1920 = arith.constant 1920 : index
      %c0_35 = arith.constant 0 : index
      %74 = vector.load %arg8[%c1920, %c0_35] : memref<2048x128xbf16, #tpu.memory_space<vmem>>, vector<128x128xbf16>
      %75 = arith.truncf %73 : vector<4x128xf32> to vector<4x128xbf16>
      %cst_36 = arith.constant dense<0.000000e+00> : vector<4x128xf32>
      %76 = tpu.matmul %75, %74, %cst_36 {dimension_numbers = #tpu.dot_dimension_numbers<[1], [0], [0], [1], [0, 0, 1, 1], [], []>} : vector<4x128xbf16>, vector<128x128xbf16>, vector<4x128xf32> -> vector<4x128xf32>
      %c12 = arith.constant 12 : index
      %c0_37 = arith.constant 0 : index
      %77 = vector.load %arg9[%c12, %c0_37] : memref<16x128xf32, #tpu.memory_space<vmem>>, vector<1x128xf32>
      %78 = vector.broadcast %77 : vector<1x128xf32> to vector<4x128xf32>
      %79 = arith.addf %76, %78 : vector<4x128xf32>
      %c0_38 = arith.constant 0 : index
      %c0_39 = arith.constant 0 : index
      %80 = vector.load %arg10[%c0_38, %c0_39] : memref<4x128xf32, #tpu.memory_space<vmem>>, vector<4x128xf32>
      tpu.vector_store %arg10[%c0_38, %c0_39], %79 {strides = array<i32>} : memref<4x128xf32, #tpu.memory_space<vmem>>, vector<4x128xf32>,
    } else {
    }
    return
  }
  func.func @transform_0(%arg0: i32, %arg1: memref<1xi32, #tpu.memory_space<smem>>) -> (i32, i32) {
    %c0_i32 = arith.constant 0 : i32
    %c0_i32_0 = arith.constant 0 : i32
    return %arg0, %c0_i32 : i32, i32
  }
  func.func @transform_1(%arg0: i32, %arg1: memref<1xi32, #tpu.memory_space<smem>>) -> (i32, i32) {
    %c0_i32 = arith.constant 0 : i32
    %c0_i32_0 = arith.constant 0 : i32
    return %arg0, %c0_i32 : i32, i32
  }
  func.func @transform_2(%arg0: i32, %arg1: memref<1xi32, #tpu.memory_space<smem>>) -> (i32, i32) {
    %c0_i32 = arith.constant 0 : i32
    %c0_i32_0 = arith.constant 0 : i32
    %c0_i32_1 = arith.constant 0 : i32
    return %c0_i32, %c0_i32_0 : i32, i32
  }
  func.func @transform_3(%arg0: i32, %arg1: memref<1xi32, #tpu.memory_space<smem>>) -> (i32, i32) {
    %c0_i32 = arith.constant 0 : i32
    %c0_i32_0 = arith.constant 0 : i32
    %c0_i32_1 = arith.constant 0 : i32
    return %c0_i32, %c0_i32_0 : i32, i32
  }
  func.func @transform_4(%arg0: i32, %arg1: memref<1xi32, #tpu.memory_space<smem>>) -> (i32, i32) {
    %c0_i32 = arith.constant 0 : i32
    %c0_i32_0 = arith.constant 0 : i32
    %c0_i32_1 = arith.constant 0 : i32
    return %c0_i32, %c0_i32_0 : i32, i32
  }
  func.func @transform_5(%arg0: i32, %arg1: memref<1xi32, #tpu.memory_space<smem>>) -> (i32, i32) {
    %c0_i32 = arith.constant 0 : i32
    %c0_i32_0 = arith.constant 0 : i32
    %c0_i32_1 = arith.constant 0 : i32
    return %c0_i32, %c0_i32_0 : i32, i32
  }
  func.func @transform_6(%arg0: i32, %arg1: memref<1xi32, #tpu.memory_space<smem>>) -> (i32, i32) {
    %c0_i32 = arith.constant 0 : i32
    %c0_i32_0 = arith.constant 0 : i32
    %c0_i32_1 = arith.constant 0 : i32
    return %c0_i32, %c0_i32_0 : i32, i32
  }
  func.func @transform_7(%arg0: i32, %arg1: memref<1xi32, #tpu.memory_space<smem>>) -> (i32, i32) {
    %c0_i32 = arith.constant 0 : i32
    %c0_i32_0 = arith.constant 0 : i32
    %c0_i32_1 = arith.constant 0 : i32
    return %c0_i32, %c0_i32_0 : i32, i32
  }
  func.func @transform_8(%arg0: i32, %arg1: memref<1xi32, #tpu.memory_space<smem>>) -> (i32, i32) {
    %c0_i32 = arith.constant 0 : i32
    %c0_i32_0 = arith.constant 0 : i32
    %c0_i32_1 = arith.constant 0 : i32
    return %c0_i32, %c0_i32_0 : i32, i32
  }
  func.func @transform_9(%arg0: i32, %arg1: memref<1xi32, #tpu.memory_space<smem>>) -> (i32, i32) {
    %c0_i32 = arith.constant 0 : i32
    %c0_i32_0 = arith.constant 0 : i32
    %c0_i32_1 = arith.constant 0 : i32
    return %c0_i32, %c0_i32_0 : i32, i32
  }
}

</mosaic_0001>

<bundles_post_ra>
// kernel: egnn_pallas.1
= control target key start
LH: loop header
LB: loop body
LE: loop exit
PB: predicated region body
PF: predicated region fallthrough
CT: control target
= control target key end

     0   :  { %s7437_s0 = inlined_call_operand.<no memory space> [shape: s32[1], index: 0, kind: input, shape index: {}]   ;;  %s7438_s1 = inlined_call_operand.vmem [shape: s32[256,2], index: 1, kind: input, shape index: {}]   ;;  %s7439_s2 = inlined_call_operand.vmem [shape: bf16[256,128], index: 2, kind: input, shape index: {}]   ;;  %s7440_s3 = inlined_call_operand.vmem [shape: f32[32,128], index: 3, kind: input, shape index: {}]   ;;  %s7441_s4 = inlined_call_operand.vmem [shape: f32[32,128], index: 4, kind: input, shape index: {}]   ;;  %s7442_s5 = inlined_call_operand.vmem [shape: f32[32,128], index: 5, kind: input, shape index: {}]   ;;  %s7443_s6 = inlined_call_operand.vmem [shape: s32[1,32], index: 6, kind: input, shape index: {}]   ;;  %s7444_s7 = inlined_call_operand.hbm [shape: bf16[2048,128], index: 7, kind: input, shape index: {}]   ;;  %s7445_s8 = inlined_call_operand.vmem [shape: f32[16,128], index: 8, kind: input, shape index: {}]   ;;  %s7446_s9 = inlined_call_operand.vmem [shape: f32[4,128], index: 9, kind: output, shape index: {0}]   ;;  %s7447_s10 = inlined_call_operand.vmem [shape: f32[32,128], index: 10, kind: output, shape index: {1}]  }
   0x1   :  { %16 = sst [smem:[#allocation8]] %s7437_s0 }
   0x2   :  { %17 = vsyncpa [#allocation10], 0  ;;  %s6149_s15 = smov 0  }
   0x3 LB: > { %s271_s18 = sshll.u32 %s7444_s7, 4  ;;  %s6158_s19 = sadd.s32 4294967295, %s6080_s15   ;;  %s6080_s15 = sphi %s6149_s15, %s23_s15   ;;  %s272_s18 = int_to_ptr.hbm [resolvable:$true] %s271_s18 }
   0x4   : > { %p4707_p0 = scmp.ge.s32.totalorder %s6080_s15, 1  ;;  %p248_p1 = scmp.lt.s32.totalorder %s6080_s15, 3 }
   0x5   : > { %p4708_p2 = scmp.ne.s32.totalorder %s6158_s19, 0  ;;  %p5613_p3 = scmp.eq.s32.totalorder %s6158_s19, 0 }
   0x6   : > { %p249_p4 = pnand %p4707_p0, %p248_p1  ;;  %s6082_s0 = smov [#allocation9]  }
   0x7   : > { %s273_s20 = sshll.u32 %s6082_s0, 4  ;;  %s6083_s21 = smov 64   ;;  %s274_s20 = int_to_ptr.vmem [resolvable:$true] %s273_s20 }
   0x8   : > { %p5609_p5 = pneg %p249_p4  ;;  %s6084_s22 = smov 4  }
   0x9   : > { %310 = sbr.rel (%p249_p4) target bundleno = 3098 (0xc1a), region = 52 }
   0xa   : > { %p5610_p6 = pnand %p5613_p3, %p5609_p5 }
   0xc   : > { %5612 = dma.hbm_to_vmem [thread:$0]  (!%p5610_p6), %s272_s18, 16384, %s274_s20, [#allocation10], %s6083_s21, %s6083_s21, %s6084_s22  }
   0xe   : > { %6075 = dma.done.wait (%p5613_p3), [#allocation10], 16384  }
   0xf   : > { %6077 = vsyncadd (%p5613_p3), [#allocation10], 4294950912  ;;  %s4712_s23 = sshll.u32 %s6158_s19, 4 }
  0x10   : > { %p348_p7 = scmp.lt.s32.totalorder %s4712_s23, 31  ;;  %363 = sbr.rel (%p4708_p2) target bundleno = 380 (0x17c), region = 60 }
  0x12   : > { %s7499_s23 = smov (!%p348_p7, %s4712_s23), 31 }
  0x13   : > { %s4713_s24 = sshll.u32 %s7499_s23, 3  ;;  %s4715_s25 = sshll.u32 %s7499_s23, 2 }
  0x14   : > { %s6168_s28 = scalar_lea.vmem %s7438_s1, %s4713_s24  ;;  %s6173_s11 = scalar_lea.vmem %s7439_s2, %s4715_s25 }
  0x15   : > { %v5391_v0 = vld [vmem:[#allocation9 + $0x38] sm:$0xff]  ;;  %v5390_v1 = vld [vmem:[#allocation9 + $0x30] sm:$0xff]  ;;  %v5389_v2 = vld [vmem:[#allocation9 + $0x28] sm:$0xff] }
  0x16   : > { %436 = vmatpush.bf16.msra.mxu0 %v5391_v0  ;;  %5578 = vmatpush.bf16.msra.mxu3 %v5391_v0  ;;  %v5388_v3 = vld [vmem:[#allocation9 + $0x20] sm:$0xff]  ;;  %v5387_v4 = vld [vmem:[#allocation9 + $0x18] sm:$0xff]  ;;  %v5386_v5 = vld [vmem:[#allocation9 + $0x10] sm:$0xff] }
  0x17   : > { %v5385_v6 = vld [vmem:[#allocation9 + $0x8] sm:$0xff]  ;;  %v5384_v7 = vld [vmem:[#allocation9] sm:$0xff]  ;;  %v366_v10 = vld [vmem:[%s7440_s3 + $0x10] sm:$0xff] }
  0x18   : > { %v364_v8 = vld [vmem:[%s7440_s3] sm:$0xff]  ;;  %v365_v9 = vld [vmem:[%s7440_s3 + $0x8] sm:$0xff]  ;;  %v367_v11 = vld [vmem:[%s7440_s3 + $0x18] sm:$0xff] }
  0x19   : > { %v384_v12 = vpack.c.bf16 %v365_v9, %v364_v8  ;;  %v385_v13 = vpack.c.bf16 %v367_v11, %v366_v10  ;;  %v5399_v14 = vld [vmem:[#allocation9 + $0x78] sm:$0xff]  ;;  %v5398_v16 = vld [vmem:[#allocation9 + $0x70] sm:$0xff]  ;;  %v5397_v18 = vld [vmem:[#allocation9 + $0x68] sm:$0xff] }
  0x1a   : > { %437 = vmatpush.bf16.msra.mxu0 %v5390_v1  ;;  %5579 = vmatpush.bf16.msra.mxu3 %v5390_v1  ;;  %v5407_v15 = vld [vmem:[#allocation9 + $0xb8] sm:$0xff]  ;;  %v5406_v17 = vld [vmem:[#allocation9 + $0xb0] sm:$0xff]  ;;  %v5405_v19 = vld [vmem:[#allocation9 + $0xa8] sm:$0xff] }
  0x1b   : > { %605 = vmatpush.bf16.msra.mxu1 %v5399_v14  ;;  %696 = vmatpush.bf16.msra.mxu2 %v5407_v15  ;;  %v5396_v20 = vld [vmem:[#allocation9 + $0x60] sm:$0xff]  ;;  %v5395_v22 = vld [vmem:[#allocation9 + $0x58] sm:$0xff]  ;;  %v5394_v26 = vld [vmem:[#allocation9 + $0x50] sm:$0xff] }
  0x1c   : > { %v5404_v21 = vld [vmem:[#allocation9 + $0xa0] sm:$0xff]  ;;  %v5403_v23 = vld [vmem:[#allocation9 + $0x98] sm:$0xff]  ;;  %v5402_v27 = vld [vmem:[#allocation9 + $0x90] sm:$0xff] }
  0x1d   : > { %v5631_v24 = vld [vmem:[%s7445_s8] ss:$0 sm:$0xff]  ;;  %v5393_v30 = vld [vmem:[#allocation9 + $0x48] sm:$0xff] }
  0x1e   : > { %438 = vmatpush.bf16.msra.mxu0 %v5389_v2  ;;  %5580 = vmatpush.bf16.msra.mxu3 %v5389_v2  ;;  %v5401_v31 = vld [vmem:[#allocation9 + $0x88] sm:$0xff]  ;;  %v5392_v35 = vld [vmem:[#allocation9 + $0x40] sm:$0xff] }
  0x1f   : > { %606 = vmatpush.bf16.msra.mxu1 %v5398_v16  ;;  %697 = vmatpush.bf16.msra.mxu2 %v5406_v17  ;;  %v5400_v36 = vld [vmem:[#allocation9 + $0x80] sm:$0xff] }
  0x22   : > { %439 = vmatpush.bf16.msra.mxu0 %v5388_v3  ;;  %5581 = vmatpush.bf16.msra.mxu3 %v5388_v3 }
  0x23   : > { %607 = vmatpush.bf16.msra.mxu1 %v5397_v18  ;;  %698 = vmatpush.bf16.msra.mxu2 %v5405_v19 }
  0x26   : > { %440 = vmatpush.bf16.msra.mxu0 %v5387_v4  ;;  %5582 = vmatpush.bf16.msra.mxu3 %v5387_v4 }
  0x27   : > { %608 = vmatpush.bf16.msra.mxu1 %v5396_v20  ;;  %699 = vmatpush.bf16.msra.mxu2 %v5404_v21 }
  0x2a   : > { %441 = vmatpush.bf16.msra.mxu0 %v5386_v5  ;;  %5583 = vmatpush.bf16.msra.mxu3 %v5386_v5 }
  0x2b   : > { %609 = vmatpush.bf16.msra.mxu1 %v5395_v22  ;;  %700 = vmatpush.bf16.msra.mxu2 %v5403_v23 }
  0x2e   : > { %442 = vmatpush.bf16.msra.mxu0 %v5385_v6  ;;  %5584 = vmatpush.bf16.msra.mxu3 %v5385_v6 }
  0x2f   : > { %610 = vmatpush.bf16.msra.mxu1 %v5394_v26  ;;  %701 = vmatpush.bf16.msra.mxu2 %v5402_v27 }
  0x32   : > { %443 = vmatpush.bf16.msra.mxu0 %v5384_v7  ;;  %5585 = vmatpush.bf16.msra.mxu3 %v5384_v7 }
  0x33   : > { %611 = vmatpush.bf16.msra.mxu1 %v5393_v30  ;;  %702 = vmatpush.bf16.msra.mxu2 %v5401_v31 }
  0x35   : > { %444 = vmatmul.bf16.vlgmr.msra.gmra.mxu0 %v384_v12  ;;  %449 = vmatmul.bf16.vlgmr.msra.gmra.mxu3 %v385_v13 }
  0x37   : > { %612 = vmatpush.bf16.msra.mxu1 %v5392_v35  ;;  %703 = vmatpush.bf16.msra.mxu2 %v5400_v36  ;;  %v725_v35 = vld [vmem:[%s7441_s4 + $0x10] sm:$0xff] }
  0x38   : > { %729 = vst [vmem:[#allocation4 + $0x20] sm:$0xff] %v725_v35 }
  0xb2   : > { %v445_v25 = vpop.f32.mrf.mxu0 }
  0xb3   : > { %v446_v28 = vadd.f32 %v5631_v24, %v445_v25 }
  0xb5   : > { %v4749_v29 = vmul.f32 -1.442695, %v446_v28 }
  0xb7   : > { %5632 = vpow2.f32 %v4749_v29 }
  0xb8   : > { %v450_v32 = vpop.f32.mrf.mxu3 }
  0xb9   : > { %v6192_v33 = vadd.f32 %v5631_v24, %v450_v32 }
  0xba   : > { %v447_v34 = vpop.f32.mrf.mxu0 }
  0xbb   : > { %v4751_v37 = vmul.f32 -1.442695, %v6192_v33  ;;  %v6195_v38 = vadd.f32 %v5631_v24, %v447_v34  ;;  %v724_v34 = vld [vmem:[%s7441_s4 + $0x8] sm:$0xff] }
  0xbc   : > { %728 = vst [vmem:[#allocation4 + $0x8] sm:$0xff] %v724_v34 }
  0xbd   : > { %v5633_v39 = vpop.eup %5632  ;;  %5634 = vpow2.f32 %v4751_v37  ;;  %v4750_v40 = vmul.f32 -1.442695, %v6195_v38  ;;  %v726_v37 = vld [vmem:[%s7441_s4 + $0x18] sm:$0xff] }
  0xbe   : > { %v467_v41 = vadd.f32 1.0, %v5633_v39  ;;  %v736_v39 = vsub.f32 0.0, %v724_v34  ;;  %730 = vst [vmem:[#allocation4 + $0x18] sm:$0xff] %v726_v37 }
  0xbf   : > { %5636 = vpow2.f32 %v4750_v40  ;;  %v737_v40 = vsub.f32 0.0, %v725_v35 }
  0xc0   : > { %5638 = vrcp.f32 %v467_v41  ;;  %v452_v42 = vpop.f32.mrf.mxu3  ;;  %v482_v52 = vand.u32 2147483648, %v467_v41  ;;  %v480_v55 = vand.u32 2147483647, %v467_v41  ;;  %vm476_vm1 = vweird.f32 %v467_v41  ;;  %740 = vst [vmem:[#allocation4 + $0x30] sm:$0xff] %v736_v39 }
  0xc1   : > { %v6198_v43 = vadd.f32 %v5631_v24, %v452_v42  ;;  %741 = vst [vmem:[#allocation4 + $0x10] sm:$0xff] %v737_v40 }
  0xc2   : > { %v483_v60 = vor.u32 1.1754944e-38, %v482_v52  ;;  %vm481_vm3 = vcmp.eq.f32.partialorder %v480_v55, 8.507059e+37 }
  0xc3   : > { %v5635_v44 = vpop.eup %5634  ;;  %v4752_v45 = vmul.f32 -1.442695, %v6198_v43 }
  0xc4   : > { %v469_v46 = vadd.f32 1.0, %v5635_v44  ;;  %v6085_v44 = vmov 0.0  }
  0xc5   : > { %v5637_v47 = vpop.eup %5636  ;;  %5640 = vpow2.f32 %v4752_v45  ;;  %743 = vst [vmem:[#allocation5] sm:$0xff] %v6085_v44 }
  0xc6   : > { %v5639_v48 = vpop.eup %5638  ;;  %5642 = vrcp.f32 %v469_v46  ;;  %v468_v50 = vadd.f32 1.0, %v5637_v47  ;;  %vm506_vm4 = vweird.f32 %v469_v46  ;;  %v512_v1 = vand.u32 2147483648, %v469_v46  ;;  %744 = vst [vmem:[#allocation5 + $0x10] sm:$0xff] %v6085_v44 }
  0xc7   : > { %v472_v49 = vmul.f32 %v5639_v48, %v467_v41  ;;  %vm477_vm0 = vweird.f32 %v5639_v48  ;;  %v510_v5 = vand.u32 2147483647, %v469_v46  ;;  %v738_v41 = vsub.f32 0.0, %v726_v37  ;;  %745 = vst [vmem:[#allocation5 + $0x18] sm:$0xff] %v6085_v44 }
  0xc8   : > { %5644 = vrcp.f32 %v468_v50  ;;  %vm478_vm2 = vmor %vm476_vm1, %vm477_vm0  ;;  %v497_v8 = vand.u32 2147483648, %v468_v50  ;;  %v513_v10 = vor.u32 1.1754944e-38, %v512_v1  ;;  %v495_v12 = vand.u32 2147483647, %v468_v50  ;;  %746 = vst [vmem:[#allocation5 + $0x8] sm:$0xff] %v6085_v44 }
  0xc9   : > { %v473_v51 = vsub.f32 1.0, %v472_v49  ;;  %vm511_vm8 = vcmp.eq.f32.partialorder %v510_v5, 8.507059e+37  ;;  %vm491_vm9 = vweird.f32 %v468_v50  ;;  %742 = vst [vmem:[#allocation4 + $0x38] sm:$0xff] %v738_v41 }
  0xca   : > { %v498_v18 = vor.u32 1.1754944e-38, %v497_v8  ;;  %vm496_vm11 = vcmp.eq.f32.partialorder %v495_v12, 8.507059e+37  ;;  %747 = vst [vmem:[#allocation6 + $0x8] sm:$0xff] %v6085_v44 }
  0xcb   : > { %v5641_v53 = vpop.eup %5640  ;;  %v474_v54 = vmul.f32 %v5639_v48, %v473_v51  ;;  %748 = vst [vmem:[#allocation6] sm:$0xff] %v6085_v44 }
  0xcc   : > { %v5643_v56 = vpop.eup %5642  ;;  %v470_v57 = vadd.f32 1.0, %v5641_v53  ;;  %749 = vst [vmem:[#allocation6 + $0x10] sm:$0xff] %v6085_v44 }
  0xcd   : > { %v475_v58 = vadd.f32 %v5639_v48, %v474_v54  ;;  %v502_v59 = vmul.f32 %v5643_v56, %v469_v46  ;;  %vm507_vm5 = vweird.f32 %v5643_v56  ;;  %750 = vst [vmem:[#allocation6 + $0x18] sm:$0xff] %v6085_v44 }
  0xce   : > { %5646 = vrcp.f32 %v470_v57  ;;  %v5645_v61 = vpop.eup %5644  ;;  %vm508_vm6 = vmor %vm506_vm4, %vm507_vm5  ;;  %v527_v21 = vand.u32 2147483648, %v470_v57  ;;  %v525_v24 = vand.u32 2147483647, %v470_v57  ;;  %vm521_vm13 = vweird.f32 %v470_v57 }
  0xcf   : > { %v479_v62 = vsel %vm478_vm2, %v5639_v48, %v475_v58  ;;  %v503_v63 = vsub.f32 1.0, %v502_v59  ;;  %v487_v2 = vmul.f32 %v5645_v61, %v468_v50  ;;  %vm492_vm7 = vweird.f32 %v5645_v61 }
  0xd0   : > { %v484_v0 = vsel %vm481_vm3, %v483_v60, %v479_v62  ;;  %vm493_vm10 = vmor %vm491_vm9, %vm492_vm7  ;;  %v528_v27 = vor.u32 1.1754944e-38, %v527_v21  ;;  %vm526_vm15 = vcmp.eq.f32.partialorder %v525_v24, 8.507059e+37 }
  0xd1   : > { %v531_v3 = vmul.f32 %v484_v0, %v446_v28  ;;  %v504_v4 = vmul.f32 %v5643_v56, %v503_v63  ;;  %v488_v6 = vsub.f32 1.0, %v487_v2 }
  0xd3   : > { %535 = vst [vmem:[#allocation2 + $0x10] sm:$0xff] %v531_v3  ;;  %v505_v7 = vadd.f32 %v5643_v56, %v504_v4  ;;  %v489_v11 = vmul.f32 %v5645_v61, %v488_v6 }
  0xd4   : > { %v5647_v9 = vpop.eup %5646 }
  0xd5   : > { %v509_v13 = vsel %vm508_vm6, %v5643_v56, %v505_v7  ;;  %v517_v14 = vmul.f32 %v5647_v9, %v470_v57  ;;  %v490_v16 = vadd.f32 %v5645_v61, %v489_v11  ;;  %vm522_vm12 = vweird.f32 %v5647_v9 }
  0xd6   : > { %v514_v15 = vsel %vm511_vm8, %v513_v10, %v509_v13  ;;  %vm523_vm14 = vmor %vm521_vm13, %vm522_vm12 }
  0xd7   : > { %v533_v17 = vmul.f32 %v514_v15, %v6192_v33  ;;  %v518_v19 = vsub.f32 1.0, %v517_v14  ;;  %v494_v20 = vsel %vm493_vm10, %v5645_v61, %v490_v16  ;;  %v723_v33 = vld [vmem:[%s7441_s4] sm:$0xff] }
  0xd8   : > { %v499_v22 = vsel %vm496_vm11, %v498_v18, %v494_v20  ;;  %727 = vst [vmem:[#allocation4] sm:$0xff] %v723_v33 }
  0xd9   : > { %537 = vst [vmem:[#allocation2 + $0x18] sm:$0xff] %v533_v17  ;;  %v519_v23 = vmul.f32 %v5647_v9, %v518_v19  ;;  %v532_v25 = vmul.f32 %v499_v22, %v6195_v38  ;;  %v735_v38 = vsub.f32 0.0, %v723_v33 }
  0xdb   : > { %v520_v26 = vadd.f32 %v5647_v9, %v519_v23  ;;  %536 = vst [vmem:[#allocation2] sm:$0xff] %v532_v25  ;;  %v555_v28 = vpack.c.bf16 %v532_v25, %v531_v3 }
  0xdc   : > { %739 = vst [vmem:[#allocation4 + $0x28] sm:$0xff] %v735_v38 }
  0xdd   : > { %v524_v29 = vsel %vm523_vm14, %v5647_v9, %v520_v26  ;;  %613 = vmatmul.bf16.vlgmr.msra.gmra.mxu1 %v555_v28  ;;  %704 = vmatmul.bf16.vlgmr.msra.gmra.mxu2 %v555_v28 }
  0xde   : > { %v529_v30 = vsel %vm526_vm15, %v528_v27, %v524_v29 }
  0xdf   : > { %v534_v31 = vmul.f32 %v529_v30, %v6198_v43 }
  0xe1   : > { %538 = vst [vmem:[#allocation2 + $0x8] sm:$0xff] %v534_v31  ;;  %v556_v32 = vpack.c.bf16 %v534_v31, %v533_v17 }
  0xed   : > { %618 = vmatmul.bf16.gmra.mxu1 %v556_v32  ;;  %709 = vmatmul.bf16.gmra.mxu2 %v556_v32 }
 0x15a   : > { %v614_v36 = vpop.f32.mrf.mxu1 }
 0x160   : > { %v705_v42 = vpop.f32.mrf.mxu2 }
 0x162   : > { %v616_v43 = vpop.f32.mrf.mxu1 }
 0x163   : > { %v5519_v45 = vpack.c.bf16 %v616_v43, %v614_v36 }
 0x165   : > { %5520 = vst [vmem:[#allocation3] sm:$0xff] %v5519_v45  }
 0x168   : > { %v707_v46 = vpop.f32.mrf.mxu2 }
 0x169   : > { %v5529_v47 = vpack.c.bf16 %v707_v46, %v705_v42 }
 0x16a   : > { %v619_v48 = vpop.f32.mrf.mxu1 }
 0x16b   : > { %5569 = vst [vmem:[#allocation3 + $0x8] sm:$0xff] %v5529_v47  }
 0x170   : > { %v710_v49 = vpop.f32.mrf.mxu2 }
 0x172   : > { %v621_v50 = vpop.f32.mrf.mxu1 }
 0x173   : > { %v5524_v51 = vpack.c.bf16 %v621_v50, %v619_v48 }
 0x175   : > { %5568 = vst [vmem:[#allocation3 + $0x18] sm:$0xff] %v5524_v51  }
 0x178   : > { %v712_v52 = vpop.f32.mrf.mxu2 }
 0x179   : > { %v5534_v53 = vpack.c.bf16 %v712_v52, %v710_v49 }
 0x17b   : > { %5570 = vst [vmem:[#allocation3 + $0x10] sm:$0xff] %v5534_v53  }
 0x17c PF: > { %s751_s13 = sld [smem:[#allocation8]] }
 0x182   : > { %p4817_p8 = scmp.ge.s32.totalorder %s6158_s19, %s751_s13 }
 0x184   : > { %755 = sbr.rel (%p4817_p8) target bundleno = 1943 (0x797), region = 64 }
 0x189   : > { %v757_v54 = vld [vmem:[%s6168_s28 + $0x8] sm:$0xff]  ;;  %v756_v55 = vld [vmem:[%s6168_s28] sm:$0xff]  ;;  %v6086_v56 = vmov 0   ;;  %v758_v57 = vld [vmem:[%s6168_s28 + $0x10] sm:$0xff]  ;;  %v6087_v61 = vmov 1   ;;  %v772_v39 = vlaneseq  ;;  %vm998_vm5 = vcmask 523264  }
 0x18a   : > { %5650 = vset.pattern.permute.xlu1 %v6086_v56  ;;  %5648 = vset.pattern.permute.xlu0 %v6086_v56  ;;  %v839_v58 = vadd.s32 32, %v757_v54  ;;  %v838_v59 = vadd.s32 32, %v756_v55  ;;  %v840_v60 = vadd.s32 32, %v758_v57  ;;  %v759_v62 = vld [vmem:[%s6168_s28 + $0x18] sm:$0xff]  ;;  %v760_v0 = vld [vmem:[%s6168_s28 + $0x20] sm:$0xff]  ;;  %v762_v1 = vld [vmem:[%s6168_s28 + $0x30] sm:$0xff] }
 0x18b   : > { %778 = vperm.xlu1 %5650, %v757_v54   ;;  %775 = vperm.xlu0 %5648, %v756_v55   ;;  %v841_v63 = vadd.s32 32, %v759_v62  ;;  %v842_v2 = vadd.s32 32, %v760_v0  ;;  %v844_v3 = vadd.s32 32, %v762_v1  ;;  %v761_v4 = vld [vmem:[%s6168_s28 + $0x28] sm:$0xff]  ;;  %v763_v7 = vld [vmem:[%s6168_s28 + $0x38] sm:$0xff]  ;;  %v764_v11 = vld [vmem:[%s6168_s28 + $0x40] sm:$0xff] }
 0x18c   : > { %5652 = vset.pattern.permute.xlu2 %v6086_v56  ;;  %v843_v5 = vadd.s32 32, %v761_v4  ;;  %v765_v6 = vld [vmem:[%s6168_s28 + $0x48] sm:$0xff]  ;;  %v845_v8 = vadd.s32 32, %v763_v7  ;;  %v767_v9 = vld [vmem:[%s6168_s28 + $0x58] sm:$0xff]  ;;  %v846_v12 = vadd.s32 32, %v764_v11  ;;  %v770_v14 = vld [vmem:[%s6168_s28 + $0x70] sm:$0xff] }
 0x18d   : > { %781 = vperm.xlu2 %5652, %v758_v57   ;;  %v849_v10 = vadd.s32 32, %v767_v9  ;;  %v847_v13 = vadd.s32 32, %v765_v6  ;;  %v766_v15 = vld [vmem:[%s6168_s28 + $0x50] sm:$0xff]  ;;  %v997_v17 = vld [vmem:[#allocation4 + $0x38] sm:$0xff]  ;;  %v768_v19 = vld [vmem:[%s6168_s28 + $0x60] sm:$0xff]  ;;  %v852_v29 = vadd.s32 32, %v770_v14 }
 0x18e   : > { %v848_v16 = vadd.s32 32, %v766_v15  ;;  %v996_v18 = vld [vmem:[#allocation4 + $0x10] sm:$0xff]  ;;  %1055 = vmatpush.msra.mxu0 %v997_v17  ;;  %v850_v20 = vadd.s32 32, %v768_v19  ;;  %v769_v21 = vld [vmem:[%s6168_s28 + $0x68] sm:$0xff]  ;;  %v993_v26 = vld [vmem:[#allocation4 + $0x18] sm:$0xff]  ;;  %v6256_v41 = vand.u32 127, %v772_v39 }
 0x18f   : > { %v995_v22 = vld [vmem:[#allocation4 + $0x30] sm:$0xff]  ;;  %v994_v23 = vld [vmem:[#allocation4 + $0x28] sm:$0xff]  ;;  %v851_v25 = vadd.s32 32, %v769_v21  ;;  %v992_v28 = vld [vmem:[#allocation4 + $0x20] sm:$0xff]  ;;  %v6088_v44 = vmov 0.0  }
 0x190   : > { %1056 = vmatpush.msra.mxu0 %v996_v18  ;;  %v5411_v24 = vld [vmem:[#allocation3 + $0x10] sm:$0xff]  ;;  %v5410_v27 = vld [vmem:[#allocation3 + $0x8] sm:$0xff]  ;;  %v5409_v31 = vld [vmem:[#allocation3 + $0x18] sm:$0xff] }
 0x191   : > { %1270 = vmatpush.bf16.msra.mxu1 %v5411_v24  ;;  %v991_v30 = vld [vmem:[#allocation4 + $0x8] sm:$0xff]  ;;  %v990_v32 = vld [vmem:[#allocation4] sm:$0xff]  ;;  %v771_v33 = vld [vmem:[%s6168_s28 + $0x78] sm:$0xff] }
 0x192   : > { %1057 = vmatpush.msra.mxu0 %v995_v22  ;;  %v5408_v34 = vld [vmem:[#allocation3] sm:$0xff]  ;;  %v853_v35 = vadd.s32 32, %v771_v33 }
 0x193   : > { %5651 = vset.pattern.permute.xlu1 %v6087_v61  ;;  %5649 = vset.pattern.permute.xlu0 %v6087_v61 }
 0x194   : > { %858 = vperm.xlu1 %5651, %v839_v58   ;;  %855 = vperm.xlu0 %5649, %v838_v59  }
 0x195   : > { %5653 = vset.pattern.permute.xlu2 %v6087_v61  ;;  %1058 = vmatpush.msra.mxu0 %v994_v23 }
 0x196   : > { %861 = vperm.xlu2 %5653, %v840_v60   ;;  %1271 = vmatpush.bf16.msra.mxu1 %v5410_v27 }
 0x197   : > { %1059 = vmatpush.msra.mxu0 %v993_v26 }
 0x199   : > { %1060 = vmatpush.msra.mxu0 %v992_v28 }
 0x19a   : > { %1272 = vmatpush.bf16.msra.mxu1 %v5409_v31 }
 0x19b   : > { %1061 = vmatpush.msra.mxu0 %v991_v30 }
 0x19c   : > { %5654 = vset.pattern.permute.xlu1 %v6086_v56  ;;  %5655 = vset.pattern.permute.xlu0 %v6086_v56 }
 0x19d   : > { %784 = vperm.xlu1 %5654, %v759_v62   ;;  %787 = vperm.xlu0 %5655, %v760_v0  }
 0x19e   : > { %864 = vperm.xlu2 %5653, %v841_v63   ;;  %1062 = vmatpush.msra.mxu0 %v990_v32 }
 0x19f   : > { %1273 = vmatpush.bf16.msra.mxu1 %v5408_v34 }
 0x1a5   : > { %5656 = vset.pattern.permute.xlu1 %v6087_v61  ;;  %5658 = vset.pattern.permute.xlu0 %v6087_v61 }
 0x1a6   : > { %867 = vperm.xlu1 %5656, %v842_v2   ;;  %873 = vperm.xlu0 %5658, %v844_v3  }
 0x1a7   : > { %5657 = vset.pattern.permute.xlu2 %v6086_v56 }
 0x1a8   : > { %790 = vperm.xlu2 %5657, %v761_v4  }
 0x1ae   : > { %870 = vperm.xlu1 %5656, %v843_v5   ;;  %5661 = vset.pattern.permute.xlu0 %v6086_v56 }
 0x1af   : > { %802 = vperm.xlu0 %5661, %v765_v6  }
 0x1b0   : > { %793 = vperm.xlu2 %5657, %v762_v1  }
 0x1b6   : > { %5659 = vset.pattern.permute.xlu1 %v6086_v56 }
 0x1b7   : > { %796 = vperm.xlu1 %5659, %v763_v7   ;;  %5664 = vset.pattern.permute.xlu0 %v6087_v61 }
 0x1b8   : > { %5660 = vset.pattern.permute.xlu2 %v6087_v61  ;;  %888 = vperm.xlu0 %5664, %v849_v10  }
 0x1b9   : > { %876 = vperm.xlu2 %5660, %v845_v8  }
 0x1bf   : > { %799 = vperm.xlu1 %5659, %v764_v11  }
 0x1c0   : > { %5667 = vset.pattern.permute.xlu0 %v6086_v56 }
 0x1c1   : > { %879 = vperm.xlu2 %5660, %v846_v12   ;;  %817 = vperm.xlu0 %5667, %v770_v14  }
 0x1c7   : > { %5662 = vset.pattern.permute.xlu1 %v6087_v61 }
 0x1c8   : > { %882 = vperm.xlu1 %5662, %v847_v13  }
 0x1c9   : > { %5663 = vset.pattern.permute.xlu2 %v6086_v56  ;;  %5670 = vset.pattern.permute.xlu0 %v6087_v61 }
 0x1ca   : > { %805 = vperm.xlu2 %5663, %v766_v15  }
 0x1d0   : > { %885 = vperm.xlu1 %5662, %v848_v16  }
 0x1d2   : > { %808 = vperm.xlu2 %5663, %v767_v9  }
 0x1d8   : > { %5665 = vset.pattern.permute.xlu1 %v6086_v56 }
 0x1d9   : > { %811 = vperm.xlu1 %5665, %v768_v19  }
 0x1da   : > { %5666 = vset.pattern.permute.xlu2 %v6087_v61 }
 0x1db   : > { %891 = vperm.xlu2 %5666, %v850_v20  }
 0x1e1   : > { %814 = vperm.xlu1 %5665, %v769_v21  }
 0x1e3   : > { %894 = vperm.xlu2 %5666, %v851_v25  }
 0x1e7   : > { %v782_v36 = vpop.permute.xlu2 %781 }
 0x1e8   : > { %vm824_vm8 = vcmp.eq.s32.totalorder %v6256_v41, %v782_v36 }
 0x1e9   : > { %5668 = vset.pattern.permute.xlu1 %v6087_v61 }
 0x1ea   : > { %897 = vperm.xlu1 %5668, %v852_v29  }
 0x1eb   : > { %5669 = vset.pattern.permute.xlu2 %v6086_v56 }
 0x1ec   : > { %820 = vperm.xlu2 %5669, %v771_v33  }
 0x1f0   : > { %v862_v40 = vpop.permute.xlu2 %861 }
 0x1f1   : > { %vm904_vm9 = vcmp.eq.s32.totalorder %v6256_v41, %v862_v40 }
 0x1f2   : > { %900 = vperm.xlu1 %5668, %v853_v35   ;;  %vm920_vm12 = vmor %vm824_vm8, %vm904_vm9 }
 0x1f3   : > { %v6288_v56 = vsel %vm920_vm12, 1.0, %v6088_v44 }
 0x1f4   : > { %v968_v59 = vpack.c.bf16 %v6288_v56, %v6288_v56 }
 0x1f6   : > { %v1196_v63 = vunpack.c.l.b16 %v968_v59 }
 0x1f8   : > { %v865_v48 = vpop.permute.xlu2 %864 }
 0x1f9   : > { %vm905_vm7 = vcmp.eq.s32.totalorder %v6256_v41, %v865_v48 }
 0x1fd   : > { %v776_v37 = vpop.permute.xlu0 %775  ;;  %v779_v38 = vpop.permute.xlu1 %778 }
 0x1fe   : > { %vm823_vm0 = vcmp.eq.s32.totalorder %v6256_v41, %v779_v38  ;;  %vm822_vm3 = vcmp.eq.s32.totalorder %v6256_v41, %v776_v37 }
 0x202   : > { %v791_v54 = vpop.permute.xlu2 %790 }
 0x203   : > { %vm827_vm15 = vcmp.eq.s32.totalorder %v6256_v41, %v791_v54 }
 0x206   : > { %v859_v42 = vpop.permute.xlu1 %858  ;;  %v856_v43 = vpop.permute.xlu0 %855 }
 0x207   : > { %vm903_vm1 = vcmp.eq.s32.totalorder %v6256_v41, %v859_v42  ;;  %vm902_vm2 = vcmp.eq.s32.totalorder %v6256_v41, %v856_v43 }
 0x208   : > { %vm919_vm4 = vmor %vm823_vm0, %vm903_vm1 }
 0x209   : > { %v6263_v45 = vsel %vm919_vm4, 1.0, %v6088_v44  ;;  %vm918_vm6 = vmor %vm822_vm3, %vm902_vm2 }
 0x20a   : > { %v967_v46 = vpack.c.bf16 %v6263_v45, %v6263_v45  ;;  %v6268_v47 = vsel %vm918_vm6, 1.0, %v6088_v44  ;;  %v794_v62 = vpop.permute.xlu2 %793 }
 0x20b   : > { %v966_v49 = vpack.c.bf16 %v6268_v47, %v6268_v47  ;;  %4834 = vmatmul.msk.f32.vlgmr.msra.gmra.mxu0 %vm998_vm5, %v6268_v47  ;;  %vm828_vm3 = vcmp.eq.s32.totalorder %v6256_v41, %v794_v62 }
 0x20c   : > { %v1195_v50 = vunpack.c.l.b16 %v967_v46 }
 0x20d   : > { %v1194_v51 = vunpack.c.l.b16 %v966_v49 }
 0x20f   : > { %v785_v52 = vpop.permute.xlu1 %784  ;;  %v6275_v53 = vpack.c.b16 %v1195_v50, %v1194_v51  ;;  %v788_v60 = vpop.permute.xlu0 %787 }
 0x210   : > { %vm825_vm10 = vcmp.eq.s32.totalorder %v6256_v41, %v785_v52  ;;  %vm826_vm14 = vcmp.eq.s32.totalorder %v6256_v41, %v788_v60 }
 0x211   : > { %vm921_vm11 = vmor %vm825_vm10, %vm905_vm7  ;;  %4866 = vmatmul.msk.bf16.vlgmr.msra.gmra.mxu1 %vm998_vm5, %v6275_v53 }
 0x212   : > { %v6285_v55 = vsel %vm921_vm11, 1.0, %v6088_v44 }
 0x213   : > { %4835 = vmatmul.msk.f32.gmra.mxu0 %vm998_vm5, %v6263_v45  ;;  %v969_v57 = vpack.c.bf16 %v6285_v55, %v6285_v55  ;;  %v877_v6 = vpop.permute.xlu2 %876 }
 0x214   : > { %vm909_vm7 = vcmp.eq.s32.totalorder %v6256_v41, %v877_v6 }
 0x215   : > { %v1197_v61 = vunpack.c.l.b16 %v969_v57 }
 0x217   : > { %v6299_v0 = vpack.c.b16 %v1197_v61, %v1196_v63 }
 0x218   : > { %v868_v58 = vpop.permute.xlu1 %867  ;;  %v874_v10 = vpop.permute.xlu0 %873 }
 0x219   : > { %vm906_vm13 = vcmp.eq.s32.totalorder %v6256_v41, %v868_v58  ;;  %vm908_vm4 = vcmp.eq.s32.totalorder %v6256_v41, %v874_v10 }
 0x21a   : > { %vm922_vm0 = vmor %vm826_vm14, %vm906_vm13 }
 0x21b   : > { %4836 = vmatmul.msk.f32.gmra.mxu0 %vm998_vm5, %v6288_v56  ;;  %v6305_v2 = vsel %vm922_vm0, 1.0, %v6088_v44  ;;  %v880_v12 = vpop.permute.xlu2 %879  ;;  %vm924_vm8 = vmor %vm828_vm3, %vm908_vm4 }
 0x21c   : > { %v970_v5 = vpack.c.bf16 %v6305_v2, %v6305_v2  ;;  %v6332_v15 = vsel %vm924_vm8, 1.0, %v6088_v44  ;;  %vm910_vm11 = vcmp.eq.s32.totalorder %v6256_v41, %v880_v12 }
 0x21d   : > { %v972_v17 = vpack.c.bf16 %v6332_v15, %v6332_v15 }
 0x21e   : > { %v1198_v8 = vunpack.c.l.b16 %v970_v5 }
 0x21f   : > { %v1200_v21 = vunpack.c.l.b16 %v972_v17 }
 0x220   : > { %v871_v1 = vpop.permute.xlu1 %870 }
 0x221   : > { %4867 = vmatmul.msk.bf16.gmra.mxu1 %vm998_vm5, %v6299_v0  ;;  %vm907_vm1 = vcmp.eq.s32.totalorder %v6256_v41, %v871_v1  ;;  %v803_v22 = vpop.permute.xlu0 %802 }
 0x222   : > { %vm923_vm2 = vmor %vm827_vm15, %vm907_vm1  ;;  %vm831_vm13 = vcmp.eq.s32.totalorder %v6256_v41, %v803_v22 }
 0x223   : > { %4837 = vmatmul.msk.f32.gmra.mxu0 %vm998_vm5, %v6285_v55  ;;  %v6310_v3 = vsel %vm923_vm2, 1.0, %v6088_v44 }
 0x224   : > { %v971_v4 = vpack.c.bf16 %v6310_v3, %v6310_v3  ;;  %v806_v18 = vpop.permute.xlu2 %805 }
 0x225   : > { %vm832_vm2 = vcmp.eq.s32.totalorder %v6256_v41, %v806_v18 }
 0x226   : > { %v1199_v7 = vunpack.c.l.b16 %v971_v4 }
 0x228   : > { %v6320_v11 = vpack.c.b16 %v1199_v7, %v1198_v8 }
 0x229   : > { %v797_v9 = vpop.permute.xlu1 %796 }
 0x22a   : > { %vm829_vm6 = vcmp.eq.s32.totalorder %v6256_v41, %v797_v9  ;;  %v889_v30 = vpop.permute.xlu0 %888 }
 0x22b   : > { %4838 = vmatmul.msk.f32.gmra.mxu0 %vm998_vm5, %v6305_v2  ;;  %vm925_vm9 = vmor %vm829_vm6, %vm909_vm7  ;;  %vm913_vm1 = vcmp.eq.s32.totalorder %v6256_v41, %v889_v30 }
 0x22c   : > { %v6329_v14 = vsel %vm925_vm9, 1.0, %v6088_v44  ;;  %v809_v25 = vpop.permute.xlu2 %808 }
 0x22d   : > { %v973_v16 = vpack.c.bf16 %v6329_v14, %v6329_v14  ;;  %vm833_vm0 = vcmp.eq.s32.totalorder %v6256_v41, %v809_v25 }
 0x22e   : > { %vm929_vm4 = vmor %vm833_vm0, %vm913_vm1 }
 0x22f   : > { %v1201_v20 = vunpack.c.l.b16 %v973_v16  ;;  %v6370_v37 = vsel %vm929_vm4, 1.0, %v6088_v44 }
 0x230   : > { %v977_v40 = vpack.c.bf16 %v6370_v37, %v6370_v37 }
 0x231   : > { %4868 = vmatmul.msk.bf16.gmra.mxu1 %vm998_vm5, %v6320_v11  ;;  %v800_v13 = vpop.permute.xlu1 %799  ;;  %v6344_v23 = vpack.c.b16 %v1201_v20, %v1200_v21 }
 0x232   : > { %vm830_vm10 = vcmp.eq.s32.totalorder %v6256_v41, %v800_v13  ;;  %v1205_v46 = vunpack.c.l.b16 %v977_v40 }
 0x233   : > { %4839 = vmatmul.msk.f32.gmra.mxu0 %vm998_vm5, %v6310_v3  ;;  %vm926_vm14 = vmor %vm830_vm10, %vm910_vm11  ;;  %v818_v43 = vpop.permute.xlu0 %817 }
 0x234   : > { %v6354_v27 = vsel %vm926_vm14, 1.0, %v6088_v44  ;;  %vm836_vm9 = vcmp.eq.s32.totalorder %v6256_v41, %v818_v43 }
 0x235   : > { %v974_v29 = vpack.c.bf16 %v6354_v27, %v6354_v27  ;;  %v892_v34 = vpop.permute.xlu2 %891 }
 0x236   : > { %vm914_vm8 = vcmp.eq.s32.totalorder %v6256_v41, %v892_v34 }
 0x237   : > { %v1202_v32 = vunpack.c.l.b16 %v974_v29 }
 0x23a   : > { %v883_v19 = vpop.permute.xlu1 %882 }
 0x23b   : > { %4840 = vmatmul.msk.f32.gmra.mxu0 %vm998_vm5, %v6332_v15  ;;  %vm911_vm12 = vcmp.eq.s32.totalorder %v6256_v41, %v883_v19 }
 0x23c   : > { %vm927_vm15 = vmor %vm831_vm13, %vm911_vm12 }
 0x23d   : > { %v6351_v26 = vsel %vm927_vm15, 1.0, %v6088_v44  ;;  %v895_v39 = vpop.permute.xlu2 %894 }
 0x23e   : > { %v975_v28 = vpack.c.bf16 %v6351_v26, %v6351_v26  ;;  %vm915_vm11 = vcmp.eq.s32.totalorder %v6256_v41, %v895_v39  ;;  %v5419_v39 = vld [vmem:[#allocation9 + $0xf8] sm:$0xff] }
 0x23f   : > { %1757 = vmatpush.bf16.msra.mxu2 %v5419_v39 }
 0x240   : > { %v1203_v31 = vunpack.c.l.b16 %v975_v28 }
 0x241   : > { %4869 = vmatmul.msk.bf16.gmra.mxu1 %vm998_vm5, %v6344_v23 }
 0x242   : > { %v886_v24 = vpop.permute.xlu1 %885  ;;  %v1214_v35 = vpack.c.b16 %v1203_v31, %v1202_v32 }
 0x243   : > { %4841 = vmatmul.msk.f32.gmra.mxu0 %vm998_vm5, %v6329_v14  ;;  %vm912_vm3 = vcmp.eq.s32.totalorder %v6256_v41, %v886_v24 }
 0x244   : > { %vm928_vm6 = vmor %vm832_vm2, %vm912_vm3 }
 0x245   : > { %v6373_v38 = vsel %vm928_vm6, 1.0, %v6088_v44 }
 0x246   : > { %v976_v42 = vpack.c.bf16 %v6373_v38, %v6373_v38  ;;  %v821_v51 = vpop.permute.xlu2 %820 }
 0x247   : > { %vm837_vm0 = vcmp.eq.s32.totalorder %v6256_v41, %v821_v51 }
 0x248   : > { %v1204_v48 = vunpack.c.l.b16 %v976_v42  ;;  %v5418_v42 = vld [vmem:[#allocation9 + $0xf0] sm:$0xff] }
 0x249   : > { %1758 = vmatpush.bf16.msra.mxu2 %v5418_v42 }
 0x24a   : > { %v1215_v50 = vpack.c.b16 %v1205_v46, %v1204_v48  ;;  %v5417_v46 = vld [vmem:[#allocation9 + $0xe8] sm:$0xff] }
 0x24b   : > { %4842 = vmatmul.msk.f32.gmra.mxu0 %vm998_vm5, %v6354_v27  ;;  %v812_v33 = vpop.permute.xlu1 %811 }
 0x24c   : > { %vm834_vm7 = vcmp.eq.s32.totalorder %v6256_v41, %v812_v33 }
 0x24d   : > { %vm930_vm12 = vmor %vm834_vm7, %vm914_vm8  ;;  %1759 = vmatpush.bf16.msra.mxu2 %v5417_v46 }
 0x24e   : > { %v6395_v57 = vsel %vm930_vm12, 1.0, %v6088_v44 }
 0x24f   : > { %v978_v61 = vpack.c.bf16 %v6395_v57, %v6395_v57 }
 0x251   : > { %4870 = vmatmul.msk.bf16.gmra.mxu1 %vm998_vm5, %v1214_v35  ;;  %v1206_v5 = vunpack.c.l.b16 %v978_v61 }
 0x253   : > { %4843 = vmatmul.msk.f32.gmra.mxu0 %vm998_vm5, %v6351_v26  ;;  %v815_v36 = vpop.permute.xlu1 %814 }
 0x254   : > { %vm835_vm10 = vcmp.eq.s32.totalorder %v6256_v41, %v815_v36 }
 0x255   : > { %vm931_vm15 = vmor %vm835_vm10, %vm915_vm11 }
 0x256   : > { %v6392_v54 = vsel %vm931_vm15, 1.0, %v6088_v44 }
 0x257   : > { %v979_v60 = vpack.c.bf16 %v6392_v54, %v6392_v54 }
 0x259   : > { %v1207_v4 = vunpack.c.l.b16 %v979_v60  ;;  %v5415_v60 = vld [vmem:[#allocation9 + $0xd8] sm:$0xff] }
 0x25b   : > { %4844 = vmatmul.msk.f32.gmra.mxu0 %vm998_vm5, %v6373_v38  ;;  %v1216_v8 = vpack.c.b16 %v1207_v4, %v1206_v5 }
 0x25c   : > { %v898_v49 = vpop.permute.xlu1 %897 }
 0x25d   : > { %vm916_vm13 = vcmp.eq.s32.totalorder %v6256_v41, %v898_v49 }
 0x25e   : > { %vm932_vm14 = vmor %vm836_vm9, %vm916_vm13 }
 0x25f   : > { %v6389_v52 = vsel %vm932_vm14, 1.0, %v6088_v44 }
 0x260   : > { %v980_v59 = vpack.c.bf16 %v6389_v52, %v6389_v52 }
 0x261   : > { %4871 = vmatmul.msk.bf16.gmra.mxu1 %vm998_vm5, %v1215_v50 }
 0x262   : > { %v1208_v1 = vunpack.c.l.b16 %v980_v59  ;;  %v5537_v59 = vld [vmem:[%s6173_s11] sm:$0xff]  }
 0x263   : > { %4845 = vmatmul.msk.f32.gmra.mxu0 %vm998_vm5, %v6370_v37 }
 0x264   : > { %v901_v58 = vpop.permute.xlu1 %900 }
 0x265   : > { %vm917_vm1 = vcmp.eq.s32.totalorder %v6256_v41, %v901_v58  ;;  %v6489_v58 = vld [vmem:[%s7445_s8 + $0x1] ss:$0 sm:$0xff] }
 0x266   : > { %vm933_vm2 = vmor %vm837_vm0, %vm917_vm1 }
 0x267   : > { %v6408_v62 = vsel %vm933_vm2, 1.0, %v6088_v44 }
 0x268   : > { %v981_v63 = vpack.c.bf16 %v6408_v62, %v6408_v62 }
 0x26a   : > { %v1209_v6 = vunpack.c.l.b16 %v981_v63  ;;  %v5538_v63 = vunpack.c.l.bf16 %v5537_v59 }
 0x26b   : > { %4846 = vmatmul.msk.f32.gmra.mxu0 %vm998_vm5, %v6395_v57 }
 0x26c   : > { %v1217_v7 = vpack.c.b16 %v1209_v6, %v1208_v1  ;;  %v5414_v6 = vld [vmem:[#allocation9 + $0xd0] sm:$0xff] }
 0x26e   : > { %5592 = vmatpush.lsf.bf16.msrb.mxu3 %v1217_v7 }
 0x271   : > { %4872 = vmatmul.msk.bf16.gmra.mxu1 %vm998_vm5, %v1216_v8 }
 0x272   : > { %5593 = vmatpush.lsf.bf16.msrb.mxu3 %v1216_v8 }
 0x273   : > { %4847 = vmatmul.msk.f32.gmra.mxu0 %vm998_vm5, %v6392_v54 }
 0x276   : > { %5594 = vmatpush.lsf.bf16.msrb.mxu3 %v1215_v50  ;;  %v5416_v50 = vld [vmem:[#allocation9 + $0xe0] sm:$0xff] }
 0x277   : > { %1760 = vmatpush.bf16.msra.mxu2 %v5416_v50 }
 0x27a   : > { %5595 = vmatpush.lsf.bf16.msrb.mxu3 %v1214_v35 }
 0x27b   : > { %4848 = vmatmul.msk.f32.gmra.mxu0 %vm998_vm5, %v6389_v52  ;;  %1761 = vmatpush.bf16.msra.mxu2 %v5415_v60 }
 0x27e   : > { %5596 = vmatpush.lsf.bf16.msrb.mxu3 %v6344_v23 }
 0x27f   : > { %1762 = vmatpush.bf16.msra.mxu2 %v5414_v6 }
 0x281   : > { %4873 = vmatmul.msk.bf16.gmra.mxu1 %vm998_vm5, %v1217_v7 }
 0x282   : > { %5597 = vmatpush.lsf.bf16.msrb.mxu3 %v6320_v11 }
 0x283   : > { %4849 = vmatmul.msk.f32.gmra.mxu0 %vm998_vm5, %v6408_v62 }
 0x286   : > { %5598 = vmatpush.lsf.bf16.msrb.mxu3 %v6299_v0 }
 0x288   : > { %v6425_v41 = vpop.f32.mrf.mxu0 }
 0x289   : > { %v1112_v44 = vmul.f32 %v6425_v41, %v6425_v41 }
 0x28a   : > { %5599 = vmatpush.lsf.bf16.msrb.mxu3 %v6275_v53 }
 0x28b   : > { %1128 = vadd.xlane.f32.xlu2 %v1112_v44 }
 0x28c   : > { %5600 = vllmr.4.mxu3 }
 0x28e   : > { %v1275_v33 = vpop.f32.mrf.mxu1 }
 0x290   : > { %v6430_v9 = vpop.f32.mrf.mxu0 }
 0x291   : > { %v1113_v10 = vmul.f32 %v6430_v9, %v6430_v9 }
 0x293   : > { %1130 = vadd.xlane.f32.xlu0 %v1113_v10  ;;  %v5413_v10 = vld [vmem:[#allocation9 + $0xc8] sm:$0xff] }
 0x294   : > { %1763 = vmatpush.bf16.msra.mxu2 %v5413_v10 }
 0x296   : > { %v1277_v36 = vpop.f32.mrf.mxu1 }
 0x298   : > { %v6434_v11 = vpop.f32.mrf.mxu0 }
 0x299   : > { %v1114_v0 = vmul.f32 %v6434_v11, %v6434_v11 }
 0x29b   : > { %1132 = vadd.xlane.f32.xlu1 %v1114_v0 }
 0x29e   : > { %v1280_v48 = vpop.f32.mrf.mxu1 }
 0x2a0   : > { %v6438_v12 = vpop.f32.mrf.mxu0 }
 0x2a1   : > { %v1115_v13 = vmul.f32 %v6438_v12, %v6438_v12 }
 0x2a3   : > { %1134 = vadd.xlane.f32.xlu2 %v1115_v13 }
 0x2a6   : > { %v1282_v4 = vpop.f32.mrf.mxu1 }
 0x2a8   : > { %v6442_v53 = vpop.f32.mrf.mxu0 }
 0x2a9   : > { %v1116_v16 = vmul.f32 %v6442_v53, %v6442_v53 }
 0x2ab   : > { %1136 = vadd.xlane.f32.xlu2 %v1116_v16  ;;  %v5539_v16 = vunpack.c.h.bf16 %v5537_v59 }
 0x2b0   : > { %v6446_v17 = vpop.f32.mrf.mxu0 }
 0x2b1   : > { %v1117_v18 = vmul.f32 %v6446_v17, %v6446_v17 }
 0x2b3   : > { %1138 = vadd.xlane.f32.xlu0 %v1117_v18 }
 0x2b8   : > { %v6450_v19 = vpop.f32.mrf.mxu0 }
 0x2b9   : > { %v1118_v20 = vmul.f32 %v6450_v19, %v6450_v19 }
 0x2bb   : > { %1140 = vadd.xlane.f32.xlu1 %v1118_v20  ;;  %v5412_v20 = vld [vmem:[#allocation9 + $0xc0] sm:$0xff] }
 0x2bc   : > { %1764 = vmatpush.bf16.msra.mxu2 %v5412_v20 }
 0x2c0   : > { %v6454_v21 = vpop.f32.mrf.mxu0 }
 0x2c1   : > { %v1119_v22 = vmul.f32 %v6454_v21, %v6454_v21 }
 0x2c3   : > { %1142 = vadd.xlane.f32.xlu2 %v1119_v22 }
 0x2c8   : > { %v6458_v23 = vpop.f32.mrf.mxu0 }
 0x2c9   : > { %v1120_v24 = vmul.f32 %v6458_v23, %v6458_v23 }
 0x2cb   : > { %1144 = vadd.xlane.f32.xlu0 %v1120_v24  ;;  %v1285_v24 = vpop.f32.mrf.mxu1 }
 0x2d0   : > { %v6462_v25 = vpop.f32.mrf.mxu0 }
 0x2d1   : > { %v1121_v28 = vmul.f32 %v6462_v25, %v6462_v25 }
 0x2d3   : > { %1146 = vadd.xlane.f32.xlu1 %v1121_v28 }
 0x2d8   : > { %v6466_v29 = vpop.f32.mrf.mxu0 }
 0x2d9   : > { %v1122_v30 = vmul.f32 %v6466_v29, %v6466_v29 }
 0x2db   : > { %1148 = vadd.xlane.f32.xlu2 %v1122_v30  ;;  %v5571_v30 = vld [vmem:[%s6173_s11 + $0x8] sm:$0xff]  }
 0x2dc   : > { %v5542_v42 = vunpack.c.l.bf16 %v5571_v30 }
 0x2e0   : > { %v6470_v31 = vpop.f32.mrf.mxu0 }
 0x2e1   : > { %v1123_v32 = vmul.f32 %v6470_v31, %v6470_v31 }
 0x2e3   : > { %1150 = vadd.xlane.f32.xlu0 %v1123_v32 }
 0x2e8   : > { %v6474_v34 = vpop.f32.mrf.mxu0 }
 0x2e9   : > { %v1124_v35 = vmul.f32 %v6474_v34, %v6474_v34 }
 0x2eb   : > { %1152 = vadd.xlane.f32.xlu1 %v1124_v35 }
 0x2f0   : > { %v6478_v40 = vpop.f32.mrf.mxu0 }
 0x2f1   : > { %v1125_v43 = vmul.f32 %v6478_v40, %v6478_v40 }
 0x2f3   : > { %1154 = vadd.xlane.f32.xlu2 %v1125_v43 }
 0x2f8   : > { %v6482_v49 = vpop.f32.mrf.mxu0 }
 0x2f9   : > { %v1126_v51 = vmul.f32 %v6482_v49, %v6482_v49 }
 0x2fb   : > { %1156 = vadd.xlane.f32.xlu0 %v1126_v51 }
 0x2fe   : > { %v1129_v61 = vpop.xlane.xlu2 %1128 }
 0x2ff   : > { %v1162_v1 = vmul.f32 %v6489_v58, %v1129_v61 }
 0x300   : > { %v6493_v5 = vpop.f32.mrf.mxu0 }
 0x301   : > { %v1276_v7 = vadd.f32 %v1275_v33, %v1162_v1  ;;  %v1127_v8 = vmul.f32 %v6493_v5, %v6493_v5  ;;  %v5543_v1 = vunpack.c.h.bf16 %v5571_v30 }
 0x303   : > { %v6497_v44 = vadd.f32 %v5538_v63, %v1276_v7  ;;  %1158 = vadd.xlane.f32.xlu1 %v1127_v8 }
 0x305   : > { %v4874_v0 = vmul.f32 -1.442695, %v6497_v44 }
 0x306   : > { %v1131_v13 = vpop.xlane.xlu0 %1130 }
 0x307   : > { %5677 = vpow2.f32 %v4874_v0  ;;  %v1163_v18 = vmul.f32 %v6489_v58, %v1131_v13  ;;  %v5572_v0 = vld [vmem:[%s6173_s11 + $0x10] sm:$0xff]  }
 0x308   : > { %v5546_v30 = vunpack.c.l.bf16 %v5572_v0 }
 0x309   : > { %v1278_v22 = vadd.f32 %v1277_v36, %v1163_v18  ;;  %v6508_v36 = vpop.f32.mrf.mxu1 }
 0x30b   : > { %v6501_v28 = vadd.f32 %v5539_v16, %v1278_v22 }
 0x30d   : > { %v5678_v32 = vpop.eup %5677  ;;  %v4875_v33 = vmul.f32 -1.442695, %v6501_v28 }
 0x30e   : > { %v1411_v35 = vadd.f32 1.0, %v5678_v32  ;;  %v1133_v39 = vpop.xlane.xlu1 %1132 }
 0x30f   : > { %5679 = vpow2.f32 %v4875_v33  ;;  %v1164_v43 = vmul.f32 %v6489_v58, %v1133_v39 }
 0x310   : > { %5681 = vrcp.f32 %v1411_v35  ;;  %vm1432_vm3 = vweird.f32 %v1411_v35 }
 0x311   : > { %v1281_v46 = vadd.f32 %v1280_v48, %v1164_v43  ;;  %v6517_v22 = vpop.f32.mrf.mxu1  ;;  %v1438_v43 = vand.u32 2147483648, %v1411_v35 }
 0x313   : > { %v6506_v50 = vadd.f32 %v5542_v42, %v1281_v46  ;;  %v1436_v46 = vand.u32 2147483647, %v1411_v35 }
 0x315   : > { %v5680_v51 = vpop.eup %5679  ;;  %v4876_v59 = vmul.f32 -1.442695, %v6506_v50  ;;  %vm1437_vm7 = vcmp.eq.f32.partialorder %v1436_v46, 8.507059e+37 }
 0x316   : > { %v5682_v60 = vpop.eup %5681  ;;  %v1412_v61 = vadd.f32 1.0, %v5680_v51  ;;  %v1135_v63 = vpop.xlane.xlu2 %1134 }
 0x317   : > { %5683 = vpow2.f32 %v4876_v59  ;;  %v1165_v6 = vmul.f32 %v6489_v58, %v1135_v63  ;;  %v1428_v7 = vmul.f32 %v5682_v60, %v1411_v35  ;;  %vm1433_vm5 = vweird.f32 %v5682_v60 }
 0x318   : > { %5685 = vrcp.f32 %v1412_v61  ;;  %vm6523_vm4 = vmor %vm1432_vm3, %vm1433_vm5  ;;  %v1451_v63 = vand.u32 2147483647, %v1412_v61  ;;  %vm1447_vm8 = vweird.f32 %v1412_v61 }
 0x319   : > { %v1283_v8 = vadd.f32 %v1282_v4, %v1165_v6  ;;  %v1429_v10 = vsub.f32 1.0, %v1428_v7 }
 0x31a   : > { %vm1452_vm10 = vcmp.eq.f32.partialorder %v1451_v63, 8.507059e+37 }
 0x31b   : > { %v6512_v48 = vadd.f32 %v5543_v1, %v1283_v8  ;;  %v1430_v13 = vmul.f32 %v5682_v60, %v1429_v10  ;;  %v1453_v1 = vand.u32 2147483648, %v1412_v61  ;;  %v5547_v10 = vunpack.c.h.bf16 %v5572_v0 }
 0x31c   : > { %3653 = vxpose.xlu2.b32.start [1/16] (narrow) %v6268_v47, 32 }
 0x31d   : > { %v5684_v16 = vpop.eup %5683  ;;  %v4877_v18 = vmul.f32 -1.442695, %v6512_v48  ;;  %v1431_v39 = vadd.f32 %v5682_v60, %v1430_v13 }
 0x31e   : > { %v5686_v20 = vpop.eup %5685  ;;  %v6519_v32 = vadd.f32 1.0, %v5684_v16  ;;  %v1137_v33 = vpop.xlane.xlu2 %1136 }
 0x31f   : > { %5687 = vpow2.f32 %v4877_v18  ;;  %v1166_v4 = vmul.f32 %v6489_v58, %v1137_v33  ;;  %v1443_v42 = vmul.f32 %v5686_v20, %v1412_v61  ;;  %v1435_v7 = vsel %vm6523_vm4, %v5682_v60, %v1431_v39 }
 0x320   : > { %5689 = vrcp.f32 %v6519_v32  ;;  %vm1448_vm6 = vweird.f32 %v5686_v20  ;;  %v1454_v60 = vor.u32 1.1754944e-38, %v1453_v1  ;;  %v5573_v1 = vld [vmem:[%s6173_s11 + $0x18] sm:$0xff]   ;;  %vm1462_vm12 = vweird.f32 %v6519_v32 }
 0x321   : > { %v1286_v47 = vadd.f32 %v1285_v24, %v1166_v4  ;;  %v1444_v51 = vsub.f32 1.0, %v1443_v42  ;;  %v1439_v24 = vor.u32 1.1754944e-38, %v1438_v43  ;;  %vm1449_vm9 = vmor %vm1447_vm8, %vm1448_vm6  ;;  %v1292_v42 = vpop.f32.mrf.mxu1 }
 0x323   : > { %v6527_v6 = vadd.f32 %v5546_v30, %v1286_v47  ;;  %v1445_v8 = vmul.f32 %v5686_v20, %v1444_v51  ;;  %v1440_v30 = vsel %vm1437_vm7, %v1439_v24, %v1435_v7 }
 0x324   : > { %3654 = vxpose.xlu2.b32.cont [2/16] (narrow) %v6263_v45, 32  ;;  %v1667_v61 = vmul.f32 %v1440_v30, %v6497_v44 }
 0x325   : > { %v5688_v13 = vpop.eup %5687  ;;  %v4878_v35 = vmul.f32 -1.442695, %v6527_v6  ;;  %v1446_v16 = vadd.f32 %v5686_v20, %v1445_v8 }
 0x326   : > { %v5690_v18 = vpop.eup %5689  ;;  %v1414_v33 = vadd.f32 1.0, %v5688_v13  ;;  %v1139_v4 = vpop.xlane.xlu0 %1138 }
 0x327   : > { %5691 = vpow2.f32 %v4878_v35  ;;  %v1167_v39 = vmul.f32 %v6489_v58, %v1139_v4  ;;  %v1450_v45 = vsel %vm1449_vm9, %v5686_v20, %v1446_v16  ;;  %v1458_v0 = vmul.f32 %v5690_v18, %v6519_v32 }
 0x328   : > { %5693 = vrcp.f32 %v1414_v33  ;;  %v1455_v43 = vsel %vm1452_vm10, %v1454_v60, %v1450_v45  ;;  %vm1463_vm11 = vweird.f32 %v5690_v18  ;;  %v1468_v16 = vand.u32 2147483648, %v6519_v32 }
 0x329   : > { %v1288_v47 = vadd.f32 %v6508_v36, %v1167_v39  ;;  %v1668_v46 = vmul.f32 %v1455_v43, %v6501_v28  ;;  %v1459_v51 = vsub.f32 1.0, %v1458_v0  ;;  %v5550_v36 = vunpack.c.l.bf16 %v5573_v1  ;;  %v1295_v60 = vpop.f32.mrf.mxu1  ;;  %vm6551_vm13 = vmor %vm1462_vm12, %vm1463_vm11 }
 0x32a   : > { %v1466_v4 = vand.u32 2147483647, %v6519_v32  ;;  %v1481_v45 = vand.u32 2147483647, %v1414_v33  ;;  %v1483_v0 = vand.u32 2147483648, %v1414_v33  ;;  %vm1477_vm0 = vweird.f32 %v1414_v33 }
 0x32b   : > { %v6538_v59 = vadd.f32 %v5547_v10, %v1288_v47  ;;  %v1699_v63 = vpack.c.bf16 %v1668_v46, %v1667_v61  ;;  %v1460_v7 = vmul.f32 %v5690_v18, %v1459_v51  ;;  %v1469_v46 = vor.u32 1.1754944e-38, %v1468_v16 }
 0x32c   : > { %3655 = vxpose.xlu2.b32.cont [3/16] (narrow) %v6288_v56, 32  ;;  %vm1467_vm15 = vcmp.eq.f32.partialorder %v1466_v4, 8.507059e+37  ;;  %vm1482_vm2 = vcmp.eq.f32.partialorder %v1481_v45, 8.507059e+37 }
 0x32d   : > { %v5692_v20 = vpop.eup %5691  ;;  %v4879_v8 = vmul.f32 -1.442695, %v6538_v59  ;;  %1765 = vmatmul.bf16.vlgmr.msra.gmra.mxu2 %v1699_v63  ;;  %v1461_v28 = vadd.f32 %v5690_v18, %v1460_v7 }
 0x32e   : > { %v5694_v24 = vpop.eup %5693  ;;  %v6543_v13 = vadd.f32 1.0, %v5692_v20  ;;  %v1141_v35 = vpop.xlane.xlu1 %1140 }
 0x32f   : > { %5695 = vpow2.f32 %v4879_v8  ;;  %v1168_v44 = vmul.f32 %v6489_v58, %v1141_v35  ;;  %v1473_v10 = vmul.f32 %v5694_v24, %v1414_v33  ;;  %v1465_v47 = vsel %vm6551_vm13, %v5690_v18, %v1461_v28 }
 0x330   : > { %5697 = vrcp.f32 %v6543_v13  ;;  %vm1478_vm14 = vweird.f32 %v5694_v24  ;;  %v1484_v18 = vor.u32 1.1754944e-38, %v1483_v0  ;;  %vm1492_vm3 = vweird.f32 %v6543_v13 }
 0x331   : > { %v1291_v56 = vadd.f32 %v6517_v22, %v1168_v44  ;;  %v1474_v30 = vsub.f32 1.0, %v1473_v10  ;;  %v5551_v22 = vunpack.c.h.bf16 %v5573_v1  ;;  %vm1479_vm1 = vmor %vm1477_vm0, %vm1478_vm14  ;;  %v1297_v45 = vpop.f32.mrf.mxu1 }
 0x333   : > { %v6555_v43 = vadd.f32 %v5550_v36, %v1291_v56  ;;  %v1475_v61 = vmul.f32 %v5694_v24, %v1474_v30  ;;  %v1470_v36 = vsel %vm1467_vm15, %v1469_v46, %v1465_v47  ;;  %v5574_v30 = vld [vmem:[%s6173_s11 + $0x20] sm:$0xff]  }
 0x334   : > { %3656 = vxpose.xlu2.b32.cont [4/16] (narrow) %v6285_v55, 32  ;;  %v1669_v10 = vmul.f32 %v1470_v36, %v6506_v50 }
 0x335   : > { %v5696_v32 = vpop.eup %5695  ;;  %v4880_v51 = vmul.f32 -1.442695, %v6555_v43  ;;  %v1476_v63 = vadd.f32 %v5694_v24, %v1475_v61 }
 0x336   : > { %v5698_v7 = vpop.eup %5697  ;;  %v1416_v20 = vadd.f32 1.0, %v5696_v32  ;;  %v1143_v8 = vpop.xlane.xlu2 %1142  ;;  %v1498_v32 = vand.u32 2147483648, %v6543_v13 }
 0x337   : > { %5699 = vpow2.f32 %v4880_v51  ;;  %v1169_v35 = vmul.f32 %v6489_v58, %v1143_v8  ;;  %v1480_v55 = vsel %vm1479_vm1, %v5694_v24, %v1476_v63  ;;  %v1488_v1 = vmul.f32 %v5698_v7, %v6543_v13 }
 0x338   : > { %5701 = vrcp.f32 %v1416_v20  ;;  %v1485_v44 = vsel %vm1482_vm2, %v1484_v18, %v1480_v55  ;;  %vm1493_vm5 = vweird.f32 %v5698_v7  ;;  %v1496_v51 = vand.u32 2147483647, %v6543_v13 }
 0x339   : > { %v1293_v28 = vadd.f32 %v1292_v42, %v1169_v35  ;;  %v1670_v33 = vmul.f32 %v1485_v44, %v6512_v48  ;;  %v1489_v16 = vsub.f32 1.0, %v1488_v1  ;;  %v5554_v42 = vunpack.c.l.bf16 %v5574_v30  ;;  %vm6577_vm4 = vmor %vm1492_vm3, %vm1493_vm5 }
 0x33a   : > { %v1511_v36 = vand.u32 2147483647, %v1416_v20  ;;  %v1513_v18 = vand.u32 2147483648, %v1416_v20  ;;  %v1499_v44 = vor.u32 1.1754944e-38, %v1498_v32  ;;  %vm1497_vm7 = vcmp.eq.f32.partialorder %v1496_v51, 8.507059e+37 }
 0x33b   : > { %v6565_v56 = vadd.f32 %v5551_v22, %v1293_v28  ;;  %v1700_v4 = vpack.c.bf16 %v1670_v33, %v1669_v10  ;;  %v1490_v39 = vmul.f32 %v5698_v7, %v1489_v16  ;;  %vm1507_vm8 = vweird.f32 %v1416_v20  ;;  %v1300_v16 = vpop.f32.mrf.mxu1 }
 0x33c   : > { %3657 = vxpose.xlu2.b32.cont [5/16] (narrow) %v6305_v2, 32  ;;  %vm1512_vm10 = vcmp.eq.f32.partialorder %v1511_v36, 8.507059e+37 }
 0x33d   : > { %v5700_v0 = vpop.eup %5699  ;;  %v4881_v24 = vmul.f32 -1.442695, %v6565_v56  ;;  %1770 = vmatmul.bf16.gmra.mxu2 %v1700_v4  ;;  %v1491_v22 = vadd.f32 %v5698_v7, %v1490_v39 }
 0x33e   : > { %v5702_v47 = vpop.eup %5701  ;;  %v6570_v61 = vadd.f32 1.0, %v5700_v0  ;;  %v1145_v50 = vpop.xlane.xlu0 %1144 }
 0x33f   : > { %5703 = vpow2.f32 %v4881_v24  ;;  %v1170_v48 = vmul.f32 %v6489_v58, %v1145_v50  ;;  %v1503_v46 = vmul.f32 %v5702_v47, %v1416_v20  ;;  %v1495_v55 = vsel %vm6577_vm4, %v5698_v7, %v1491_v22 }
 0x340   : > { %5705 = vrcp.f32 %v6570_v61  ;;  %vm1508_vm6 = vweird.f32 %v5702_v47  ;;  %v1500_v0 = vsel %vm1497_vm7, %v1499_v44, %v1495_v55  ;;  %v1514_v7 = vor.u32 1.1754944e-38, %v1513_v18 }
 0x341   : > { %v1296_v2 = vadd.f32 %v1295_v60, %v1170_v48  ;;  %v1504_v63 = vsub.f32 1.0, %v1503_v46  ;;  %v5555_v60 = vunpack.c.h.bf16 %v5574_v30  ;;  %vm1509_vm9 = vmor %vm1507_vm8, %vm1508_vm6  ;;  %v1671_v20 = vmul.f32 %v1500_v0, %v6527_v6 }
 0x342   : > { %vm1522_vm12 = vweird.f32 %v6570_v61  ;;  %v1526_v44 = vand.u32 2147483647, %v6570_v61 }
 0x343   : > { %v6581_v35 = vadd.f32 %v5554_v42, %v1296_v2  ;;  %v1505_v1 = vmul.f32 %v5702_v47, %v1504_v63  ;;  %v5575_v2 = vld [vmem:[%s6173_s11 + $0x28] sm:$0xff]  }
 0x344   : > { %3658 = vxpose.xlu2.b32.cont [6/16] (narrow) %v6310_v3, 32  ;;  %vm1527_vm15 = vcmp.eq.f32.partialorder %v1526_v44, 8.507059e+37 }
 0x345   : > { %v5704_v28 = vpop.eup %5703  ;;  %v4882_v13 = vmul.f32 -1.442695, %v6581_v35  ;;  %v1506_v10 = vadd.f32 %v5702_v47, %v1505_v1  ;;  %v1302_v1 = vpop.f32.mrf.mxu1 }
 0x346   : > { %v5706_v33 = vpop.eup %5705  ;;  %v1418_v4 = vadd.f32 1.0, %v5704_v28  ;;  %v1147_v39 = vpop.xlane.xlu1 %1146 }
 0x347   : > { %5707 = vpow2.f32 %v4882_v13  ;;  %v1171_v3 = vmul.f32 %v6489_v58, %v1147_v39  ;;  %v1510_v30 = vsel %vm1509_vm9, %v5702_v47, %v1506_v10  ;;  %v1518_v24 = vmul.f32 %v5706_v33, %v6570_v61 }
 0x348   : > { %5709 = vrcp.f32 %v1418_v4  ;;  %v1515_v42 = vsel %vm1512_vm10, %v1514_v7, %v1510_v30  ;;  %vm1523_vm11 = vweird.f32 %v5706_v33  ;;  %v1541_v10 = vand.u32 2147483647, %v1418_v4 }
 0x349   : > { %v1298_v50 = vadd.f32 %v1297_v45, %v1171_v3  ;;  %v1672_v48 = vmul.f32 %v1515_v42, %v6538_v59  ;;  %v1519_v22 = vsub.f32 1.0, %v1518_v24  ;;  %v5558_v45 = vunpack.c.l.bf16 %v5575_v2  ;;  %vm6603_vm13 = vmor %vm1522_vm12, %vm1523_vm11 }
 0x34a   : > { %v1543_v39 = vand.u32 2147483648, %v1418_v4  ;;  %vm1537_vm0 = vweird.f32 %v1418_v4  ;;  %vm1542_vm2 = vcmp.eq.f32.partialorder %v1541_v10, 8.507059e+37 }
 0x34b   : > { %v6591_v46 = vadd.f32 %v5555_v60, %v1298_v50  ;;  %v1701_v32 = vpack.c.bf16 %v1672_v48, %v1671_v20  ;;  %v1520_v51 = vmul.f32 %v5706_v33, %v1519_v22 }
 0x34c   : > { %3659 = vxpose.xlu2.b32.cont [7/16] (narrow) %v6332_v15, 32  ;;  %v1528_v15 = vand.u32 2147483648, %v6570_v61 }
 0x34d   : > { %v5708_v63 = vpop.eup %5707  ;;  %v4883_v47 = vmul.f32 -1.442695, %v6591_v46  ;;  %1775 = vmatmul.bf16.gmra.mxu2 %v1701_v32  ;;  %v1521_v59 = vadd.f32 %v5706_v33, %v1520_v51 }
 0x34e   : > { %v5710_v8 = vpop.eup %5709  ;;  %v6596_v36 = vadd.f32 1.0, %v5708_v63  ;;  %v1149_v18 = vpop.xlane.xlu2 %1148  ;;  %v1529_v30 = vor.u32 1.1754944e-38, %v1528_v15 }
 0x34f   : > { %5711 = vpow2.f32 %v4883_v47  ;;  %v1172_v6 = vmul.f32 %v6489_v58, %v1149_v18  ;;  %v1533_v55 = vmul.f32 %v5710_v8, %v1418_v4  ;;  %v1525_v7 = vsel %vm6603_vm13, %v5706_v33, %v1521_v59  ;;  %v1305_v18 = vpop.f32.mrf.mxu1 }
 0x350   : > { %5713 = vrcp.f32 %v6596_v36  ;;  %vm1538_vm14 = vweird.f32 %v5710_v8  ;;  %v1530_v22 = vsel %vm1527_vm15, %v1529_v30, %v1525_v7  ;;  %v1544_v33 = vor.u32 1.1754944e-38, %v1543_v39 }
 0x351   : > { %v1301_v60 = vadd.f32 %v1300_v16, %v1172_v6  ;;  %v1534_v28 = vsub.f32 1.0, %v1533_v55  ;;  %v5559_v16 = vunpack.c.h.bf16 %v5575_v2  ;;  %vm1539_vm1 = vmor %vm1537_vm0, %vm1538_vm14  ;;  %v1673_v47 = vmul.f32 %v1530_v22, %v6555_v43  ;;  %v5576_v55 = vld [vmem:[%s6173_s11 + $0x30] sm:$0xff]  }
 0x352   : > { %v1558_v39 = vand.u32 2147483648, %v6596_v36  ;;  %vm1552_vm3 = vweird.f32 %v6596_v36  ;;  %v1556_v7 = vand.u32 2147483647, %v6596_v36 }
 0x353   : > { %v6607_v0 = vadd.f32 %v5558_v45, %v1301_v60  ;;  %v1535_v3 = vmul.f32 %v5710_v8, %v1534_v28 }
 0x354   : > { %3660 = vxpose.xlu2.b32.cont [8/16] (narrow) %v6329_v14, 32  ;;  %vm1557_vm7 = vcmp.eq.f32.partialorder %v1556_v7, 8.507059e+37 }
 0x355   : > { %v5712_v24 = vpop.eup %5711  ;;  %v4884_v61 = vmul.f32 -1.442695, %v6607_v0  ;;  %v1536_v42 = vadd.f32 %v5710_v8, %v1535_v3 }
 0x356   : > { %v5714_v50 = vpop.eup %5713  ;;  %v1420_v20 = vadd.f32 1.0, %v5712_v24  ;;  %v1151_v48 = vpop.xlane.xlu0 %1150 }
 0x357   : > { %5715 = vpow2.f32 %v4884_v61  ;;  %v1173_v32 = vmul.f32 %v6489_v58, %v1151_v48  ;;  %v1540_v14 = vsel %vm1539_vm1, %v5710_v8, %v1536_v42  ;;  %v1548_v2 = vmul.f32 %v5714_v50, %v6596_v36  ;;  %v1307_v22 = vpop.f32.mrf.mxu1 }
 0x358   : > { %5717 = vrcp.f32 %v1420_v20  ;;  %v1545_v51 = vsel %vm1542_vm2, %v1544_v33, %v1540_v14  ;;  %vm1553_vm5 = vweird.f32 %v5714_v50  ;;  %v1571_v30 = vand.u32 2147483647, %v1420_v20 }
 0x359   : > { %v1303_v63 = vadd.f32 %v1302_v1, %v1173_v32  ;;  %v1674_v4 = vmul.f32 %v1545_v51, %v6565_v56  ;;  %v1549_v45 = vsub.f32 1.0, %v1548_v2  ;;  %v5562_v1 = vunpack.c.l.bf16 %v5576_v55  ;;  %vm6629_vm4 = vmor %vm1552_vm3, %vm1553_vm5 }
 0x35a   : > { %v1573_v24 = vand.u32 2147483648, %v1420_v20  ;;  %v5563_v33 = vunpack.c.h.bf16 %v5576_v55  ;;  %v1559_v32 = vor.u32 1.1754944e-38, %v1558_v39  ;;  %vm1567_vm8 = vweird.f32 %v1420_v20 }
 0x35b   : > { %v6617_v6 = vadd.f32 %v5559_v16, %v1303_v63  ;;  %v1702_v59 = vpack.c.bf16 %v1674_v4, %v1673_v47  ;;  %v1550_v15 = vmul.f32 %v5714_v50, %v1549_v45  ;;  %vm1572_vm10 = vcmp.eq.f32.partialorder %v1571_v30, 8.507059e+37 }
 0x35c   : > { %3661 = vxpose.xlu2.b32.cont [9/16] (narrow) %v6354_v27, 32 }
 0x35d   : > { %v5716_v60 = vpop.eup %5715  ;;  %v4885_v8 = vmul.f32 -1.442695, %v6617_v6  ;;  %1780 = vmatmul.bf16.gmra.mxu2 %v1702_v59  ;;  %v1551_v13 = vadd.f32 %v5714_v50, %v1550_v15 }
 0x35e   : > { %v5718_v44 = vpop.eup %5717  ;;  %v6622_v28 = vadd.f32 1.0, %v5716_v60  ;;  %v1153_v43 = vpop.xlane.xlu1 %1152 }
 0x35f   : > { %5719 = vpow2.f32 %v4885_v8  ;;  %v1174_v56 = vmul.f32 %v6489_v58, %v1153_v43  ;;  %v1563_v10 = vmul.f32 %v5718_v44, %v1420_v20  ;;  %v1555_v42 = vsel %vm6629_vm4, %v5714_v50, %v1551_v13  ;;  %v5577_v43 = vld [vmem:[%s6173_s11 + $0x38] sm:$0xff]   ;;  %v1310_v39 = vpop.f32.mrf.mxu1 }
 0x360   : > { %5721 = vrcp.f32 %v6622_v28  ;;  %vm1568_vm6 = vweird.f32 %v5718_v44  ;;  %v1560_v4 = vsel %vm1557_vm7, %v1559_v32, %v1555_v42  ;;  %v1574_v50 = vor.u32 1.1754944e-38, %v1573_v24 }
 0x361   : > { %v1306_v27 = vadd.f32 %v1305_v18, %v1174_v56  ;;  %v1564_v3 = vsub.f32 1.0, %v1563_v10  ;;  %vm1569_vm9 = vmor %vm1567_vm8, %vm1568_vm6  ;;  %v1675_v15 = vmul.f32 %v1560_v4, %v6581_v35  ;;  %v5566_v7 = vunpack.c.l.bf16 %v5577_v43 }
 0x362   : > { %vm1582_vm12 = vweird.f32 %v6622_v28  ;;  %v1586_v24 = vand.u32 2147483647, %v6622_v28 }
 0x363   : > { %v6633_v61 = vadd.f32 %v5562_v1, %v1306_v27  ;;  %v1565_v48 = vmul.f32 %v5718_v44, %v1564_v3 }
 0x364   : > { %3662 = vxpose.xlu2.b32.cont [10/16] (narrow) %v6351_v26, 32  ;;  %vm1587_vm15 = vcmp.eq.f32.partialorder %v1586_v24, 8.507059e+37 }
 0x365   : > { %v5720_v36 = vpop.eup %5719  ;;  %v4886_v14 = vmul.f32 -1.442695, %v6633_v61  ;;  %v1566_v2 = vadd.f32 %v5718_v44, %v1565_v48 }
 0x366   : > { %v5722_v51 = vpop.eup %5721  ;;  %v1422_v63 = vadd.f32 1.0, %v5720_v36  ;;  %v1155_v47 = vpop.xlane.xlu2 %1154 }
 0x367   : > { %5723 = vpow2.f32 %v4886_v14  ;;  %v1175_v45 = vmul.f32 %v6489_v58, %v1155_v47  ;;  %v1570_v26 = vsel %vm1569_vm9, %v5718_v44, %v1566_v2  ;;  %v1578_v18 = vmul.f32 %v5722_v51, %v6622_v28 }
 0x368   : > { %5725 = vrcp.f32 %v1422_v63  ;;  %v1575_v59 = vsel %vm1572_vm10, %v1574_v50, %v1570_v26  ;;  %vm1583_vm11 = vweird.f32 %v5722_v51  ;;  %v5567_v2 = vunpack.c.h.bf16 %v5577_v43 }
 0x369   : > { %v1308_v55 = vadd.f32 %v1307_v22, %v1175_v45  ;;  %v1676_v20 = vmul.f32 %v1575_v59, %v6591_v46  ;;  %v1579_v60 = vsub.f32 1.0, %v1578_v18  ;;  %vm6655_vm13 = vmor %vm1582_vm12, %vm1583_vm11  ;;  %v1601_v22 = vand.u32 2147483647, %v1422_v63 }
 0x36a   : > { %vm1597_vm0 = vweird.f32 %v1422_v63 }
 0x36b   : > { %v6643_v8 = vadd.f32 %v5563_v33, %v1308_v55  ;;  %v1703_v1 = vpack.c.bf16 %v1676_v20, %v1675_v15  ;;  %v1580_v56 = vmul.f32 %v5722_v51, %v1579_v60  ;;  %v1603_v33 = vand.u32 2147483648, %v1422_v63  ;;  %v1312_v20 = vpop.f32.mrf.mxu1 }
 0x36c   : > { %3663 = vxpose.xlu2.b32.cont [11/16] (narrow) %v6373_v38, 32  ;;  %v1588_v38 = vand.u32 2147483648, %v6622_v28  ;;  %vm1602_vm2 = vcmp.eq.f32.partialorder %v1601_v22, 8.507059e+37 }
 0x36d   : > { %v5724_v13 = vpop.eup %5723  ;;  %v4887_v44 = vmul.f32 -1.442695, %v6643_v8  ;;  %1785 = vmatmul.bf16.gmra.mxu2 %v1703_v1  ;;  %v1581_v3 = vadd.f32 %v5722_v51, %v1580_v56  ;;  %v1604_v55 = vor.u32 1.1754944e-38, %v1603_v33 }
 0x36e   : > { %v5726_v10 = vpop.eup %5725  ;;  %v6648_v27 = vadd.f32 1.0, %v5724_v13  ;;  %v1157_v35 = vpop.xlane.xlu0 %1156  ;;  %v1589_v47 = vor.u32 1.1754944e-38, %v1588_v38 }
 0x36f   : > { %5727 = vpow2.f32 %v4887_v44  ;;  %v1176_v46 = vmul.f32 %v6489_v58, %v1157_v35  ;;  %v1593_v16 = vmul.f32 %v5726_v10, %v1422_v63  ;;  %v1585_v36 = vsel %vm6655_vm13, %v5722_v51, %v1581_v3 }
 0x370   : > { %5729 = vrcp.f32 %v6648_v27  ;;  %vm1598_vm14 = vweird.f32 %v5726_v10  ;;  %v1590_v59 = vsel %vm1587_vm15, %v1589_v47, %v1585_v36  ;;  %vm1612_vm3 = vweird.f32 %v6648_v27 }
 0x371   : > { %v1311_v30 = vadd.f32 %v1310_v39, %v1176_v46  ;;  %v1594_v42 = vsub.f32 1.0, %v1593_v16  ;;  %vm1599_vm1 = vmor %vm1597_vm0, %vm1598_vm14  ;;  %v1677_v43 = vmul.f32 %v1590_v59, %v6607_v0  ;;  %v1618_v0 = vand.u32 2147483648, %v6648_v27 }
 0x373   : > { %v6659_v32 = vadd.f32 %v5566_v7, %v1311_v30  ;;  %v1595_v14 = vmul.f32 %v5726_v10, %v1594_v42  ;;  %v1619_v42 = vor.u32 1.1754944e-38, %v1618_v0  ;;  %v6686_v0 = vld [vmem:[%s7445_s8 + $0x2] ss:$0 sm:$0xff] }
 0x374   : > { %3664 = vxpose.xlu2.b32.cont [12/16] (narrow) %v6370_v37, 32 }
 0x375   : > { %v5728_v4 = vpop.eup %5727  ;;  %v4888_v28 = vmul.f32 -1.442695, %v6659_v32  ;;  %v1596_v50 = vadd.f32 %v5726_v10, %v1595_v14 }
 0x376   : > { %v5730_v45 = vpop.eup %5729  ;;  %v1424_v26 = vadd.f32 1.0, %v5728_v4  ;;  %v1159_v18 = vpop.xlane.xlu1 %1158 }
 0x377   : > { %5731 = vpow2.f32 %v4888_v28  ;;  %v1177_v51 = vmul.f32 %v6489_v58, %v1159_v18  ;;  %v1600_v15 = vsel %vm1599_vm1, %v5726_v10, %v1596_v50  ;;  %v1608_v37 = vmul.f32 %v5730_v45, %v6648_v27 }
 0x378   : > { %5733 = vrcp.f32 %v1424_v26  ;;  %v1605_v60 = vsel %vm1602_vm2, %v1604_v55, %v1600_v15  ;;  %vm1613_vm5 = vweird.f32 %v5730_v45  ;;  %v1631_v24 = vand.u32 2147483647, %v1424_v26 }
 0x379   : > { %v1313_v1 = vadd.f32 %v1312_v20, %v1177_v51  ;;  %v1678_v63 = vmul.f32 %v1605_v60, %v6617_v6  ;;  %v1609_v56 = vsub.f32 1.0, %v1608_v37  ;;  %v1616_v6 = vand.u32 2147483647, %v6648_v27  ;;  %vm1614_vm4 = vmor %vm1612_vm3, %vm1613_vm5 }
 0x37a   : > { %vm1627_vm8 = vweird.f32 %v1424_v26  ;;  %vm1632_vm10 = vcmp.eq.f32.partialorder %v1631_v24, 8.507059e+37 }
 0x37b   : > { %v6669_v13 = vadd.f32 %v5567_v2, %v1313_v1  ;;  %v1704_v44 = vpack.c.bf16 %v1678_v63, %v1677_v43  ;;  %v1610_v39 = vmul.f32 %v5730_v45, %v1609_v56  ;;  %vm1617_vm7 = vcmp.eq.f32.partialorder %v1616_v6, 8.507059e+37  ;;  %v5422_v6 = vld [vmem:[#allocation9 + $0x110] sm:$0xff] }
 0x37c   : > { %3665 = vxpose.xlu2.b32.cont [13/16] (narrow) %v6395_v57, 32  ;;  %v1633_v57 = vand.u32 2147483648, %v1424_v26 }
 0x37d   : > { %v5732_v7 = vpop.eup %5731  ;;  %v4889_v58 = vmul.f32 -1.442695, %v6669_v13  ;;  %1790 = vmatmul.bf16.gmra.mxu2 %v1704_v44  ;;  %v1611_v46 = vadd.f32 %v5730_v45, %v1610_v39 }
 0x37e   : > { %v5734_v10 = vpop.eup %5733  ;;  %v1425_v35 = vadd.f32 1.0, %v5732_v7  ;;  %v1634_v2 = vor.u32 1.1754944e-38, %v1633_v57  ;;  %v5421_v57 = vld [vmem:[#allocation9 + $0x108] sm:$0xff] }
 0x37f   : > { %5735 = vpow2.f32 %v4889_v58  ;;  %v1623_v3 = vmul.f32 %v5734_v10, %v1424_v26  ;;  %v1615_v38 = vsel %vm1614_vm4, %v5730_v45, %v1611_v46  ;;  %vm1628_vm6 = vweird.f32 %v5734_v10  ;;  %v5424_v46 = vld [vmem:[#allocation9 + $0x120] sm:$0xff] }
 0x380   : > { %5737 = vrcp.f32 %v1425_v35  ;;  %v1620_v14 = vsel %vm1617_vm7, %v1619_v42, %v1615_v38  ;;  %vm1629_vm9 = vmor %vm1627_vm8, %vm1628_vm6  ;;  %v1648_v51 = vand.u32 2147483648, %v1425_v35  ;;  %vm1642_vm12 = vweird.f32 %v1425_v35 }
 0x381   : > { %v1624_v16 = vsub.f32 1.0, %v1623_v3  ;;  %v1679_v28 = vmul.f32 %v1620_v14, %v6633_v61  ;;  %v1646_v15 = vand.u32 2147483647, %v1425_v35  ;;  %v5423_v3 = vld [vmem:[#allocation9 + $0x118] sm:$0xff] }
 0x382   : > { %v1649_v1 = vor.u32 1.1754944e-38, %v1648_v51 }
 0x383   : > { %v1625_v30 = vmul.f32 %v5734_v10, %v1624_v16  ;;  %vm1647_vm15 = vcmp.eq.f32.partialorder %v1646_v15, 8.507059e+37 }
 0x384   : > { %3666 = vxpose.xlu2.b32.cont [14/16] (narrow) %v6392_v54, 32 }
 0x385   : > { %v5736_v48 = vpop.eup %5735  ;;  %v1626_v22 = vadd.f32 %v5734_v10, %v1625_v30  ;;  %v5420_v30 = vld [vmem:[#allocation9 + $0x100] sm:$0xff] }
 0x386   : > { %v5738_v33 = vpop.eup %5737  ;;  %v1426_v36 = vadd.f32 1.0, %v5736_v48 }
 0x387   : > { %v1630_v27 = vsel %vm1629_vm9, %v5734_v10, %v1626_v22  ;;  %v1638_v47 = vmul.f32 %v5738_v33, %v1425_v35  ;;  %vm1643_vm11 = vweird.f32 %v5738_v33  ;;  %v5427_v10 = vld [vmem:[#allocation9 + $0x138] sm:$0xff]  ;;  %v5426_v35 = vld [vmem:[#allocation9 + $0x130] sm:$0xff] }
 0x388   : > { %5739 = vrcp.f32 %v1426_v36  ;;  %v1635_v4 = vsel %vm1632_vm10, %v1634_v2, %v1630_v27  ;;  %vm1644_vm13 = vmor %vm1642_vm12, %vm1643_vm11  ;;  %v1663_v20 = vand.u32 2147483648, %v1426_v36  ;;  %vm1657_vm0 = vweird.f32 %v1426_v36  ;;  %2200 = vmatpush.bf16.msra.mxu3 %v5427_v10 }
 0x389   : > { %v1680_v50 = vmul.f32 %v1635_v4, %v6643_v8  ;;  %v1639_v54 = vsub.f32 1.0, %v1638_v47  ;;  %v1661_v8 = vand.u32 2147483647, %v1426_v36 }
 0x38a   : > { %v1664_v63 = vor.u32 1.1754944e-38, %v1663_v20 }
 0x38b   : > { %v1705_v45 = vpack.c.bf16 %v1680_v50, %v1679_v28  ;;  %v1640_v18 = vmul.f32 %v5738_v33, %v1639_v54  ;;  %vm1662_vm2 = vcmp.eq.f32.partialorder %v1661_v8, 8.507059e+37 }
 0x38c   : > { %3667 = vxpose.xlu2.b32.cont [15/16] (narrow) %v6389_v52, 32  ;;  %2201 = vmatpush.bf16.msra.mxu3 %v5426_v35 }
 0x38d   : > { %1795 = vmatmul.bf16.gmra.mxu2 %v1705_v45  ;;  %v1641_v59 = vadd.f32 %v5738_v33, %v1640_v18 }
 0x38e   : > { %v5740_v26 = vpop.eup %5739 }
 0x38f   : > { %v1653_v55 = vmul.f32 %v5740_v26, %v1426_v36  ;;  %v1645_v60 = vsel %vm1644_vm13, %v5738_v33, %v1641_v59  ;;  %vm1658_vm14 = vweird.f32 %v5740_v26 }
 0x390   : > { %v1650_v43 = vsel %vm1647_vm15, %v1649_v1, %v1645_v60  ;;  %vm1659_vm1 = vmor %vm1657_vm0, %vm1658_vm14 }
 0x391   : > { %v1654_v37 = vsub.f32 1.0, %v1653_v55  ;;  %v1681_v39 = vmul.f32 %v1650_v43, %v6659_v32 }
 0x393   : > { %v1655_v61 = vmul.f32 %v5740_v26, %v1654_v37 }
 0x394   : > { %3668 = vxpose.xlu2.b32.end [16/16] (narrow) %v6408_v62, 32  ;;  %v5425_v62 = vld [vmem:[#allocation9 + $0x128] sm:$0xff] }
 0x395   : > { %v1656_v52 = vadd.f32 %v5740_v26, %v1655_v61  ;;  %2202 = vmatpush.bf16.msra.mxu3 %v5425_v62 }
 0x397   : > { %v1660_v56 = vsel %vm1659_vm1, %v5740_v26, %v1656_v52 }
 0x398   : > { %v1665_v44 = vsel %vm1662_vm2, %v1664_v63, %v1660_v56 }
 0x399   : > { %v1682_v7 = vmul.f32 %v1665_v44, %v6669_v13  ;;  %2203 = vmatpush.bf16.msra.mxu3 %v5424_v46 }
 0x39b   : > { %v1706_v58 = vpack.c.bf16 %v1682_v7, %v1681_v39 }
 0x39d   : > { %1800 = vmatmul.bf16.gmra.mxu2 %v1706_v58  ;;  %2204 = vmatpush.bf16.msra.mxu3 %v5423_v3 }
 0x3a1   : > { %2205 = vmatpush.bf16.msra.mxu3 %v5422_v6 }
 0x3a5   : > { %2206 = vmatpush.bf16.msra.mxu3 %v5421_v57 }
 0x3a9   : > { %2207 = vmatpush.bf16.msra.mxu3 %v5420_v30 }
 0x3b0   : > { %v1766_v32 = vpop.f32.mrf.mxu2 }
 0x3b1   : > { %v6689_v13 = vadd.f32 %v6686_v0, %v1766_v32 }
 0x3b3   : > { %v4922_v16 = vmul.f32 -1.442695, %v6689_v13 }
 0x3b5   : > { %5741 = vpow2.f32 %v4922_v16 }
 0x3b8   : > { %v1768_v38 = vpop.f32.mrf.mxu2 }
 0x3b9   : > { %v1769_v24 = vadd.f32 %v6686_v0, %v1768_v38 }
 0x3bb   : > { %v5742_v42 = vpop.eup %5741  ;;  %v4923_v48 = vmul.f32 -1.442695, %v1769_v24 }
 0x3bc   : > { %v1854_v22 = vadd.f32 1.0, %v5742_v42 }
 0x3bd   : > { %5743 = vpow2.f32 %v4923_v48 }
 0x3be   : > { %5745 = vrcp.f32 %v1854_v22  ;;  %v1881_v37 = vand.u32 2147483648, %v1854_v22  ;;  %vm1875_vm3 = vweird.f32 %v1854_v22  ;;  %v1879_v20 = vand.u32 2147483647, %v1854_v22 }
 0x3c0   : > { %v1771_v33 = vpop.f32.mrf.mxu2  ;;  %v1882_v44 = vor.u32 1.1754944e-38, %v1881_v37  ;;  %vm1880_vm7 = vcmp.eq.f32.partialorder %v1879_v20, 8.507059e+37 }
 0x3c1   : > { %v6694_v36 = vadd.f32 %v6686_v0, %v1771_v33 }
 0x3c3   : > { %v5744_v14 = vpop.eup %5743  ;;  %v4924_v2 = vmul.f32 -1.442695, %v6694_v36 }
 0x3c4   : > { %v5746_v27 = vpop.eup %5745  ;;  %v1855_v47 = vadd.f32 1.0, %v5744_v14 }
 0x3c5   : > { %v1871_v4 = vmul.f32 %v5746_v27, %v1854_v22  ;;  %5747 = vpow2.f32 %v4924_v2  ;;  %vm1876_vm5 = vweird.f32 %v5746_v27 }
 0x3c6   : > { %5749 = vrcp.f32 %v1855_v47  ;;  %vm6704_vm4 = vmor %vm1875_vm3, %vm1876_vm5  ;;  %v1894_v1 = vand.u32 2147483647, %v1855_v47  ;;  %v1896_v52 = vand.u32 2147483648, %v1855_v47  ;;  %vm1890_vm8 = vweird.f32 %v1855_v47 }
 0x3c7   : > { %v1872_v28 = vsub.f32 1.0, %v1871_v4 }
 0x3c8   : > { %v1773_v50 = vpop.f32.mrf.mxu2  ;;  %v1897_v46 = vor.u32 1.1754944e-38, %v1896_v52  ;;  %vm1895_vm10 = vcmp.eq.f32.partialorder %v1894_v1, 8.507059e+37 }
 0x3c9   : > { %v1873_v54 = vmul.f32 %v5746_v27, %v1872_v28  ;;  %v6698_v45 = vadd.f32 %v6686_v0, %v1773_v50 }
 0x3cb   : > { %v5748_v18 = vpop.eup %5747  ;;  %v4925_v26 = vmul.f32 -1.442695, %v6698_v45  ;;  %v1874_v51 = vadd.f32 %v5746_v27, %v1873_v54 }
 0x3cc   : > { %v5750_v59 = vpop.eup %5749  ;;  %v6701_v55 = vadd.f32 1.0, %v5748_v18 }
 0x3cd   : > { %5751 = vpow2.f32 %v4925_v26  ;;  %v1886_v15 = vmul.f32 %v5750_v59, %v1855_v47  ;;  %v1878_v43 = vsel %vm6704_vm4, %v5746_v27, %v1874_v51  ;;  %vm1891_vm6 = vweird.f32 %v5750_v59 }
 0x3ce   : > { %5753 = vrcp.f32 %v6701_v55  ;;  %v1883_v35 = vsel %vm1880_vm7, %v1882_v44, %v1878_v43  ;;  %vm1892_vm9 = vmor %vm1890_vm8, %vm1891_vm6  ;;  %v1911_v47 = vand.u32 2147483648, %v6701_v55  ;;  %vm1905_vm12 = vweird.f32 %v6701_v55 }
 0x3cf   : > { %v1887_v60 = vsub.f32 1.0, %v1886_v15  ;;  %v6716_v16 = vmul.f32 %v1883_v35, %v6689_v13  ;;  %v1909_v4 = vand.u32 2147483647, %v6701_v55 }
 0x3d0   : > { %v1776_v8 = vpop.f32.mrf.mxu2  ;;  %v1912_v37 = vor.u32 1.1754944e-38, %v1911_v47 }
 0x3d1   : > { %v6711_v63 = vadd.f32 %v6686_v0, %v1776_v8  ;;  %v1888_v56 = vmul.f32 %v5750_v59, %v1887_v60  ;;  %vm1910_vm15 = vcmp.eq.f32.partialorder %v1909_v4, 8.507059e+37 }
 0x3d3   : > { %v5752_v39 = vpop.eup %5751  ;;  %v4926_v7 = vmul.f32 -1.442695, %v6711_v63  ;;  %v1889_v58 = vadd.f32 %v5750_v59, %v1888_v56 }
 0x3d4   : > { %v5754_v10 = vpop.eup %5753  ;;  %v1857_v62 = vadd.f32 1.0, %v5752_v39 }
 0x3d5   : > { %v1901_v3 = vmul.f32 %v5754_v10, %v6701_v55  ;;  %5755 = vpow2.f32 %v4926_v7  ;;  %v1893_v32 = vsel %vm1892_vm9, %v5750_v59, %v1889_v58  ;;  %vm1906_vm11 = vweird.f32 %v5754_v10 }
 0x3d6   : > { %5757 = vrcp.f32 %v1857_v62  ;;  %v1898_v6 = vsel %vm1895_vm10, %v1897_v46, %v1893_v32  ;;  %vm6732_vm13 = vmor %vm1905_vm12, %vm1906_vm11  ;;  %v1924_v18 = vand.u32 2147483647, %v1857_v62  ;;  %v1926_v26 = vand.u32 2147483648, %v1857_v62 }
 0x3d7   : > { %v1902_v57 = vsub.f32 1.0, %v1901_v3  ;;  %v6718_v38 = vmul.f32 %v1898_v6, %v1769_v24  ;;  %vm1920_vm0 = vweird.f32 %v1857_v62 }
 0x3d8   : > { %v1778_v30 = vpop.f32.mrf.mxu2  ;;  %v1927_v52 = vor.u32 1.1754944e-38, %v1926_v26  ;;  %vm1925_vm2 = vcmp.eq.f32.partialorder %v1924_v18, 8.507059e+37 }
 0x3d9   : > { %v1903_v42 = vmul.f32 %v5754_v10, %v1902_v57  ;;  %v6721_v48 = vadd.f32 %v6686_v0, %v1778_v30  ;;  %v2142_v22 = vpack.c.bf16 %v6718_v38, %v6716_v16 }
 0x3db   : > { %v5756_v33 = vpop.eup %5755  ;;  %v4927_v14 = vmul.f32 -1.442695, %v6721_v48  ;;  %2208 = vmatmul.bf16.vlgmr.msra.gmra.mxu3 %v2142_v22  ;;  %v1904_v13 = vadd.f32 %v5754_v10, %v1903_v42 }
 0x3dc   : > { %v5758_v2 = vpop.eup %5757  ;;  %v6726_v27 = vadd.f32 1.0, %v5756_v33 }
 0x3dd   : > { %5759 = vpow2.f32 %v4927_v14  ;;  %v1916_v24 = vmul.f32 %v5758_v2, %v1857_v62  ;;  %v1908_v59 = vsel %vm6732_vm13, %v5754_v10, %v1904_v13  ;;  %vm1921_vm14 = vweird.f32 %v5758_v2 }
 0x3de   : > { %5761 = vrcp.f32 %v6726_v27  ;;  %v1913_v8 = vsel %vm1910_vm15, %v1912_v37, %v1908_v59  ;;  %vm1922_vm1 = vmor %vm1920_vm0, %vm1921_vm14  ;;  %v1941_v30 = vand.u32 2147483648, %v6726_v27  ;;  %vm1935_vm3 = vweird.f32 %v6726_v27 }
 0x3df   : > { %v1917_v28 = vsub.f32 1.0, %v1916_v24  ;;  %v6744_v39 = vmul.f32 %v1913_v8, %v6694_v36  ;;  %v1939_v42 = vand.u32 2147483647, %v6726_v27 }
 0x3e0   : > { %v1781_v54 = vpop.f32.mrf.mxu2 }
 0x3e1   : > { %v6739_v51 = vadd.f32 %v6686_v0, %v1781_v54  ;;  %v1918_v15 = vmul.f32 %v5758_v2, %v1917_v28  ;;  %v1942_v28 = vor.u32 1.1754944e-38, %v1941_v30  ;;  %vm1940_vm7 = vcmp.eq.f32.partialorder %v1939_v42, 8.507059e+37 }
 0x3e3   : > { %v5760_v20 = vpop.eup %5759  ;;  %v4928_v55 = vmul.f32 -1.442695, %v6739_v51  ;;  %v1919_v60 = vadd.f32 %v5758_v2, %v1918_v15 }
 0x3e4   : > { %v5762_v61 = vpop.eup %5761  ;;  %v1859_v1 = vadd.f32 1.0, %v5760_v20 }
 0x3e5   : > { %v1931_v43 = vmul.f32 %v5762_v61, %v6726_v27  ;;  %5763 = vpow2.f32 %v4928_v55  ;;  %v1923_v56 = vsel %vm1922_vm1, %v5758_v2, %v1919_v60  ;;  %vm1936_vm5 = vweird.f32 %v5762_v61 }
 0x3e6   : > { %5765 = vrcp.f32 %v1859_v1  ;;  %v1928_v44 = vsel %vm1925_vm2, %v1927_v52, %v1923_v56  ;;  %vm6761_vm4 = vmor %vm1935_vm3, %vm1936_vm5  ;;  %v1954_v2 = vand.u32 2147483647, %v1859_v1  ;;  %v1956_v13 = vand.u32 2147483648, %v1859_v1 }
 0x3e7   : > { %v1932_v7 = vsub.f32 1.0, %v1931_v43  ;;  %v6747_v58 = vmul.f32 %v1928_v44, %v6698_v45  ;;  %vm1950_vm8 = vweird.f32 %v1859_v1 }
 0x3e8   : > { %v1783_v10 = vpop.f32.mrf.mxu2  ;;  %v1957_v15 = vor.u32 1.1754944e-38, %v1956_v13  ;;  %vm1955_vm10 = vcmp.eq.f32.partialorder %v1954_v2, 8.507059e+37 }
 0x3e9   : > { %v1933_v35 = vmul.f32 %v5762_v61, %v1932_v7  ;;  %v6750_v62 = vadd.f32 %v6686_v0, %v1783_v10  ;;  %v2143_v46 = vpack.c.bf16 %v6747_v58, %v6744_v39 }
 0x3eb   : > { %v5764_v3 = vpop.eup %5763  ;;  %v4929_v32 = vmul.f32 -1.442695, %v6750_v62  ;;  %2213 = vmatmul.bf16.gmra.mxu3 %v2143_v46  ;;  %v1934_v36 = vadd.f32 %v5762_v61, %v1933_v35 }
 0x3ec   : > { %v5766_v6 = vpop.eup %5765  ;;  %v6755_v57 = vadd.f32 1.0, %v5764_v3 }
 0x3ed   : > { %5767 = vpow2.f32 %v4929_v32  ;;  %v1946_v45 = vmul.f32 %v5766_v6, %v1859_v1  ;;  %v1938_v24 = vsel %vm6761_vm4, %v5762_v61, %v1934_v36  ;;  %vm1951_vm6 = vweird.f32 %v5766_v6 }
 0x3ee   : > { %5769 = vrcp.f32 %v6755_v57  ;;  %v1943_v26 = vsel %vm1940_vm7, %v1942_v28, %v1938_v24  ;;  %vm1952_vm9 = vmor %vm1950_vm8, %vm1951_vm6  ;;  %vm1965_vm12 = vweird.f32 %v6755_v57  ;;  %v1969_v32 = vand.u32 2147483647, %v6755_v57 }
 0x3ef   : > { %v1947_v22 = vsub.f32 1.0, %v1946_v45  ;;  %v6773_v60 = vmul.f32 %v1943_v26, %v6711_v63  ;;  %v5435_v26 = vld [vmem:[#allocation9 + $0x178] sm:$0xff] }
 0x3f0   : > { %v1786_v14 = vpop.f32.mrf.mxu2  ;;  %vm1970_vm0 = vcmp.eq.f32.partialorder %v1969_v32, 8.507059e+37  ;;  %2643 = vmatpush.bf16.msrb.mxu0 %v5435_v26  ;;  %v5434_v26 = vld [vmem:[#allocation9 + $0x170] sm:$0xff] }
 0x3f1   : > { %v6768_v47 = vadd.f32 %v6686_v0, %v1786_v14  ;;  %v1948_v4 = vmul.f32 %v5766_v6, %v1947_v22 }
 0x3f3   : > { %v5768_v50 = vpop.eup %5767  ;;  %v4930_v27 = vmul.f32 -1.442695, %v6768_v47  ;;  %v1949_v54 = vadd.f32 %v5766_v6, %v1948_v4 }
 0x3f4   : > { %v5770_v18 = vpop.eup %5769  ;;  %v1861_v59 = vadd.f32 1.0, %v5768_v50  ;;  %2644 = vmatpush.bf16.msrb.mxu0 %v5434_v26 }
 0x3f5   : > { %v1961_v37 = vmul.f32 %v5770_v18, %v6755_v57  ;;  %5771 = vpow2.f32 %v4930_v27  ;;  %v1953_v20 = vsel %vm1952_vm9, %v5766_v6, %v1949_v54  ;;  %vm1966_vm11 = vweird.f32 %v5770_v18 }
 0x3f6   : > { %5773 = vrcp.f32 %v1861_v59  ;;  %v1958_v55 = vsel %vm1955_vm10, %v1957_v15, %v1953_v20  ;;  %v1986_v36 = vand.u32 2147483648, %v1861_v59  ;;  %vm6790_vm13 = vmor %vm1965_vm12, %vm1966_vm11  ;;  %v1984_v33 = vand.u32 2147483647, %v1861_v59 }
 0x3f7   : > { %v1962_v61 = vsub.f32 1.0, %v1961_v37  ;;  %v6776_v8 = vmul.f32 %v1958_v55, %v6721_v48  ;;  %v1971_v48 = vand.u32 2147483648, %v6755_v57  ;;  %vm1980_vm15 = vweird.f32 %v1861_v59 }
 0x3f8   : > { %v1788_v1 = vpop.f32.mrf.mxu2  ;;  %v1987_v28 = vor.u32 1.1754944e-38, %v1986_v36  ;;  %vm1985_vm2 = vcmp.eq.f32.partialorder %v1984_v33, 8.507059e+37 }
 0x3f9   : > { %v6779_v52 = vadd.f32 %v6686_v0, %v1788_v1  ;;  %v2144_v43 = vpack.c.bf16 %v6776_v8, %v6773_v60  ;;  %v1963_v56 = vmul.f32 %v5770_v18, %v1962_v61  ;;  %v1972_v2 = vor.u32 1.1754944e-38, %v1971_v48 }
 0x3fb   : > { %v5772_v44 = vpop.eup %5771  ;;  %v4931_v7 = vmul.f32 -1.442695, %v6779_v52  ;;  %2218 = vmatmul.bf16.gmra.mxu3 %v2144_v43  ;;  %v1964_v46 = vadd.f32 %v5770_v18, %v1963_v56 }
 0x3fc   : > { %v5774_v10 = vpop.eup %5773  ;;  %v6784_v35 = vadd.f32 1.0, %v5772_v44 }
 0x3fd   : > { %5775 = vpow2.f32 %v4931_v7  ;;  %v1976_v63 = vmul.f32 %v5774_v10, %v1861_v59  ;;  %vm1981_vm14 = vweird.f32 %v5774_v10  ;;  %v1968_v22 = vsel %vm6790_vm13, %v5770_v18, %v1964_v46 }
 0x3fe   : > { %5777 = vrcp.f32 %v6784_v35  ;;  %vm1982_vm1 = vmor %vm1980_vm15, %vm1981_vm14  ;;  %v1973_v50 = vsel %vm1970_vm0, %v1972_v2, %v1968_v22  ;;  %vm1995_vm3 = vweird.f32 %v6784_v35 }
 0x3ff   : > { %v1977_v3 = vsub.f32 1.0, %v1976_v63  ;;  %v6802_v37 = vmul.f32 %v1973_v50, %v6739_v51  ;;  %v1999_v63 = vand.u32 2147483647, %v6784_v35 }
 0x400   : > { %v1791_v6 = vpop.f32.mrf.mxu2 }
 0x401   : > { %v6795_v30 = vadd.f32 %v6686_v0, %v1791_v6  ;;  %v1978_v42 = vmul.f32 %v5774_v10, %v1977_v3  ;;  %vm2000_vm7 = vcmp.eq.f32.partialorder %v1999_v63, 8.507059e+37 }
 0x403   : > { %v5776_v14 = vpop.eup %5775  ;;  %v4932_v13 = vmul.f32 -1.442695, %v6795_v30  ;;  %v1979_v57 = vadd.f32 %v5774_v10, %v1978_v42 }
 0x404   : > { %v5778_v24 = vpop.eup %5777  ;;  %v1863_v4 = vadd.f32 1.0, %v5776_v14 }
 0x405   : > { %v1991_v27 = vmul.f32 %v5778_v24, %v6784_v35  ;;  %5779 = vpow2.f32 %v4932_v13  ;;  %v1983_v54 = vsel %vm1982_vm1, %v5774_v10, %v1979_v57  ;;  %vm1996_vm5 = vweird.f32 %v5778_v24 }
 0x406   : > { %5781 = vrcp.f32 %v1863_v4  ;;  %v1988_v15 = vsel %vm1985_vm2, %v1987_v28, %v1983_v54  ;;  %vm6819_vm4 = vmor %vm1995_vm3, %vm1996_vm5  ;;  %v2014_v3 = vand.u32 2147483647, %v1863_v4  ;;  %v2016_v32 = vand.u32 2147483648, %v1863_v4 }
 0x407   : > { %v1992_v18 = vsub.f32 1.0, %v1991_v27  ;;  %v6805_v59 = vmul.f32 %v1988_v15, %v6750_v62  ;;  %v2001_v62 = vand.u32 2147483648, %v6784_v35  ;;  %vm2010_vm8 = vweird.f32 %v1863_v4 }
 0x408   : > { %v1793_v20 = vpop.f32.mrf.mxu2  ;;  %v2017_v57 = vor.u32 1.1754944e-38, %v2016_v32  ;;  %vm2015_vm10 = vcmp.eq.f32.partialorder %v2014_v3, 8.507059e+37 }
 0x409   : > { %v1993_v55 = vmul.f32 %v5778_v24, %v1992_v18  ;;  %v6808_v61 = vadd.f32 %v6686_v0, %v1793_v20  ;;  %v2145_v1 = vpack.c.bf16 %v6805_v59, %v6802_v37  ;;  %v2002_v22 = vor.u32 1.1754944e-38, %v2001_v62 }
 0x40b   : > { %v5780_v43 = vpop.eup %5779  ;;  %v4933_v56 = vmul.f32 -1.442695, %v6808_v61  ;;  %2223 = vmatmul.bf16.gmra.mxu3 %v2145_v1  ;;  %v1994_v51 = vadd.f32 %v5778_v24, %v1993_v55 }
 0x40c   : > { %v5782_v44 = vpop.eup %5781  ;;  %v6813_v7 = vadd.f32 1.0, %v5780_v43 }
 0x40d   : > { %v2006_v10 = vmul.f32 %v5782_v44, %v1863_v4  ;;  %5783 = vpow2.f32 %v4933_v56  ;;  %v1998_v36 = vsel %vm6819_vm4, %v5778_v24, %v1994_v51  ;;  %vm2011_vm6 = vweird.f32 %v5782_v44 }
 0x40e   : > { %5785 = vrcp.f32 %v6813_v7  ;;  %v2003_v13 = vsel %vm2000_vm7, %v2002_v22, %v1998_v36  ;;  %vm2012_vm9 = vmor %vm2010_vm8, %vm2011_vm6  ;;  %vm2025_vm12 = vweird.f32 %v6813_v7  ;;  %v2029_v62 = vand.u32 2147483647, %v6813_v7 }
 0x40f   : > { %v2007_v46 = vsub.f32 1.0, %v2006_v10  ;;  %v6831_v54 = vmul.f32 %v2003_v13, %v6768_v47  ;;  %v2031_v10 = vand.u32 2147483648, %v6813_v7 }
 0x410   : > { %v1796_v6 = vpop.f32.mrf.mxu2  ;;  %vm2030_vm15 = vcmp.eq.f32.partialorder %v2029_v62, 8.507059e+37 }
 0x411   : > { %v2008_v45 = vmul.f32 %v5782_v44, %v2007_v46  ;;  %v6826_v42 = vadd.f32 %v6686_v0, %v1796_v6  ;;  %v2032_v22 = vor.u32 1.1754944e-38, %v2031_v10 }
 0x413   : > { %v5784_v33 = vpop.eup %5783  ;;  %v2009_v35 = vadd.f32 %v5782_v44, %v2008_v45  ;;  %v4934_v14 = vmul.f32 -1.442695, %v6826_v42 }
 0x414   : > { %v5786_v2 = vpop.eup %5785  ;;  %v1865_v28 = vadd.f32 1.0, %v5784_v33 }
 0x415   : > { %v2013_v50 = vsel %vm2012_vm9, %v5782_v44, %v2009_v35  ;;  %v2021_v24 = vmul.f32 %v5786_v2, %v6813_v7  ;;  %5787 = vpow2.f32 %v4934_v14  ;;  %vm2026_vm11 = vweird.f32 %v5786_v2 }
 0x416   : > { %v2018_v27 = vsel %vm2015_vm10, %v2017_v57, %v2013_v50  ;;  %5789 = vrcp.f32 %v1865_v28  ;;  %vm6848_vm13 = vmor %vm2025_vm12, %vm2026_vm11  ;;  %v2044_v48 = vand.u32 2147483647, %v1865_v28  ;;  %v2046_v3 = vand.u32 2147483648, %v1865_v28 }
 0x417   : > { %v6834_v18 = vmul.f32 %v2018_v27, %v6779_v52  ;;  %v2022_v4 = vsub.f32 1.0, %v2021_v24  ;;  %vm2040_vm0 = vweird.f32 %v1865_v28 }
 0x418   : > { %v1798_v15 = vpop.f32.mrf.mxu2  ;;  %v2047_v57 = vor.u32 1.1754944e-38, %v2046_v3  ;;  %vm2045_vm2 = vcmp.eq.f32.partialorder %v2044_v48, 8.507059e+37 }
 0x419   : > { %v2023_v20 = vmul.f32 %v5786_v2, %v2022_v4  ;;  %v6837_v55 = vadd.f32 %v6686_v0, %v1798_v15  ;;  %v2146_v1 = vpack.c.bf16 %v6834_v18, %v6831_v54  ;;  %v5433_v15 = vld [vmem:[#allocation9 + $0x168] sm:$0xff] }
 0x41a   : > { %2645 = vmatpush.bf16.msrb.mxu0 %v5433_v15 }
 0x41b   : > { %v5788_v43 = vpop.eup %5787  ;;  %v4935_v56 = vmul.f32 -1.442695, %v6837_v55  ;;  %2228 = vmatmul.bf16.gmra.mxu3 %v2146_v1  ;;  %v2024_v52 = vadd.f32 %v5786_v2, %v2023_v20 }
 0x41c   : > { %v5790_v44 = vpop.eup %5789  ;;  %v6842_v47 = vadd.f32 1.0, %v5788_v43 }
 0x41d   : > { %v2036_v51 = vmul.f32 %v5790_v44, %v1865_v28  ;;  %5791 = vpow2.f32 %v4935_v56  ;;  %v2028_v6 = vsel %vm6848_vm13, %v5786_v2, %v2024_v52  ;;  %vm2041_vm14 = vweird.f32 %v5790_v44 }
 0x41e   : > { %5793 = vrcp.f32 %v6842_v47  ;;  %v2033_v13 = vsel %vm2030_vm15, %v2032_v22, %v2028_v6  ;;  %vm2042_vm1 = vmor %vm2040_vm0, %vm2041_vm14  ;;  %vm2055_vm3 = vweird.f32 %v6842_v47  ;;  %v2059_v46 = vand.u32 2147483647, %v6842_v47  ;;  %v5430_v22 = vld [vmem:[#allocation9 + $0x150] sm:$0xff] }
 0x41f   : > { %v2037_v63 = vsub.f32 1.0, %v2036_v51  ;;  %v6860_v4 = vmul.f32 %v2033_v13, %v6795_v30 }
 0x420   : > { %v1801_v32 = vpop.f32.mrf.mxu2  ;;  %vm2060_vm7 = vcmp.eq.f32.partialorder %v2059_v46, 8.507059e+37 }
 0x421   : > { %v2038_v36 = vmul.f32 %v5790_v44, %v2037_v63  ;;  %v6855_v45 = vadd.f32 %v6686_v0, %v1801_v32  ;;  %v5431_v63 = vld [vmem:[#allocation9 + $0x158] sm:$0xff] }
 0x423   : > { %v5792_v33 = vpop.eup %5791  ;;  %v2039_v7 = vadd.f32 %v5790_v44, %v2038_v36  ;;  %v4936_v35 = vmul.f32 -1.442695, %v6855_v45 }
 0x424   : > { %v5794_v14 = vpop.eup %5793  ;;  %v1867_v50 = vadd.f32 1.0, %v5792_v33 }
 0x425   : > { %v2043_v24 = vsel %vm2042_vm1, %v5790_v44, %v2039_v7  ;;  %v2051_v2 = vmul.f32 %v5794_v14, %v6842_v47  ;;  %5795 = vpow2.f32 %v4936_v35  ;;  %v5432_v44 = vld [vmem:[#allocation9 + $0x160] sm:$0xff]  ;;  %vm2056_vm5 = vweird.f32 %v5794_v14 }
 0x426   : > { %v2048_v27 = vsel %vm2045_vm2, %v2047_v57, %v2043_v24  ;;  %5797 = vrcp.f32 %v1867_v50  ;;  %2646 = vmatpush.bf16.msrb.mxu0 %v5432_v44  ;;  %vm2057_vm4 = vmor %vm2055_vm3, %vm2056_vm5  ;;  %v2076_v3 = vand.u32 2147483648, %v1867_v50  ;;  %v2074_v36 = vand.u32 2147483647, %v1867_v50 }
 0x427   : > { %v6863_v26 = vmul.f32 %v2048_v27, %v6808_v61  ;;  %v2052_v28 = vsub.f32 1.0, %v2051_v2  ;;  %vm2070_vm8 = vweird.f32 %v1867_v50 }
 0x428   : > { %v1803_v20 = vpop.f32.mrf.mxu2  ;;  %v2077_v24 = vor.u32 1.1754944e-38, %v2076_v3  ;;  %vm2075_vm10 = vcmp.eq.f32.partialorder %v2074_v36, 8.507059e+37 }
 0x429   : > { %v2053_v1 = vmul.f32 %v5794_v14, %v2052_v28  ;;  %v6866_v43 = vadd.f32 %v6686_v0, %v1803_v20  ;;  %v2147_v56 = vpack.c.bf16 %v6863_v26, %v6860_v4  ;;  %v2061_v0 = vand.u32 2147483648, %v6842_v47 }
 0x42a   : > { %2647 = vmatpush.bf16.msrb.mxu0 %v5431_v63 }
 0x42b   : > { %v5796_v52 = vpop.eup %5795  ;;  %v4937_v51 = vmul.f32 -1.442695, %v6866_v43  ;;  %2233 = vmatmul.bf16.gmra.mxu3 %v2147_v56  ;;  %v2054_v61 = vadd.f32 %v5794_v14, %v2053_v1  ;;  %v2062_v33 = vor.u32 1.1754944e-38, %v2061_v0 }
 0x42c   : > { %v5798_v30 = vpop.eup %5797  ;;  %v1868_v10 = vadd.f32 1.0, %v5796_v52 }
 0x42d   : > { %v2066_v62 = vmul.f32 %v5798_v30, %v1867_v50  ;;  %5799 = vpow2.f32 %v4937_v51  ;;  %v2058_v32 = vsel %vm2057_vm4, %v5794_v14, %v2054_v61  ;;  %vm2071_vm6 = vweird.f32 %v5798_v30 }
 0x42e   : > { %5801 = vrcp.f32 %v1868_v10  ;;  %v2063_v57 = vsel %vm2060_vm7, %v2062_v33, %v2058_v32  ;;  %vm2072_vm9 = vmor %vm2070_vm8, %vm2071_vm6  ;;  %2648 = vmatpush.bf16.msrb.mxu0 %v5430_v22  ;;  %v2091_v51 = vand.u32 2147483648, %v1868_v10  ;;  %vm2085_vm12 = vweird.f32 %v1868_v10  ;;  %v6893_v33 = vld [vmem:[%s7445_s8 + $0x3] ss:$0 sm:$0xff] }
 0x42f   : > { %v2067_v48 = vsub.f32 1.0, %v2066_v62  ;;  %v6875_v28 = vmul.f32 %v2063_v57, %v6826_v42  ;;  %v5428_v57 = vld [vmem:[#allocation9 + $0x140] sm:$0xff] }
 0x430   : > { %v2092_v0 = vor.u32 1.1754944e-38, %v2091_v51 }
 0x431   : > { %v2068_v6 = vmul.f32 %v5798_v30, %v2067_v48 }
 0x433   : > { %v5800_v7 = vpop.eup %5799  ;;  %v2069_v35 = vadd.f32 %v5798_v30, %v2068_v6 }
 0x434   : > { %v5802_v13 = vpop.eup %5801  ;;  %v1869_v2 = vadd.f32 1.0, %v5800_v7 }
 0x435   : > { %v2073_v47 = vsel %vm2072_vm9, %v5798_v30, %v2069_v35  ;;  %v2081_v27 = vmul.f32 %v5802_v13, %v1868_v10  ;;  %vm2086_vm11 = vweird.f32 %v5802_v13  ;;  %v2089_v30 = vand.u32 2147483647, %v1868_v10 }
 0x436   : > { %v2078_v14 = vsel %vm2075_vm10, %v2077_v24, %v2073_v47  ;;  %5803 = vrcp.f32 %v1869_v2  ;;  %vm2087_vm13 = vmor %vm2085_vm12, %vm2086_vm11  ;;  %v2106_v42 = vand.u32 2147483648, %v1869_v2  ;;  %vm2100_vm0 = vweird.f32 %v1869_v2 }
 0x437   : > { %v6878_v15 = vmul.f32 %v2078_v14, %v6837_v55  ;;  %v2082_v20 = vsub.f32 1.0, %v2081_v27  ;;  %v2104_v55 = vand.u32 2147483647, %v1869_v2  ;;  %vm2090_vm15 = vcmp.eq.f32.partialorder %v2089_v30, 8.507059e+37 }
 0x438   : > { %v2107_v3 = vor.u32 1.1754944e-38, %v2106_v42 }
 0x439   : > { %v2083_v1 = vmul.f32 %v5802_v13, %v2082_v20  ;;  %v2148_v50 = vpack.c.bf16 %v6878_v15, %v6875_v28  ;;  %vm2105_vm2 = vcmp.eq.f32.partialorder %v2104_v55, 8.507059e+37 }
 0x43b   : > { %2238 = vmatmul.bf16.gmra.mxu3 %v2148_v50  ;;  %v2084_v44 = vadd.f32 %v5802_v13, %v2083_v1 }
 0x43c   : > { %v5804_v56 = vpop.eup %5803 }
 0x43d   : > { %v2096_v52 = vmul.f32 %v5804_v56, %v1869_v2  ;;  %v2088_v62 = vsel %vm2087_vm13, %v5802_v13, %v2084_v44  ;;  %vm2101_vm14 = vweird.f32 %v5804_v56 }
 0x43e   : > { %v2093_v48 = vsel %vm2090_vm15, %v2092_v0, %v2088_v62  ;;  %vm2102_vm1 = vmor %vm2100_vm0, %vm2101_vm14 }
 0x43f   : > { %v2097_v61 = vsub.f32 1.0, %v2096_v52  ;;  %v6883_v36 = vmul.f32 %v2093_v48, %v6855_v45  ;;  %v5429_v45 = vld [vmem:[#allocation9 + $0x148] sm:$0xff] }
 0x440   : > { %2649 = vmatpush.bf16.msrb.mxu0 %v5429_v45 }
 0x441   : > { %v2098_v63 = vmul.f32 %v5804_v56, %v2097_v61 }
 0x443   : > { %v2099_v46 = vadd.f32 %v5804_v56, %v2098_v63 }
 0x444   : > { %2650 = vmatpush.bf16.msrb.mxu0 %v5428_v57 }
 0x445   : > { %v2103_v32 = vsel %vm2102_vm1, %v5804_v56, %v2099_v46 }
 0x446   : > { %v2108_v6 = vsel %vm2105_vm2, %v2107_v3, %v2103_v32 }
 0x447   : > { %v6886_v10 = vmul.f32 %v2108_v6, %v6866_v43 }
 0x449   : > { %v2149_v22 = vpack.c.bf16 %v6886_v10, %v6883_v36 }
 0x44b   : > { %2243 = vmatmul.bf16.gmra.mxu3 %v2149_v22 }
 0x45e   : > { %v2209_v7 = vpop.f32.mrf.mxu3 }
 0x45f   : > { %v6896_v35 = vadd.f32 %v6893_v33, %v2209_v7 }
 0x461   : > { %v4970_v13 = vmul.f32 -1.442695, %v6896_v35 }
 0x463   : > { %5805 = vpow2.f32 %v4970_v13 }
 0x466   : > { %v2211_v43 = vpop.f32.mrf.mxu3 }
 0x467   : > { %v2212_v24 = vadd.f32 %v6893_v33, %v2211_v43 }
 0x469   : > { %v5806_v2 = vpop.eup %5805  ;;  %v4971_v47 = vmul.f32 -1.442695, %v2212_v24 }
 0x46a   : > { %v2297_v27 = vadd.f32 1.0, %v5806_v2 }
 0x46b   : > { %5807 = vpow2.f32 %v4971_v47 }
 0x46c   : > { %5809 = vrcp.f32 %v2297_v27  ;;  %v2324_v3 = vand.u32 2147483648, %v2297_v27  ;;  %vm2318_vm3 = vweird.f32 %v2297_v27  ;;  %v2322_v32 = vand.u32 2147483647, %v2297_v27 }
 0x46e   : > { %v2214_v14 = vpop.f32.mrf.mxu3  ;;  %v2325_v47 = vor.u32 1.1754944e-38, %v2324_v3  ;;  %vm2323_vm7 = vcmp.eq.f32.partialorder %v2322_v32, 8.507059e+37 }
 0x46f   : > { %v6901_v20 = vadd.f32 %v6893_v33, %v2214_v14 }
 0x471   : > { %v5808_v1 = vpop.eup %5807  ;;  %v4972_v50 = vmul.f32 -1.442695, %v6901_v20 }
 0x472   : > { %v5810_v56 = vpop.eup %5809  ;;  %v2298_v44 = vadd.f32 1.0, %v5808_v1 }
 0x473   : > { %v2314_v52 = vmul.f32 %v5810_v56, %v2297_v27  ;;  %5811 = vpow2.f32 %v4972_v50  ;;  %vm2319_vm5 = vweird.f32 %v5810_v56 }
 0x474   : > { %5813 = vrcp.f32 %v2298_v44  ;;  %vm6911_vm4 = vmor %vm2318_vm3, %vm2319_vm5  ;;  %v2337_v7 = vand.u32 2147483647, %v2298_v44  ;;  %v2339_v13 = vand.u32 2147483648, %v2298_v44  ;;  %vm2333_vm8 = vweird.f32 %v2298_v44 }
 0x475   : > { %v2315_v51 = vsub.f32 1.0, %v2314_v52 }
 0x476   : > { %v2216_v30 = vpop.f32.mrf.mxu3  ;;  %vm2338_vm10 = vcmp.eq.f32.partialorder %v2337_v7, 8.507059e+37 }
 0x477   : > { %v2316_v61 = vmul.f32 %v5810_v56, %v2315_v51  ;;  %v6905_v42 = vadd.f32 %v6893_v33, %v2216_v30  ;;  %v2340_v51 = vor.u32 1.1754944e-38, %v2339_v13 }
 0x479   : > { %v5812_v62 = vpop.eup %5811  ;;  %v4973_v63 = vmul.f32 -1.442695, %v6905_v42  ;;  %v2317_v46 = vadd.f32 %v5810_v56, %v2316_v61 }
 0x47a   : > { %v5814_v55 = vpop.eup %5813  ;;  %v6908_v0 = vadd.f32 1.0, %v5812_v62 }
 0x47b   : > { %v2329_v48 = vmul.f32 %v5814_v55, %v2298_v44  ;;  %5815 = vpow2.f32 %v4973_v63  ;;  %v2321_v43 = vsel %vm6911_vm4, %v5810_v56, %v2317_v46  ;;  %vm2334_vm6 = vweird.f32 %v5814_v55 }
 0x47c   : > { %5817 = vrcp.f32 %v6908_v0  ;;  %v2326_v52 = vsel %vm2323_vm7, %v2325_v47, %v2321_v43  ;;  %vm2335_vm9 = vmor %vm2333_vm8, %vm2334_vm6  ;;  %vm2348_vm12 = vweird.f32 %v6908_v0 }
 0x47d   : > { %v2330_v6 = vsub.f32 1.0, %v2329_v48  ;;  %v2553_v63 = vmul.f32 %v2326_v52, %v6896_v35  ;;  %v2354_v35 = vand.u32 2147483648, %v6908_v0 }
 0x47e   : > { %v2219_v45 = vpop.f32.mrf.mxu3 }
 0x47f   : > { %v2331_v57 = vmul.f32 %v5814_v55, %v2330_v6  ;;  %v6918_v2 = vadd.f32 %v6893_v33, %v2219_v45 }
 0x481   : > { %v5816_v14 = vpop.eup %5815  ;;  %v2332_v27 = vadd.f32 %v5814_v55, %v2331_v57  ;;  %v4974_v1 = vmul.f32 -1.442695, %v6918_v2 }
 0x482   : > { %v5818_v50 = vpop.eup %5817  ;;  %v2300_v30 = vadd.f32 1.0, %v5816_v14 }
 0x483   : > { %v2336_v61 = vsel %vm2335_vm9, %v5814_v55, %v2332_v27  ;;  %v2344_v56 = vmul.f32 %v5818_v50, %v6908_v0  ;;  %5819 = vpow2.f32 %v4974_v1  ;;  %vm2349_vm11 = vweird.f32 %v5818_v50 }
 0x484   : > { %v2341_v62 = vsel %vm2338_vm10, %v2340_v51, %v2336_v61  ;;  %5821 = vrcp.f32 %v2300_v30  ;;  %vm2350_vm13 = vmor %vm2348_vm12, %vm2349_vm11  ;;  %v2369_v47 = vand.u32 2147483648, %v2300_v30  ;;  %v2367_v1 = vand.u32 2147483647, %v2300_v30 }
 0x485   : > { %v2554_v46 = vmul.f32 %v2341_v62, %v2212_v24  ;;  %v2345_v48 = vsub.f32 1.0, %v2344_v56  ;;  %v2352_v24 = vand.u32 2147483647, %v6908_v0  ;;  %v2355_v51 = vor.u32 1.1754944e-38, %v2354_v35 }
 0x486   : > { %v2221_v3 = vpop.f32.mrf.mxu3  ;;  %vm2363_vm0 = vweird.f32 %v2300_v30  ;;  %v2370_v0 = vor.u32 1.1754944e-38, %v2369_v47  ;;  %vm2368_vm2 = vcmp.eq.f32.partialorder %v2367_v1, 8.507059e+37 }
 0x487   : > { %v2346_v44 = vmul.f32 %v5818_v50, %v2345_v48  ;;  %v6924_v32 = vadd.f32 %v6893_v33, %v2221_v3  ;;  %v2585_v6 = vpack.c.bf16 %v2554_v46, %v2553_v63  ;;  %vm2353_vm15 = vcmp.eq.f32.partialorder %v2352_v24, 8.507059e+37 }
 0x489   : > { %v5820_v22 = vpop.eup %5819  ;;  %v4975_v13 = vmul.f32 -1.442695, %v6924_v32  ;;  %2651 = vmatmul.bf16.vlgmr.msrb.gmra.mxu0 %v2585_v6  ;;  %v2347_v45 = vadd.f32 %v5818_v50, %v2346_v44 }
 0x48a   : > { %v5822_v55 = vpop.eup %5821  ;;  %v6927_v7 = vadd.f32 1.0, %v5820_v22 }
 0x48b   : > { %v2359_v43 = vmul.f32 %v5822_v55, %v2300_v30  ;;  %5823 = vpow2.f32 %v4975_v13  ;;  %v2351_v14 = vsel %vm2350_vm13, %v5818_v50, %v2347_v45  ;;  %vm2364_vm14 = vweird.f32 %v5822_v55 }
 0x48c   : > { %5825 = vrcp.f32 %v6927_v7  ;;  %v2356_v46 = vsel %vm2353_vm15, %v2355_v51, %v2351_v14  ;;  %vm2365_vm1 = vmor %vm2363_vm0, %vm2364_vm14  ;;  %vm2378_vm3 = vweird.f32 %v6927_v7 }
 0x48d   : > { %v2360_v57 = vsub.f32 1.0, %v2359_v43  ;;  %v2555_v22 = vmul.f32 %v2356_v46, %v6901_v20  ;;  %v2384_v20 = vand.u32 2147483648, %v6927_v7 }
 0x48e   : > { %v2224_v52 = vpop.f32.mrf.mxu3 }
 0x48f   : > { %v2361_v27 = vmul.f32 %v5822_v55, %v2360_v57  ;;  %v6934_v61 = vadd.f32 %v6893_v33, %v2224_v52 }
 0x491   : > { %v5824_v56 = vpop.eup %5823  ;;  %v2362_v62 = vadd.f32 %v5822_v55, %v2361_v27  ;;  %v4976_v3 = vmul.f32 -1.442695, %v6934_v61 }
 0x492   : > { %v5826_v63 = vpop.eup %5825  ;;  %v2302_v48 = vadd.f32 1.0, %v5824_v56 }
 0x493   : > { %v2366_v50 = vsel %vm2365_vm1, %v5822_v55, %v2362_v62  ;;  %v2374_v44 = vmul.f32 %v5826_v63, %v6927_v7  ;;  %vm2379_vm5 = vweird.f32 %v5826_v63 }
 0x494   : > { %v2371_v6 = vsel %vm2368_vm2, %v2370_v0, %v2366_v50  ;;  %5827 = vrcp.f32 %v2302_v48  ;;  %vm2380_vm4 = vmor %vm2378_vm3, %vm2379_vm5  ;;  %v2399_v51 = vand.u32 2147483648, %v2302_v48  ;;  %v2397_v46 = vand.u32 2147483647, %v2302_v48 }
 0x495   : > { %v2556_v13 = vmul.f32 %v2371_v6, %v6905_v42  ;;  %v2375_v45 = vsub.f32 1.0, %v2374_v44  ;;  %5829 = vpow2.f32 %v4976_v3  ;;  %v2382_v42 = vand.u32 2147483647, %v6927_v7 }
 0x496   : > { %v2226_v43 = vpop.f32.mrf.mxu3  ;;  %v2385_v3 = vor.u32 1.1754944e-38, %v2384_v20  ;;  %vm2393_vm8 = vweird.f32 %v2302_v48  ;;  %v2400_v7 = vor.u32 1.1754944e-38, %v2399_v51  ;;  %vm2398_vm10 = vcmp.eq.f32.partialorder %v2397_v46, 8.507059e+37 }
 0x497   : > { %v2376_v30 = vmul.f32 %v5826_v63, %v2375_v45  ;;  %v2586_v35 = vpack.c.bf16 %v2556_v13, %v2555_v22  ;;  %v6941_v24 = vadd.f32 %v6893_v33, %v2226_v43  ;;  %vm2383_vm7 = vcmp.eq.f32.partialorder %v2382_v42, 8.507059e+37 }
 0x499   : > { %2656 = vmatmul.bf16.gmra.mxu0 %v2586_v35  ;;  %v4977_v55 = vmul.f32 -1.442695, %v6941_v24  ;;  %v2377_v14 = vadd.f32 %v5826_v63, %v2376_v30 }
 0x49a   : > { %v5828_v57 = vpop.eup %5827 }
 0x49b   : > { %v5830_v47 = vpop.eup %5829  ;;  %v2389_v27 = vmul.f32 %v5828_v57, %v2302_v48  ;;  %5831 = vpow2.f32 %v4977_v55  ;;  %v2381_v56 = vsel %vm2380_vm4, %v5826_v63, %v2377_v14  ;;  %vm2394_vm6 = vweird.f32 %v5828_v57 }
 0x49c   : > { %v6945_v1 = vadd.f32 1.0, %v5830_v47  ;;  %v2386_v22 = vsel %vm2383_vm7, %v2385_v3, %v2381_v56  ;;  %vm2395_vm9 = vmor %vm2393_vm8, %vm2394_vm6  ;;  %v5443_v3 = vld [vmem:[#allocation9 + $0x1b8] sm:$0xff] }
 0x49d   : > { %v2390_v52 = vsub.f32 1.0, %v2389_v27  ;;  %v2557_v35 = vmul.f32 %v2386_v22, %v6918_v2  ;;  %3086 = vmatpush.bf16.msrb.mxu1 %v5443_v3 }
 0x49e   : > { %5833 = vrcp.f32 %v6945_v1  ;;  %v2229_v0 = vpop.f32.mrf.mxu3  ;;  %vm2408_vm12 = vweird.f32 %v6945_v1  ;;  %v2412_v46 = vand.u32 2147483647, %v6945_v1 }
 0x49f   : > { %v2391_v62 = vmul.f32 %v5828_v57, %v2390_v52  ;;  %v6951_v50 = vadd.f32 %v6893_v33, %v2229_v0 }
 0x4a0   : > { %vm2413_vm15 = vcmp.eq.f32.partialorder %v2412_v46, 8.507059e+37 }
 0x4a1   : > { %v2392_v44 = vadd.f32 %v5828_v57, %v2391_v62  ;;  %v5832_v6 = vpop.eup %5831  ;;  %v4978_v13 = vmul.f32 -1.442695, %v6951_v50  ;;  %v2414_v62 = vand.u32 2147483648, %v6945_v1 }
 0x4a2   : > { %v2304_v63 = vadd.f32 1.0, %v5832_v6 }
 0x4a3   : > { %v2396_v45 = vsel %vm2395_vm9, %v5828_v57, %v2392_v44  ;;  %5835 = vpow2.f32 %v4978_v13 }
 0x4a4   : > { %v5834_v30 = vpop.eup %5833  ;;  %v2401_v43 = vsel %vm2398_vm10, %v2400_v7, %v2396_v45  ;;  %5837 = vrcp.f32 %v2304_v63  ;;  %v2427_v6 = vand.u32 2147483647, %v2304_v63  ;;  %v2429_v22 = vand.u32 2147483648, %v2304_v63 }
 0x4a5   : > { %v2558_v55 = vmul.f32 %v2401_v43, %v6924_v32  ;;  %v2404_v47 = vmul.f32 %v5834_v30, %v6945_v1  ;;  %vm2409_vm11 = vweird.f32 %v5834_v30  ;;  %vm2423_vm0 = vweird.f32 %v2304_v63 }
 0x4a6   : > { %v2231_v14 = vpop.f32.mrf.mxu3  ;;  %vm6967_vm13 = vmor %vm2408_vm12, %vm2409_vm11  ;;  %vm2428_vm2 = vcmp.eq.f32.partialorder %v2427_v6, 8.507059e+37 }
 0x4a7   : > { %v2405_v48 = vsub.f32 1.0, %v2404_v47  ;;  %v2587_v27 = vpack.c.bf16 %v2558_v55, %v2557_v35  ;;  %v6958_v20 = vadd.f32 %v6893_v33, %v2231_v14  ;;  %v2415_v35 = vor.u32 1.1754944e-38, %v2414_v62 }
 0x4a9   : > { %v2406_v42 = vmul.f32 %v5834_v30, %v2405_v48  ;;  %2661 = vmatmul.bf16.gmra.mxu0 %v2587_v27  ;;  %v5836_v57 = vpop.eup %5835  ;;  %v4979_v52 = vmul.f32 -1.442695, %v6958_v20  ;;  %v2430_v27 = vor.u32 1.1754944e-38, %v2429_v22 }
 0x4aa   : > { %v5838_v51 = vpop.eup %5837  ;;  %v6961_v56 = vadd.f32 1.0, %v5836_v57 }
 0x4ab   : > { %v2407_v2 = vadd.f32 %v5834_v30, %v2406_v42  ;;  %v2419_v32 = vmul.f32 %v5838_v51, %v2304_v63  ;;  %5839 = vpow2.f32 %v4979_v52  ;;  %vm2424_vm14 = vweird.f32 %v5838_v51 }
 0x4ac   : > { %5841 = vrcp.f32 %v6961_v56  ;;  %vm2425_vm1 = vmor %vm2423_vm0, %vm2424_vm14  ;;  %vm2438_vm3 = vweird.f32 %v6961_v56 }
 0x4ad   : > { %v2420_v0 = vsub.f32 1.0, %v2419_v32  ;;  %v2411_v13 = vsel %vm6967_vm13, %v5834_v30, %v2407_v2 }
 0x4ae   : > { %v2234_v7 = vpop.f32.mrf.mxu3  ;;  %v2416_v14 = vsel %vm2413_vm15, %v2415_v35, %v2411_v13  ;;  %v5442_v35 = vld [vmem:[#allocation9 + $0x1b0] sm:$0xff] }
 0x4af   : > { %v2421_v45 = vmul.f32 %v5838_v51, %v2420_v0  ;;  %v6974_v43 = vadd.f32 %v6893_v33, %v2234_v7  ;;  %v2559_v2 = vmul.f32 %v2416_v14, %v6934_v61  ;;  %v2444_v61 = vand.u32 2147483648, %v6961_v56  ;;  %3087 = vmatpush.bf16.msrb.mxu1 %v5442_v35 }
 0x4b1   : > { %v5840_v1 = vpop.eup %5839  ;;  %v2422_v55 = vadd.f32 %v5838_v51, %v2421_v45  ;;  %v4980_v47 = vmul.f32 -1.442695, %v6974_v43 }
 0x4b2   : > { %v5842_v48 = vpop.eup %5841  ;;  %v2306_v42 = vadd.f32 1.0, %v5840_v1 }
 0x4b3   : > { %v2426_v57 = vsel %vm2425_vm1, %v5838_v51, %v2422_v55  ;;  %v2434_v30 = vmul.f32 %v5842_v48, %v6961_v56  ;;  %5843 = vpow2.f32 %v4980_v47  ;;  %vm2439_vm5 = vweird.f32 %v5842_v48 }
 0x4b4   : > { %v2431_v52 = vsel %vm2428_vm2, %v2430_v27, %v2426_v57  ;;  %5845 = vrcp.f32 %v2306_v42  ;;  %vm6990_vm4 = vmor %vm2438_vm3, %vm2439_vm5  ;;  %v2457_v55 = vand.u32 2147483647, %v2306_v42  ;;  %v2459_v47 = vand.u32 2147483648, %v2306_v42 }
 0x4b5   : > { %v2560_v32 = vmul.f32 %v2431_v52, %v6941_v24  ;;  %v2435_v62 = vsub.f32 1.0, %v2434_v30  ;;  %v2442_v24 = vand.u32 2147483647, %v6961_v56  ;;  %v2445_v52 = vor.u32 1.1754944e-38, %v2444_v61 }
 0x4b6   : > { %v2236_v63 = vpop.f32.mrf.mxu3  ;;  %vm2453_vm8 = vweird.f32 %v2306_v42  ;;  %vm2458_vm10 = vcmp.eq.f32.partialorder %v2457_v55, 8.507059e+37 }
 0x4b7   : > { %v2436_v46 = vmul.f32 %v5842_v48, %v2435_v62  ;;  %v6981_v0 = vadd.f32 %v6893_v33, %v2236_v63  ;;  %v2588_v3 = vpack.c.bf16 %v2560_v32, %v2559_v2  ;;  %vm2443_vm7 = vcmp.eq.f32.partialorder %v2442_v24, 8.507059e+37 }
 0x4b9   : > { %v5844_v44 = vpop.eup %5843  ;;  %v4981_v51 = vmul.f32 -1.442695, %v6981_v0  ;;  %2666 = vmatmul.bf16.gmra.mxu0 %v2588_v3  ;;  %v2437_v7 = vadd.f32 %v5842_v48, %v2436_v46  ;;  %v2460_v46 = vor.u32 1.1754944e-38, %v2459_v47 }
 0x4ba   : > { %v5846_v6 = vpop.eup %5845  ;;  %v6984_v22 = vadd.f32 1.0, %v5844_v44 }
 0x4bb   : > { %v2449_v13 = vmul.f32 %v5846_v6, %v2306_v42  ;;  %5847 = vpow2.f32 %v4981_v51  ;;  %v2441_v27 = vsel %vm6990_vm4, %v5842_v48, %v2437_v7  ;;  %vm2454_vm6 = vweird.f32 %v5846_v6 }
 0x4bc   : > { %5849 = vrcp.f32 %v6984_v22  ;;  %v2446_v63 = vsel %vm2443_vm7, %v2445_v52, %v2441_v27  ;;  %vm2455_vm9 = vmor %vm2453_vm8, %vm2454_vm6  ;;  %vm2468_vm12 = vweird.f32 %v6984_v22  ;;  %v5441_v52 = vld [vmem:[#allocation9 + $0x1a8] sm:$0xff] }
 0x4bd   : > { %v2450_v45 = vsub.f32 1.0, %v2449_v13  ;;  %v2561_v7 = vmul.f32 %v2446_v63, %v6951_v50  ;;  %v2474_v50 = vand.u32 2147483648, %v6984_v22  ;;  %3088 = vmatpush.bf16.msrb.mxu1 %v5441_v52 }
 0x4be   : > { %v2239_v14 = vpop.f32.mrf.mxu3 }
 0x4bf   : > { %v2451_v57 = vmul.f32 %v5846_v6, %v2450_v45  ;;  %v6997_v30 = vadd.f32 %v6893_v33, %v2239_v14 }
 0x4c1   : > { %v5848_v56 = vpop.eup %5847  ;;  %v2452_v2 = vadd.f32 %v5846_v6, %v2451_v57  ;;  %v4982_v32 = vmul.f32 -1.442695, %v6997_v30 }
 0x4c2   : > { %v5850_v62 = vpop.eup %5849  ;;  %v2308_v3 = vadd.f32 1.0, %v5848_v56 }
 0x4c3   : > { %v2456_v44 = vsel %vm2455_vm9, %v5846_v6, %v2452_v2  ;;  %v2464_v48 = vmul.f32 %v5850_v62, %v6984_v22  ;;  %5851 = vpow2.f32 %v4982_v32  ;;  %vm2469_vm11 = vweird.f32 %v5850_v62 }
 0x4c4   : > { %v2461_v51 = vsel %vm2458_vm10, %v2460_v46, %v2456_v44  ;;  %5853 = vrcp.f32 %v2308_v3  ;;  %vm7013_vm13 = vmor %vm2468_vm12, %vm2469_vm11  ;;  %v2487_v2 = vand.u32 2147483647, %v2308_v3  ;;  %v2489_v32 = vand.u32 2147483648, %v2308_v3 }
 0x4c5   : > { %v2562_v13 = vmul.f32 %v2461_v51, %v6958_v20  ;;  %v2465_v61 = vsub.f32 1.0, %v2464_v48  ;;  %v2472_v20 = vand.u32 2147483647, %v6984_v22  ;;  %v2475_v51 = vor.u32 1.1754944e-38, %v2474_v50 }
 0x4c6   : > { %v2241_v42 = vpop.f32.mrf.mxu3  ;;  %vm2483_vm0 = vweird.f32 %v2308_v3  ;;  %vm2488_vm2 = vcmp.eq.f32.partialorder %v2487_v2, 8.507059e+37 }
 0x4c7   : > { %v2466_v24 = vmul.f32 %v5850_v62, %v2465_v61  ;;  %v7004_v45 = vadd.f32 %v6893_v33, %v2241_v42  ;;  %v2589_v35 = vpack.c.bf16 %v2562_v13, %v2561_v7  ;;  %vm2473_vm15 = vcmp.eq.f32.partialorder %v2472_v20, 8.507059e+37 }
 0x4c9   : > { %v5852_v1 = vpop.eup %5851  ;;  %v4983_v6 = vmul.f32 -1.442695, %v7004_v45  ;;  %2671 = vmatmul.bf16.gmra.mxu0 %v2589_v35  ;;  %v2467_v14 = vadd.f32 %v5850_v62, %v2466_v24  ;;  %v2490_v24 = vor.u32 1.1754944e-38, %v2489_v32 }
 0x4ca   : > { %v5854_v55 = vpop.eup %5853  ;;  %v7007_v47 = vadd.f32 1.0, %v5852_v1 }
 0x4cb   : > { %v2479_v27 = vmul.f32 %v5854_v55, %v2308_v3  ;;  %5855 = vpow2.f32 %v4983_v6  ;;  %v2471_v46 = vsel %vm7013_vm13, %v5850_v62, %v2467_v14  ;;  %vm2484_vm14 = vweird.f32 %v5854_v55  ;;  %v5440_v3 = vld [vmem:[#allocation9 + $0x1a0] sm:$0xff] }
 0x4cc   : > { %5857 = vrcp.f32 %v7007_v47  ;;  %v2476_v42 = vsel %vm2473_vm15, %v2475_v51, %v2471_v46  ;;  %vm2485_vm1 = vmor %vm2483_vm0, %vm2484_vm14  ;;  %3089 = vmatpush.bf16.msrb.mxu1 %v5440_v3  ;;  %v2504_v51 = vand.u32 2147483648, %v7007_v47  ;;  %vm2498_vm3 = vweird.f32 %v7007_v47 }
 0x4cd   : > { %v2480_v57 = vsub.f32 1.0, %v2479_v27  ;;  %v2563_v14 = vmul.f32 %v2476_v42, %v6974_v43 }
 0x4ce   : > { %v2244_v63 = vpop.f32.mrf.mxu3 }
 0x4cf   : > { %v2481_v44 = vmul.f32 %v5854_v55, %v2480_v57  ;;  %v7020_v48 = vadd.f32 %v6893_v33, %v2244_v63 }
 0x4d1   : > { %v5856_v22 = vpop.eup %5855  ;;  %v2482_v7 = vadd.f32 %v5854_v55, %v2481_v44  ;;  %v4984_v13 = vmul.f32 -1.442695, %v7020_v48 }
 0x4d2   : > { %v5858_v61 = vpop.eup %5857  ;;  %v2310_v35 = vadd.f32 1.0, %v5856_v22 }
 0x4d3   : > { %v2486_v1 = vsel %vm2485_vm1, %v5854_v55, %v2482_v7  ;;  %v2494_v62 = vmul.f32 %v5858_v61, %v7007_v47  ;;  %5859 = vpow2.f32 %v4984_v13  ;;  %v5439_v55 = vld [vmem:[#allocation9 + $0x198] sm:$0xff]  ;;  %vm2499_vm5 = vweird.f32 %v5858_v61 }
 0x4d4   : > { %v2491_v6 = vsel %vm2488_vm2, %v2490_v24, %v2486_v1  ;;  %5861 = vrcp.f32 %v2310_v35  ;;  %3090 = vmatpush.bf16.msrb.mxu1 %v5439_v55  ;;  %vm2500_vm4 = vmor %vm2498_vm3, %vm2499_vm5  ;;  %v2519_v7 = vand.u32 2147483648, %v2310_v35  ;;  %v2517_v24 = vand.u32 2147483647, %v2310_v35 }
 0x4d5   : > { %v2564_v27 = vmul.f32 %v2491_v6, %v6981_v0  ;;  %v2495_v50 = vsub.f32 1.0, %v2494_v62  ;;  %v5438_v0 = vld [vmem:[#allocation9 + $0x190] sm:$0xff]  ;;  %v2505_v1 = vor.u32 1.1754944e-38, %v2504_v51  ;;  %vm2513_vm8 = vweird.f32 %v2310_v35 }
 0x4d6   : > { %v2246_v20 = vpop.f32.mrf.mxu3  ;;  %vm2518_vm10 = vcmp.eq.f32.partialorder %v2517_v24, 8.507059e+37 }
 0x4d7   : > { %v2496_v57 = vmul.f32 %v5858_v61, %v2495_v50  ;;  %v7027_v52 = vadd.f32 %v6893_v33, %v2246_v20  ;;  %v2590_v56 = vpack.c.bf16 %v2564_v27, %v2563_v14  ;;  %v2502_v33 = vand.u32 2147483647, %v7007_v47 }
 0x4d8   : > { %3091 = vmatpush.bf16.msrb.mxu1 %v5438_v0  ;;  %v2520_v50 = vor.u32 1.1754944e-38, %v2519_v7 }
 0x4d9   : > { %v5860_v2 = vpop.eup %5859  ;;  %v4985_v32 = vmul.f32 -1.442695, %v7027_v52  ;;  %2676 = vmatmul.bf16.gmra.mxu0 %v2590_v56  ;;  %v2497_v44 = vadd.f32 %v5858_v61, %v2496_v57  ;;  %vm2503_vm7 = vcmp.eq.f32.partialorder %v2502_v33, 8.507059e+37 }
 0x4da   : > { %v5862_v63 = vpop.eup %5861  ;;  %v2311_v46 = vadd.f32 1.0, %v5860_v2 }
 0x4db   : > { %v2509_v43 = vmul.f32 %v5862_v63, %v2310_v35  ;;  %5863 = vpow2.f32 %v4985_v32  ;;  %v2501_v13 = vsel %vm2500_vm4, %v5858_v61, %v2497_v44  ;;  %vm2514_vm6 = vweird.f32 %v5862_v63 }
 0x4dc   : > { %5865 = vrcp.f32 %v2311_v46  ;;  %v2506_v27 = vsel %vm2503_vm7, %v2505_v1, %v2501_v13  ;;  %vm2515_vm9 = vmor %vm2513_vm8, %vm2514_vm6  ;;  %v2534_v0 = vand.u32 2147483648, %v2311_v46  ;;  %vm2528_vm12 = vweird.f32 %v2311_v46 }
 0x4dd   : > { %v2510_v22 = vsub.f32 1.0, %v2509_v43  ;;  %v2565_v61 = vmul.f32 %v2506_v27, %v6997_v30  ;;  %v2532_v51 = vand.u32 2147483647, %v2311_v46 }
 0x4de   : > { %v2535_v13 = vor.u32 1.1754944e-38, %v2534_v0 }
 0x4df   : > { %v2511_v42 = vmul.f32 %v5862_v63, %v2510_v22  ;;  %vm2533_vm15 = vcmp.eq.f32.partialorder %v2532_v51, 8.507059e+37 }
 0x4e1   : > { %v5864_v62 = vpop.eup %5863  ;;  %v2512_v6 = vadd.f32 %v5862_v63, %v2511_v42 }
 0x4e2   : > { %v5866_v14 = vpop.eup %5865  ;;  %v2312_v3 = vadd.f32 1.0, %v5864_v62 }
 0x4e3   : > { %v2516_v20 = vsel %vm2515_vm9, %v5862_v63, %v2512_v6  ;;  %v2524_v47 = vmul.f32 %v5866_v14, %v2311_v46  ;;  %vm2529_vm11 = vweird.f32 %v5866_v14 }
 0x4e4   : > { %v2521_v57 = vsel %vm2518_vm10, %v2520_v50, %v2516_v20  ;;  %5867 = vrcp.f32 %v2312_v3  ;;  %vm2530_vm13 = vmor %vm2528_vm12, %vm2529_vm11  ;;  %v2549_v33 = vand.u32 2147483648, %v2312_v3  ;;  %v2547_v30 = vand.u32 2147483647, %v2312_v3  ;;  %v5437_v50 = vld [vmem:[#allocation9 + $0x188] sm:$0xff] }
 0x4e5   : > { %v2566_v56 = vmul.f32 %v2521_v57, %v7004_v45  ;;  %v2525_v55 = vsub.f32 1.0, %v2524_v47  ;;  %vm2543_vm0 = vweird.f32 %v2312_v3  ;;  %3092 = vmatpush.bf16.msrb.mxu1 %v5437_v50  ;;  %v5436_v57 = vld [vmem:[#allocation9 + $0x180] sm:$0xff] }
 0x4e6   : > { %v2550_v24 = vor.u32 1.1754944e-38, %v2549_v33  ;;  %vm2548_vm2 = vcmp.eq.f32.partialorder %v2547_v30, 8.507059e+37 }
 0x4e7   : > { %v2526_v2 = vmul.f32 %v5866_v14, %v2525_v55  ;;  %v2591_v32 = vpack.c.bf16 %v2566_v56, %v2565_v61 }
 0x4e9   : > { %2681 = vmatmul.bf16.gmra.mxu0 %v2591_v32  ;;  %v2527_v35 = vadd.f32 %v5866_v14, %v2526_v2  ;;  %3093 = vmatpush.bf16.msrb.mxu1 %v5436_v57 }
 0x4ea   : > { %v5868_v44 = vpop.eup %5867 }
 0x4eb   : > { %v2539_v43 = vmul.f32 %v5868_v44, %v2312_v3  ;;  %v2531_v22 = vsel %vm2530_vm13, %v5866_v14, %v2527_v35  ;;  %vm2544_vm14 = vweird.f32 %v5868_v44  ;;  %v7040_v14 = vld [vmem:[%s7445_s8 + $0x4] ss:$0 sm:$0xff] }
 0x4ec   : > { %v2536_v42 = vsel %vm2533_vm15, %v2535_v13, %v2531_v22  ;;  %vm2545_vm1 = vmor %vm2543_vm0, %vm2544_vm14 }
 0x4ed   : > { %v2540_v63 = vsub.f32 1.0, %v2539_v43  ;;  %v2567_v6 = vmul.f32 %v2536_v42, %v7020_v48 }
 0x4ef   : > { %v2541_v7 = vmul.f32 %v5868_v44, %v2540_v63 }
 0x4f1   : > { %v2542_v45 = vadd.f32 %v5868_v44, %v2541_v7 }
 0x4f3   : > { %v2546_v1 = vsel %vm2545_vm1, %v5868_v44, %v2542_v45 }
 0x4f4   : > { %v2551_v62 = vsel %vm2548_vm2, %v2550_v24, %v2546_v1 }
 0x4f5   : > { %v2568_v46 = vmul.f32 %v2551_v62, %v7027_v52 }
 0x4f7   : > { %v2592_v27 = vpack.c.bf16 %v2568_v46, %v2567_v6 }
 0x4f9   : > { %2686 = vmatmul.bf16.gmra.mxu0 %v2592_v27 }
 0x506   : > { %v2652_v20 = vpop.f32.mrf.mxu0 }
 0x507   : > { %v2653_v3 = vadd.f32 %v7040_v14, %v2652_v20 }
 0x509   : > { %v5018_v47 = vmul.f32 -1.442695, %v2653_v3 }
 0x50b   : > { %5869 = vpow2.f32 %v5018_v47 }
 0x50e   : > { %v2654_v61 = vpop.f32.mrf.mxu0 }
 0x50f   : > { %v2655_v48 = vadd.f32 %v7040_v14, %v2654_v61 }
 0x511   : > { %v5870_v52 = vpop.eup %5869  ;;  %v5019_v56 = vmul.f32 -1.442695, %v2655_v48 }
 0x512   : > { %v2740_v55 = vadd.f32 1.0, %v5870_v52 }
 0x513   : > { %5871 = vpow2.f32 %v5019_v56 }
 0x514   : > { %5873 = vrcp.f32 %v2740_v55  ;;  %v2767_v62 = vand.u32 2147483648, %v2740_v55  ;;  %vm2761_vm3 = vweird.f32 %v2740_v55  ;;  %v2765_v46 = vand.u32 2147483647, %v2740_v55 }
 0x516   : > { %v2657_v2 = vpop.f32.mrf.mxu0  ;;  %v2768_v48 = vor.u32 1.1754944e-38, %v2767_v62  ;;  %vm2766_vm7 = vcmp.eq.f32.partialorder %v2765_v46, 8.507059e+37 }
 0x517   : > { %v2658_v32 = vadd.f32 %v7040_v14, %v2657_v2 }
 0x519   : > { %v5872_v44 = vpop.eup %5871  ;;  %v5020_v35 = vmul.f32 -1.442695, %v2658_v32 }
 0x51a   : > { %v5874_v43 = vpop.eup %5873  ;;  %v2741_v0 = vadd.f32 1.0, %v5872_v44 }
 0x51b   : > { %v2757_v51 = vmul.f32 %v5874_v43, %v2740_v55  ;;  %5875 = vpow2.f32 %v5020_v35  ;;  %vm2762_vm5 = vweird.f32 %v5874_v43 }
 0x51c   : > { %5877 = vrcp.f32 %v2741_v0  ;;  %vm7049_vm4 = vmor %vm2761_vm3, %vm2762_vm5  ;;  %v2780_v20 = vand.u32 2147483647, %v2741_v0  ;;  %v2782_v3 = vand.u32 2147483648, %v2741_v0  ;;  %vm2776_vm8 = vweird.f32 %v2741_v0 }
 0x51d   : > { %v2758_v63 = vsub.f32 1.0, %v2757_v51 }
 0x51e   : > { %v2659_v33 = vpop.f32.mrf.mxu0  ;;  %v2783_v35 = vor.u32 1.1754944e-38, %v2782_v3  ;;  %vm2781_vm10 = vcmp.eq.f32.partialorder %v2780_v20, 8.507059e+37 }
 0x51f   : > { %v2660_v22 = vadd.f32 %v7040_v14, %v2659_v33  ;;  %v2759_v7 = vmul.f32 %v5874_v43, %v2758_v63 }
 0x521   : > { %v5876_v30 = vpop.eup %5875  ;;  %v5021_v13 = vmul.f32 -1.442695, %v2660_v22  ;;  %v2760_v1 = vadd.f32 %v5874_v43, %v2759_v7 }
 0x522   : > { %v5878_v45 = vpop.eup %5877  ;;  %v7046_v42 = vadd.f32 1.0, %v5876_v30 }
 0x523   : > { %v2772_v24 = vmul.f32 %v5878_v45, %v2741_v0  ;;  %5879 = vpow2.f32 %v5021_v13  ;;  %v2764_v57 = vsel %vm7049_vm4, %v5874_v43, %v2760_v1  ;;  %vm2777_vm6 = vweird.f32 %v5878_v45 }
 0x524   : > { %5881 = vrcp.f32 %v7046_v42  ;;  %v2769_v44 = vsel %vm2766_vm7, %v2768_v48, %v2764_v57  ;;  %vm2778_vm9 = vmor %vm2776_vm8, %vm2777_vm6  ;;  %vm2791_vm12 = vweird.f32 %v7046_v42 }
 0x525   : > { %v2773_v6 = vsub.f32 1.0, %v2772_v24  ;;  %v2996_v33 = vmul.f32 %v2769_v44, %v6716_v16 }
 0x526   : > { %v2662_v27 = vpop.f32.mrf.mxu0 }
 0x527   : > { %v2663_v47 = vadd.f32 %v7040_v14, %v2662_v27  ;;  %v2774_v61 = vmul.f32 %v5878_v45, %v2773_v6  ;;  %v2795_v27 = vand.u32 2147483647, %v7046_v42 }
 0x529   : > { %v5880_v52 = vpop.eup %5879  ;;  %v5022_v56 = vmul.f32 -1.442695, %v2663_v47  ;;  %v2775_v2 = vadd.f32 %v5878_v45, %v2774_v61  ;;  %vm2796_vm15 = vcmp.eq.f32.partialorder %v2795_v27, 8.507059e+37 }
 0x52a   : > { %v5882_v55 = vpop.eup %5881  ;;  %v2743_v32 = vadd.f32 1.0, %v5880_v52 }
 0x52b   : > { %5883 = vpow2.f32 %v5022_v56  ;;  %v2779_v51 = vsel %vm2778_vm9, %v5878_v45, %v2775_v2  ;;  %v2787_v63 = vmul.f32 %v5882_v55, %v7046_v42  ;;  %vm2792_vm11 = vweird.f32 %v5882_v55 }
 0x52c   : > { %5885 = vrcp.f32 %v2743_v32  ;;  %v2784_v43 = vsel %vm2781_vm10, %v2783_v35, %v2779_v51  ;;  %vm7069_vm13 = vmor %vm2791_vm12, %vm2792_vm11  ;;  %v2812_v3 = vand.u32 2147483648, %v2743_v32  ;;  %v2810_v48 = vand.u32 2147483647, %v2743_v32 }
 0x52d   : > { %v2997_v22 = vmul.f32 %v2784_v43, %v6718_v38  ;;  %v2788_v7 = vsub.f32 1.0, %v2787_v63  ;;  %v2797_v38 = vand.u32 2147483648, %v7046_v42  ;;  %vm2806_vm0 = vweird.f32 %v2743_v32 }
 0x52e   : > { %v2664_v30 = vpop.f32.mrf.mxu0  ;;  %v2813_v43 = vor.u32 1.1754944e-38, %v2812_v3  ;;  %vm2811_vm2 = vcmp.eq.f32.partialorder %v2810_v48, 8.507059e+37 }
 0x52f   : > { %v2665_v0 = vadd.f32 %v7040_v14, %v2664_v30  ;;  %v7060_v13 = vpack.c.bf16 %v2997_v22, %v2996_v33  ;;  %v2789_v24 = vmul.f32 %v5882_v55, %v2788_v7  ;;  %v2798_v56 = vor.u32 1.1754944e-38, %v2797_v38 }
 0x531   : > { %v5884_v1 = vpop.eup %5883  ;;  %v5023_v62 = vmul.f32 -1.442695, %v2665_v0  ;;  %3094 = vmatmul.bf16.vlgmr.msrb.gmra.mxu1 %v7060_v13  ;;  %v2790_v46 = vadd.f32 %v5882_v55, %v2789_v24 }
 0x532   : > { %v5886_v45 = vpop.eup %5885  ;;  %v7063_v6 = vadd.f32 1.0, %v5884_v1 }
 0x533   : > { %5887 = vpow2.f32 %v5023_v62  ;;  %v2802_v16 = vmul.f32 %v5886_v45, %v2743_v32  ;;  %v2794_v57 = vsel %vm7069_vm13, %v5882_v55, %v2790_v46  ;;  %vm2807_vm14 = vweird.f32 %v5886_v45 }
 0x534   : > { %5889 = vrcp.f32 %v7063_v6  ;;  %v2799_v63 = vsel %vm2796_vm15, %v2798_v56, %v2794_v57  ;;  %vm2808_vm1 = vmor %vm2806_vm0, %vm2807_vm14  ;;  %vm2821_vm3 = vweird.f32 %v7063_v6 }
 0x535   : > { %v2803_v50 = vsub.f32 1.0, %v2802_v16  ;;  %v2998_v7 = vmul.f32 %v2799_v63, %v6744_v39  ;;  %v2827_v39 = vand.u32 2147483648, %v7063_v6 }
 0x536   : > { %v2667_v47 = vpop.f32.mrf.mxu0 }
 0x537   : > { %v2804_v61 = vmul.f32 %v5886_v45, %v2803_v50  ;;  %v2668_v52 = vadd.f32 %v7040_v14, %v2667_v47  ;;  %v2828_v56 = vor.u32 1.1754944e-38, %v2827_v39 }
 0x539   : > { %v5888_v2 = vpop.eup %5887  ;;  %v2805_v44 = vadd.f32 %v5886_v45, %v2804_v61  ;;  %v5024_v51 = vmul.f32 -1.442695, %v2668_v52 }
 0x53a   : > { %v5890_v42 = vpop.eup %5889  ;;  %v2745_v35 = vadd.f32 1.0, %v5888_v2 }
 0x53b   : > { %v2809_v33 = vsel %vm2808_vm1, %v5886_v45, %v2805_v44  ;;  %v2817_v55 = vmul.f32 %v5890_v42, %v7063_v6  ;;  %vm2822_vm5 = vweird.f32 %v5890_v42 }
 0x53c   : > { %5891 = vrcp.f32 %v2745_v35  ;;  %v2814_v22 = vsel %vm2811_vm2, %v2813_v43, %v2809_v33  ;;  %vm2823_vm4 = vmor %vm2821_vm3, %vm2822_vm5  ;;  %v2842_v3 = vand.u32 2147483648, %v2745_v35  ;;  %v2840_v48 = vand.u32 2147483647, %v2745_v35 }
 0x53d   : > { %5893 = vpow2.f32 %v5024_v51  ;;  %v2999_v30 = vmul.f32 %v2814_v22, %v6747_v58  ;;  %v2818_v0 = vsub.f32 1.0, %v2817_v55  ;;  %v2825_v58 = vand.u32 2147483647, %v7063_v6 }
 0x53e   : > { %v2669_v24 = vpop.f32.mrf.mxu0  ;;  %vm2836_vm8 = vweird.f32 %v2745_v35  ;;  %v2843_v6 = vor.u32 1.1754944e-38, %v2842_v3  ;;  %vm2841_vm10 = vcmp.eq.f32.partialorder %v2840_v48, 8.507059e+37 }
 0x53f   : > { %v7079_v32 = vpack.c.bf16 %v2999_v30, %v2998_v7  ;;  %v2819_v1 = vmul.f32 %v5890_v42, %v2818_v0  ;;  %v2670_v62 = vadd.f32 %v7040_v14, %v2669_v24  ;;  %vm2826_vm7 = vcmp.eq.f32.partialorder %v2825_v58, 8.507059e+37  ;;  %v5451_v0 = vld [vmem:[#allocation9 + $0x1f8] sm:$0xff] }
 0x540   : > { %3529 = vmatpush.bf16.msrb.mxu2 %v5451_v0 }
 0x541   : > { %3099 = vmatmul.bf16.gmra.mxu1 %v7079_v32  ;;  %v5025_v46 = vmul.f32 -1.442695, %v2670_v62  ;;  %v2820_v38 = vadd.f32 %v5890_v42, %v2819_v1 }
 0x542   : > { %v5892_v45 = vpop.eup %5891 }
 0x543   : > { %v5894_v16 = vpop.eup %5893  ;;  %v2832_v27 = vmul.f32 %v5892_v45, %v2745_v35  ;;  %5895 = vpow2.f32 %v5025_v46  ;;  %v2824_v57 = vsel %vm2823_vm4, %v5890_v42, %v2820_v38  ;;  %vm2837_vm6 = vweird.f32 %v5892_v45 }
 0x544   : > { %v7083_v50 = vadd.f32 1.0, %v5894_v16  ;;  %v2829_v63 = vsel %vm2826_vm7, %v2828_v56, %v2824_v57  ;;  %vm2838_vm9 = vmor %vm2836_vm8, %vm2837_vm6 }
 0x545   : > { %v2833_v20 = vsub.f32 1.0, %v2832_v27  ;;  %v3000_v22 = vmul.f32 %v2829_v63, %v6773_v60 }
 0x546   : > { %5897 = vrcp.f32 %v7083_v50  ;;  %v2672_v47 = vpop.f32.mrf.mxu0  ;;  %v2857_v39 = vand.u32 2147483648, %v7083_v50  ;;  %vm2851_vm12 = vweird.f32 %v7083_v50  ;;  %v2855_v58 = vand.u32 2147483647, %v7083_v50 }
 0x547   : > { %v2834_v61 = vmul.f32 %v5892_v45, %v2833_v20  ;;  %v2673_v52 = vadd.f32 %v7040_v14, %v2672_v47 }
 0x548   : > { %vm2856_vm15 = vcmp.eq.f32.partialorder %v2855_v58, 8.507059e+37 }
 0x549   : > { %v2835_v2 = vadd.f32 %v5892_v45, %v2834_v61  ;;  %v5896_v44 = vpop.eup %5895  ;;  %v5026_v51 = vmul.f32 -1.442695, %v2673_v52 }
 0x54a   : > { %v2747_v43 = vadd.f32 1.0, %v5896_v44 }
 0x54b   : > { %v2839_v33 = vsel %vm2838_vm9, %v5892_v45, %v2835_v2  ;;  %5899 = vpow2.f32 %v5026_v51  ;;  %v2858_v2 = vor.u32 1.1754944e-38, %v2857_v39 }
 0x54c   : > { %v5898_v55 = vpop.eup %5897  ;;  %v2844_v42 = vsel %vm2841_vm10, %v2843_v6, %v2839_v33  ;;  %5901 = vrcp.f32 %v2747_v43  ;;  %v2870_v57 = vand.u32 2147483647, %v2747_v43  ;;  %v2872_v61 = vand.u32 2147483648, %v2747_v43 }
 0x54d   : > { %v3001_v7 = vmul.f32 %v2844_v42, %v6776_v8  ;;  %v2847_v30 = vmul.f32 %v5898_v55, %v7083_v50  ;;  %vm2852_vm11 = vweird.f32 %v5898_v55  ;;  %vm2866_vm0 = vweird.f32 %v2747_v43 }
 0x54e   : > { %v2674_v35 = vpop.f32.mrf.mxu0  ;;  %vm7103_vm13 = vmor %vm2851_vm12, %vm2852_vm11  ;;  %v2873_v42 = vor.u32 1.1754944e-38, %v2872_v61  ;;  %vm2871_vm2 = vcmp.eq.f32.partialorder %v2870_v57, 8.507059e+37 }
 0x54f   : > { %v7093_v24 = vpack.c.bf16 %v3001_v7, %v3000_v22  ;;  %v2848_v1 = vsub.f32 1.0, %v2847_v30  ;;  %v2675_v62 = vadd.f32 %v7040_v14, %v2674_v35 }
 0x551   : > { %3104 = vmatmul.bf16.gmra.mxu1 %v7093_v24  ;;  %v2849_v45 = vmul.f32 %v5898_v55, %v2848_v1  ;;  %v5900_v46 = vpop.eup %5899  ;;  %v5027_v16 = vmul.f32 -1.442695, %v2675_v62  ;;  %v5450_v1 = vld [vmem:[#allocation9 + $0x1f0] sm:$0xff] }
 0x552   : > { %v5902_v38 = vpop.eup %5901  ;;  %v7097_v27 = vadd.f32 1.0, %v5900_v46  ;;  %3530 = vmatpush.bf16.msrb.mxu2 %v5450_v1  ;;  %v5449_v1 = vld [vmem:[#allocation9 + $0x1e8] sm:$0xff] }
 0x553   : > { %5903 = vpow2.f32 %v5027_v16  ;;  %v2850_v60 = vadd.f32 %v5898_v55, %v2849_v45  ;;  %v2862_v8 = vmul.f32 %v5902_v38, %v2747_v43  ;;  %vm2867_vm14 = vweird.f32 %v5902_v38 }
 0x554   : > { %5905 = vrcp.f32 %v7097_v27  ;;  %vm2868_vm1 = vmor %vm2866_vm0, %vm2867_vm14  ;;  %vm2881_vm3 = vweird.f32 %v7097_v27 }
 0x555   : > { %v2863_v20 = vsub.f32 1.0, %v2862_v8  ;;  %v2854_v52 = vsel %vm7103_vm13, %v5898_v55, %v2850_v60 }
 0x556   : > { %v2677_v3 = vpop.f32.mrf.mxu0  ;;  %v2859_v33 = vsel %vm2856_vm15, %v2858_v2, %v2854_v52  ;;  %3531 = vmatpush.bf16.msrb.mxu2 %v5449_v1 }
 0x557   : > { %v2678_v48 = vadd.f32 %v7040_v14, %v2677_v3  ;;  %v2864_v56 = vmul.f32 %v5902_v38, %v2863_v20  ;;  %v3002_v0 = vmul.f32 %v2859_v33, %v6802_v37  ;;  %v2885_v20 = vand.u32 2147483647, %v7097_v27 }
 0x559   : > { %v5904_v44 = vpop.eup %5903  ;;  %v5028_v51 = vmul.f32 -1.442695, %v2678_v48  ;;  %v2865_v50 = vadd.f32 %v5902_v38, %v2864_v56  ;;  %vm2886_vm7 = vcmp.eq.f32.partialorder %v2885_v20, 8.507059e+37  ;;  %v5448_v20 = vld [vmem:[#allocation9 + $0x1e0] sm:$0xff] }
 0x55a   : > { %v5906_v63 = vpop.eup %5905  ;;  %v2749_v6 = vadd.f32 1.0, %v5904_v44  ;;  %3532 = vmatpush.bf16.msrb.mxu2 %v5448_v20 }
 0x55b   : > { %v2877_v22 = vmul.f32 %v5906_v63, %v7097_v27  ;;  %5907 = vpow2.f32 %v5028_v51  ;;  %v2869_v7 = vsel %vm2868_vm1, %v5902_v38, %v2865_v50  ;;  %vm2882_vm5 = vweird.f32 %v5906_v63 }
 0x55c   : > { %5909 = vrcp.f32 %v2749_v6  ;;  %v2874_v55 = vsel %vm2871_vm2, %v2873_v42, %v2869_v7  ;;  %vm7123_vm4 = vmor %vm2881_vm3, %vm2882_vm5  ;;  %v2900_v57 = vand.u32 2147483647, %v2749_v6  ;;  %v2902_v61 = vand.u32 2147483648, %v2749_v6 }
 0x55d   : > { %v2878_v30 = vsub.f32 1.0, %v2877_v22  ;;  %v3003_v35 = vmul.f32 %v2874_v55, %v6805_v59  ;;  %v2887_v59 = vand.u32 2147483648, %v7097_v27  ;;  %vm2896_vm8 = vweird.f32 %v2749_v6 }
 0x55e   : > { %v2679_v62 = vpop.f32.mrf.mxu0  ;;  %v2903_v22 = vor.u32 1.1754944e-38, %v2902_v61  ;;  %vm2901_vm10 = vcmp.eq.f32.partialorder %v2900_v57, 8.507059e+37 }
 0x55f   : > { %v2680_v43 = vadd.f32 %v7040_v14, %v2679_v62  ;;  %v7114_v45 = vpack.c.bf16 %v3003_v35, %v3002_v0  ;;  %v2879_v46 = vmul.f32 %v5906_v63, %v2878_v30  ;;  %v2888_v2 = vor.u32 1.1754944e-38, %v2887_v59 }
 0x561   : > { %v5908_v16 = vpop.eup %5907  ;;  %v5029_v60 = vmul.f32 -1.442695, %v2680_v43  ;;  %3109 = vmatmul.bf16.gmra.mxu1 %v7114_v45  ;;  %v2880_v37 = vadd.f32 %v5906_v63, %v2879_v46 }
 0x562   : > { %v5910_v38 = vpop.eup %5909  ;;  %v7117_v8 = vadd.f32 1.0, %v5908_v16 }
 0x563   : > { %v2892_v39 = vmul.f32 %v5910_v38, %v2749_v6  ;;  %5911 = vpow2.f32 %v5029_v60  ;;  %v2884_v52 = vsel %vm7123_vm4, %v5906_v63, %v2880_v37  ;;  %vm2897_vm6 = vweird.f32 %v5910_v38 }
 0x564   : > { %5913 = vrcp.f32 %v7117_v8  ;;  %v2889_v42 = vsel %vm2886_vm7, %v2888_v2, %v2884_v52  ;;  %vm2898_vm9 = vmor %vm2896_vm8, %vm2897_vm6  ;;  %vm2911_vm12 = vweird.f32 %v7117_v8  ;;  %v5447_v2 = vld [vmem:[#allocation9 + $0x1d8] sm:$0xff] }
 0x565   : > { %v2893_v58 = vsub.f32 1.0, %v2892_v39  ;;  %v3004_v0 = vmul.f32 %v2889_v42, %v6831_v54  ;;  %3533 = vmatpush.bf16.msrb.mxu2 %v5447_v2 }
 0x566   : > { %v2682_v3 = vpop.f32.mrf.mxu0 }
 0x567   : > { %v2683_v48 = vadd.f32 %v7040_v14, %v2682_v3  ;;  %v2894_v56 = vmul.f32 %v5910_v38, %v2893_v58  ;;  %v2915_v58 = vand.u32 2147483647, %v7117_v8 }
 0x569   : > { %v5912_v44 = vpop.eup %5911  ;;  %v5030_v51 = vmul.f32 -1.442695, %v2683_v48  ;;  %v2895_v50 = vadd.f32 %v5910_v38, %v2894_v56  ;;  %vm2916_vm15 = vcmp.eq.f32.partialorder %v2915_v58, 8.507059e+37 }
 0x56a   : > { %v5914_v27 = vpop.eup %5913  ;;  %v2751_v33 = vadd.f32 1.0, %v5912_v44 }
 0x56b   : > { %v2907_v7 = vmul.f32 %v5914_v27, %v7117_v8  ;;  %5915 = vpow2.f32 %v5030_v51  ;;  %v2899_v55 = vsel %vm2898_vm9, %v5910_v38, %v2895_v50  ;;  %vm2912_vm11 = vweird.f32 %v5914_v27 }
 0x56c   : > { %5917 = vrcp.f32 %v2751_v33  ;;  %v2904_v63 = vsel %vm2901_vm10, %v2903_v22, %v2899_v55  ;;  %vm7143_vm13 = vmor %vm2911_vm12, %vm2912_vm11  ;;  %v2930_v57 = vand.u32 2147483647, %v2751_v33  ;;  %v2932_v61 = vand.u32 2147483648, %v2751_v33 }
 0x56d   : > { %v2908_v30 = vsub.f32 1.0, %v2907_v7  ;;  %v3005_v35 = vmul.f32 %v2904_v63, %v6834_v18  ;;  %v2917_v18 = vand.u32 2147483648, %v7117_v8  ;;  %vm2926_vm0 = vweird.f32 %v2751_v33 }
 0x56e   : > { %v2684_v62 = vpop.f32.mrf.mxu0  ;;  %v2933_v55 = vor.u32 1.1754944e-38, %v2932_v61  ;;  %vm2931_vm2 = vcmp.eq.f32.partialorder %v2930_v57, 8.507059e+37 }
 0x56f   : > { %v2685_v6 = vadd.f32 %v7040_v14, %v2684_v62  ;;  %v7134_v43 = vpack.c.bf16 %v3005_v35, %v3004_v0  ;;  %v2909_v46 = vmul.f32 %v5914_v27, %v2908_v30  ;;  %v2918_v44 = vor.u32 1.1754944e-38, %v2917_v18 }
 0x571   : > { %v5916_v16 = vpop.eup %5915  ;;  %v5031_v60 = vmul.f32 -1.442695, %v2685_v6  ;;  %3114 = vmatmul.bf16.gmra.mxu1 %v7134_v43  ;;  %v2910_v54 = vadd.f32 %v5914_v27, %v2909_v46 }
 0x572   : > { %v5918_v38 = vpop.eup %5917  ;;  %v7137_v39 = vadd.f32 1.0, %v5916_v16 }
 0x573   : > { %v2922_v37 = vmul.f32 %v5918_v38, %v2751_v33  ;;  %5919 = vpow2.f32 %v5031_v60  ;;  %v2914_v52 = vsel %vm7143_vm13, %v5914_v27, %v2910_v54  ;;  %vm2927_vm14 = vweird.f32 %v5918_v38 }
 0x574   : > { %5921 = vrcp.f32 %v7137_v39  ;;  %v2919_v7 = vsel %vm2916_vm15, %v2918_v44, %v2914_v52  ;;  %vm2928_vm1 = vmor %vm2926_vm0, %vm2927_vm14  ;;  %vm2941_vm3 = vweird.f32 %v7137_v39 }
 0x575   : > { %v2923_v59 = vsub.f32 1.0, %v2922_v37  ;;  %v3006_v35 = vmul.f32 %v2919_v7, %v6860_v4  ;;  %v2947_v4 = vand.u32 2147483648, %v7137_v39 }
 0x576   : > { %v2687_v3 = vpop.f32.mrf.mxu0 }
 0x577   : > { %v2688_v48 = vadd.f32 %v7040_v14, %v2687_v3  ;;  %v2924_v56 = vmul.f32 %v5918_v38, %v2923_v59  ;;  %v2948_v47 = vor.u32 1.1754944e-38, %v2947_v4 }
 0x579   : > { %v5920_v51 = vpop.eup %5919  ;;  %v5032_v8 = vmul.f32 -1.442695, %v2688_v48  ;;  %v2925_v50 = vadd.f32 %v5918_v38, %v2924_v56  ;;  %v5446_v48 = vld [vmem:[#allocation9 + $0x1d0] sm:$0xff] }
 0x57a   : > { %v5922_v42 = vpop.eup %5921  ;;  %v2753_v22 = vadd.f32 1.0, %v5920_v51  ;;  %3534 = vmatpush.bf16.msrb.mxu2 %v5446_v48 }
 0x57b   : > { %v2937_v63 = vmul.f32 %v5922_v42, %v7137_v39  ;;  %5923 = vpow2.f32 %v5032_v8  ;;  %v2929_v30 = vsel %vm2928_vm1, %v5918_v38, %v2925_v50  ;;  %vm2942_vm5 = vweird.f32 %v5922_v42 }
 0x57c   : > { %5925 = vrcp.f32 %v2753_v22  ;;  %v2934_v27 = vsel %vm2931_vm2, %v2933_v55, %v2929_v30  ;;  %vm2943_vm4 = vmor %vm2941_vm3, %vm2942_vm5  ;;  %v2962_v59 = vand.u32 2147483648, %v2753_v22  ;;  %v2960_v3 = vand.u32 2147483647, %v2753_v22 }
 0x57d   : > { %v2938_v0 = vsub.f32 1.0, %v2937_v63  ;;  %v3007_v1 = vmul.f32 %v2934_v27, %v6863_v26  ;;  %vm2956_vm8 = vweird.f32 %v2753_v22 }
 0x57e   : > { %v2689_v62 = vpop.f32.mrf.mxu0  ;;  %v2963_v44 = vor.u32 1.1754944e-38, %v2962_v59  ;;  %vm2961_vm10 = vcmp.eq.f32.partialorder %v2960_v3, 8.507059e+37 }
 0x57f   : > { %v2690_v33 = vadd.f32 %v7040_v14, %v2689_v62  ;;  %v7154_v6 = vpack.c.bf16 %v3007_v1, %v3006_v35  ;;  %v2939_v46 = vmul.f32 %v5922_v42, %v2938_v0  ;;  %v2945_v14 = vand.u32 2147483647, %v7137_v39 }
 0x581   : > { %v5924_v16 = vpop.eup %5923  ;;  %v5033_v60 = vmul.f32 -1.442695, %v2690_v33  ;;  %3119 = vmatmul.bf16.gmra.mxu1 %v7154_v6  ;;  %v2940_v18 = vadd.f32 %v5922_v42, %v2939_v46  ;;  %vm2946_vm7 = vcmp.eq.f32.partialorder %v2945_v14, 8.507059e+37  ;;  %v7168_v14 = vld [vmem:[%s7445_s8 + $0x5] ss:$0 sm:$0xff] }
 0x582   : > { %v5926_v38 = vpop.eup %5925  ;;  %v2754_v37 = vadd.f32 1.0, %v5924_v16 }
 0x583   : > { %v2952_v54 = vmul.f32 %v5926_v38, %v2753_v22  ;;  %5927 = vpow2.f32 %v5033_v60  ;;  %v2944_v58 = vsel %vm2943_vm4, %v5922_v42, %v2940_v18  ;;  %vm2957_vm6 = vweird.f32 %v5926_v38 }
 0x584   : > { %5929 = vrcp.f32 %v2754_v37  ;;  %v2949_v2 = vsel %vm2946_vm7, %v2948_v47, %v2944_v58  ;;  %vm2958_vm9 = vmor %vm2956_vm8, %vm2957_vm6  ;;  %v2977_v0 = vand.u32 2147483648, %v2754_v37  ;;  %vm2971_vm12 = vweird.f32 %v2754_v37 }
 0x585   : > { %v2953_v26 = vsub.f32 1.0, %v2952_v54  ;;  %v3008_v42 = vmul.f32 %v2949_v2, %v6875_v28  ;;  %v2975_v1 = vand.u32 2147483647, %v2754_v37 }
 0x586   : > { %v2978_v28 = vor.u32 1.1754944e-38, %v2977_v0 }
 0x587   : > { %v2954_v20 = vmul.f32 %v5926_v38, %v2953_v26  ;;  %vm2976_vm15 = vcmp.eq.f32.partialorder %v2975_v1, 8.507059e+37 }
 0x589   : > { %v5928_v57 = vpop.eup %5927  ;;  %v2955_v61 = vadd.f32 %v5926_v38, %v2954_v20  ;;  %v5444_v20 = vld [vmem:[#allocation9 + $0x1c0] sm:$0xff] }
 0x58a   : > { %v5930_v52 = vpop.eup %5929  ;;  %v2755_v56 = vadd.f32 1.0, %v5928_v57 }
 0x58b   : > { %v2967_v51 = vmul.f32 %v5930_v52, %v2754_v37  ;;  %v2959_v8 = vsel %vm2958_vm9, %v5926_v38, %v2955_v61  ;;  %vm2972_vm11 = vweird.f32 %v5930_v52 }
 0x58c   : > { %5931 = vrcp.f32 %v2755_v56  ;;  %v2964_v39 = vsel %vm2961_vm10, %v2963_v44, %v2959_v8  ;;  %vm2973_vm13 = vmor %vm2971_vm12, %vm2972_vm11  ;;  %v2992_v62 = vand.u32 2147483648, %v2755_v56  ;;  %v2990_v16 = vand.u32 2147483647, %v2755_v56 }
 0x58d   : > { %v2968_v50 = vsub.f32 1.0, %v2967_v51  ;;  %v3009_v7 = vmul.f32 %v2964_v39, %v6878_v15  ;;  %vm2986_vm0 = vweird.f32 %v2755_v56 }
 0x58e   : > { %v2993_v38 = vor.u32 1.1754944e-38, %v2992_v62  ;;  %vm2991_vm2 = vcmp.eq.f32.partialorder %v2990_v16, 8.507059e+37 }
 0x58f   : > { %v3034_v55 = vpack.c.bf16 %v3009_v7, %v3008_v42  ;;  %v2969_v63 = vmul.f32 %v5930_v52, %v2968_v50 }
 0x591   : > { %3124 = vmatmul.bf16.gmra.mxu1 %v3034_v55  ;;  %v2970_v27 = vadd.f32 %v5930_v52, %v2969_v63 }
 0x592   : > { %v5932_v22 = vpop.eup %5931 }
 0x593   : > { %v2982_v30 = vmul.f32 %v5932_v22, %v2755_v56  ;;  %v2974_v33 = vsel %vm2973_vm13, %v5930_v52, %v2970_v27  ;;  %vm2987_vm14 = vweird.f32 %v5932_v22 }
 0x594   : > { %v2979_v60 = vsel %vm2976_vm15, %v2978_v28, %v2974_v33  ;;  %vm2988_vm1 = vmor %vm2986_vm0, %vm2987_vm14 }
 0x595   : > { %v2983_v35 = vsub.f32 1.0, %v2982_v30  ;;  %v3010_v4 = vmul.f32 %v2979_v60, %v6883_v36 }
 0x597   : > { %v2984_v46 = vmul.f32 %v5932_v22, %v2983_v35 }
 0x599   : > { %v2985_v15 = vadd.f32 %v5932_v22, %v2984_v46 }
 0x59b   : > { %v2989_v54 = vsel %vm2988_vm1, %v5932_v22, %v2985_v15 }
 0x59c   : > { %v2994_v18 = vsel %vm2991_vm2, %v2993_v38, %v2989_v54 }
 0x59d   : > { %v3011_v37 = vmul.f32 %v2994_v18, %v6886_v10  ;;  %v5445_v10 = vld [vmem:[#allocation9 + $0x1c8] sm:$0xff] }
 0x59e   : > { %3535 = vmatpush.bf16.msrb.mxu2 %v5445_v10 }
 0x59f   : > { %v3035_v26 = vpack.c.bf16 %v3011_v37, %v3010_v4 }
 0x5a1   : > { %3129 = vmatmul.bf16.gmra.mxu1 %v3035_v26  ;;  %3622 = vmatpush.bf16.msra.mxu3 %v3035_v26 }
 0x5a2   : > { %3536 = vmatpush.bf16.msrb.mxu2 %v5444_v20 }
 0x5a5   : > { %3623 = vmatpush.bf16.msra.mxu3 %v3034_v55 }
 0x5a9   : > { %3624 = vmatpush.bf16.msra.mxu3 %v7154_v6 }
 0x5ad   : > { %3625 = vmatpush.bf16.msra.mxu3 %v7134_v43 }
 0x5ae   : > { %v3095_v59 = vpop.f32.mrf.mxu1 }
 0x5af   : > { %v7172_v58 = vadd.f32 %v7168_v14, %v3095_v59 }
 0x5b1   : > { %v5066_v36 = vmul.f32 -1.442695, %v7172_v58  ;;  %3626 = vmatpush.bf16.msra.mxu3 %v7114_v45 }
 0x5b3   : > { %5933 = vpow2.f32 %v5066_v36 }
 0x5b5   : > { %3627 = vmatpush.bf16.msra.mxu3 %v7093_v24 }
 0x5b6   : > { %v3097_v6 = vpop.f32.mrf.mxu1 }
 0x5b7   : > { %v7178_v3 = vadd.f32 %v7168_v14, %v3097_v6 }
 0x5b9   : > { %v5934_v43 = vpop.eup %5933  ;;  %v5067_v47 = vmul.f32 -1.442695, %v7178_v3  ;;  %3628 = vmatpush.bf16.msra.mxu3 %v7079_v32 }
 0x5ba   : > { %v3183_v57 = vadd.f32 1.0, %v5934_v43 }
 0x5bb   : > { %5935 = vpow2.f32 %v5067_v47 }
 0x5bc   : > { %5937 = vrcp.f32 %v3183_v57  ;;  %v3210_v63 = vand.u32 2147483648, %v3183_v57  ;;  %vm3204_vm3 = vweird.f32 %v3183_v57  ;;  %v3208_v22 = vand.u32 2147483647, %v3183_v57 }
 0x5bd   : > { %3629 = vmatpush.bf16.msra.mxu3 %v7060_v13 }
 0x5be   : > { %v3100_v45 = vpop.f32.mrf.mxu1  ;;  %v3211_v16 = vor.u32 1.1754944e-38, %v3210_v63  ;;  %vm3209_vm7 = vcmp.eq.f32.partialorder %v3208_v22, 8.507059e+37 }
 0x5bf   : > { %v7184_v61 = vadd.f32 %v7168_v14, %v3100_v45 }
 0x5c0   : > { %5601 = vmatmul.lmr.bf16.vlgmr.msra.gmra.4.mxu3 }
 0x5c1   : > { %v5936_v24 = vpop.eup %5935  ;;  %v5068_v48 = vmul.f32 -1.442695, %v7184_v61 }
 0x5c2   : > { %v5938_v52 = vpop.eup %5937  ;;  %v3184_v56 = vadd.f32 1.0, %v5936_v24 }
 0x5c3   : > { %v3200_v2 = vmul.f32 %v5938_v52, %v3183_v57  ;;  %5939 = vpow2.f32 %v5068_v48  ;;  %vm3205_vm5 = vweird.f32 %v5938_v52 }
 0x5c4   : > { %5941 = vrcp.f32 %v3184_v56  ;;  %vm7194_vm4 = vmor %vm3204_vm3, %vm3205_vm5  ;;  %v3223_v0 = vand.u32 2147483647, %v3184_v56  ;;  %v3225_v35 = vand.u32 2147483648, %v3184_v56  ;;  %vm3219_vm8 = vweird.f32 %v3184_v56 }
 0x5c5   : > { %v3201_v44 = vsub.f32 1.0, %v3200_v2 }
 0x5c6   : > { %v3102_v51 = vpop.f32.mrf.mxu1  ;;  %v3226_v18 = vor.u32 1.1754944e-38, %v3225_v35  ;;  %vm3224_vm10 = vcmp.eq.f32.partialorder %v3223_v0, 8.507059e+37 }
 0x5c7   : > { %v3202_v32 = vmul.f32 %v5938_v52, %v3201_v44  ;;  %v7188_v8 = vadd.f32 %v7168_v14, %v3102_v51 }
 0x5c8   : > { %5602 = vmatmul.lmr.bf16.gmra.4.mxu3 }
 0x5c9   : > { %v5940_v13 = vpop.eup %5939  ;;  %v5069_v39 = vmul.f32 -1.442695, %v7188_v8  ;;  %v3203_v7 = vadd.f32 %v5938_v52, %v3202_v32 }
 0x5ca   : > { %v5942_v50 = vpop.eup %5941  ;;  %v7191_v42 = vadd.f32 1.0, %v5940_v13 }
 0x5cb   : > { %v3215_v55 = vmul.f32 %v5942_v50, %v3184_v56  ;;  %5943 = vpow2.f32 %v5069_v39  ;;  %v3207_v62 = vsel %vm7194_vm4, %v5938_v52, %v3203_v7  ;;  %vm3220_vm6 = vweird.f32 %v5942_v50 }
 0x5cc   : > { %5945 = vrcp.f32 %v7191_v42  ;;  %v3212_v54 = vsel %vm3209_vm7, %v3211_v16, %v3207_v62  ;;  %vm3221_vm9 = vmor %vm3219_vm8, %vm3220_vm6  ;;  %vm3234_vm12 = vweird.f32 %v7191_v42  ;;  %v3238_v2 = vand.u32 2147483647, %v7191_v42 }
 0x5cd   : > { %v3216_v30 = vsub.f32 1.0, %v3215_v55  ;;  %v3439_v36 = vmul.f32 %v3212_v54, %v7172_v58 }
 0x5ce   : > { %v3105_v1 = vpop.f32.mrf.mxu1  ;;  %vm3239_vm15 = vcmp.eq.f32.partialorder %v3238_v2, 8.507059e+37 }
 0x5cf   : > { %v3217_v33 = vmul.f32 %v5942_v50, %v3216_v30  ;;  %v7201_v46 = vadd.f32 %v7168_v14, %v3105_v1 }
 0x5d0   : > { %5603 = vmatmul.lmr.bf16.gmra.4.mxu3 }
 0x5d1   : > { %v5944_v28 = vpop.eup %5943  ;;  %v3218_v15 = vadd.f32 %v5942_v50, %v3217_v33  ;;  %v5070_v60 = vmul.f32 -1.442695, %v7201_v46 }
 0x5d2   : > { %v5946_v38 = vpop.eup %5945  ;;  %v3186_v4 = vadd.f32 1.0, %v5944_v28 }
 0x5d3   : > { %v3222_v37 = vsel %vm3221_vm9, %v5942_v50, %v3218_v15  ;;  %v3230_v26 = vmul.f32 %v5946_v38, %v7191_v42  ;;  %5947 = vpow2.f32 %v5070_v60  ;;  %vm3235_vm11 = vweird.f32 %v5946_v38 }
 0x5d4   : > { %v3227_v59 = vsel %vm3224_vm10, %v3226_v18, %v3222_v37  ;;  %5949 = vrcp.f32 %v3186_v4  ;;  %vm3236_vm13 = vmor %vm3234_vm12, %vm3235_vm11  ;;  %v3255_v51 = vand.u32 2147483648, %v3186_v4  ;;  %v3253_v39 = vand.u32 2147483647, %v3186_v4 }
 0x5d5   : > { %v3440_v10 = vmul.f32 %v3227_v59, %v7178_v3  ;;  %v3231_v6 = vsub.f32 1.0, %v3230_v26  ;;  %v3240_v3 = vand.u32 2147483648, %v7191_v42  ;;  %vm3249_vm0 = vweird.f32 %v3186_v4 }
 0x5d6   : > { %v3107_v20 = vpop.f32.mrf.mxu1  ;;  %v3256_v42 = vor.u32 1.1754944e-38, %v3255_v51  ;;  %vm3254_vm2 = vcmp.eq.f32.partialorder %v3253_v39, 8.507059e+37 }
 0x5d7   : > { %v3232_v43 = vmul.f32 %v5946_v38, %v3231_v6  ;;  %v7208_v47 = vadd.f32 %v7168_v14, %v3107_v20  ;;  %v3471_v57 = vpack.c.bf16 %v3440_v10, %v3439_v36  ;;  %v3241_v7 = vor.u32 1.1754944e-38, %v3240_v3 }
 0x5d8   : > { %5604 = vmatmul.lmr.bf16.gmra.4.mxu3 }
 0x5d9   : > { %v5948_v45 = vpop.eup %5947  ;;  %v5071_v24 = vmul.f32 -1.442695, %v7208_v47  ;;  %3537 = vmatmul.bf16.vlgmr.msrb.gmra.mxu2 %v3471_v57  ;;  %v3233_v56 = vadd.f32 %v5946_v38, %v3232_v43 }
 0x5da   : > { %v5950_v48 = vpop.eup %5949  ;;  %v7211_v52 = vadd.f32 1.0, %v5948_v45 }
 0x5db   : > { %v3245_v58 = vmul.f32 %v5950_v48, %v3186_v4  ;;  %5951 = vpow2.f32 %v5071_v24  ;;  %v3237_v32 = vsel %vm3236_vm13, %v5946_v38, %v3233_v56  ;;  %vm3250_vm14 = vweird.f32 %v5950_v48 }
 0x5dc   : > { %5953 = vrcp.f32 %v7211_v52  ;;  %v3242_v27 = vsel %vm3239_vm15, %v3241_v7, %v3237_v32  ;;  %vm3251_vm1 = vmor %vm3249_vm0, %vm3250_vm14  ;;  %vm3264_vm3 = vweird.f32 %v7211_v52 }
 0x5dd   : > { %v3246_v44 = vsub.f32 1.0, %v3245_v58  ;;  %v3441_v16 = vmul.f32 %v3242_v27, %v7184_v61  ;;  %v3270_v61 = vand.u32 2147483648, %v7211_v52 }
 0x5de   : > { %v3110_v50 = vpop.f32.mrf.mxu1 }
 0x5df   : > { %v3247_v13 = vmul.f32 %v5950_v48, %v3246_v44  ;;  %v7218_v55 = vadd.f32 %v7168_v14, %v3110_v50 }
 0x5e1   : > { %v5952_v63 = vpop.eup %5951  ;;  %v3248_v22 = vadd.f32 %v5950_v48, %v3247_v13  ;;  %v5072_v35 = vmul.f32 -1.442695, %v7218_v55 }
 0x5e2   : > { %v5954_v30 = vpop.eup %5953  ;;  %v3188_v0 = vadd.f32 1.0, %v5952_v63 }
 0x5e3   : > { %v3252_v1 = vsel %vm3251_vm1, %v5950_v48, %v3248_v22  ;;  %v3260_v62 = vmul.f32 %v5954_v30, %v7211_v52  ;;  %vm3265_vm5 = vweird.f32 %v5954_v30  ;;  %v3271_v48 = vor.u32 1.1754944e-38, %v3270_v61 }
 0x5e4   : > { %v3257_v33 = vsel %vm3254_vm2, %v3256_v42, %v3252_v1  ;;  %5955 = vrcp.f32 %v3188_v0  ;;  %vm3266_vm4 = vmor %vm3264_vm3, %vm3265_vm5  ;;  %v3285_v20 = vand.u32 2147483648, %v3188_v0  ;;  %v3283_v45 = vand.u32 2147483647, %v3188_v0 }
 0x5e5   : > { %v3442_v28 = vmul.f32 %v3257_v33, %v7188_v8  ;;  %v3261_v15 = vsub.f32 1.0, %v3260_v62  ;;  %5957 = vpow2.f32 %v5072_v35  ;;  %v3268_v8 = vand.u32 2147483647, %v7211_v52 }
 0x5e6   : > { %v3112_v38 = vpop.f32.mrf.mxu1  ;;  %vm3279_vm8 = vweird.f32 %v3188_v0  ;;  %v3286_v52 = vor.u32 1.1754944e-38, %v3285_v20  ;;  %vm3284_vm10 = vcmp.eq.f32.partialorder %v3283_v45, 8.507059e+37 }
 0x5e7   : > { %v3262_v60 = vmul.f32 %v5954_v30, %v3261_v15  ;;  %v3472_v54 = vpack.c.bf16 %v3442_v28, %v3441_v16  ;;  %v7225_v18 = vadd.f32 %v7168_v14, %v3112_v38  ;;  %vm3269_vm7 = vcmp.eq.f32.partialorder %v3268_v8, 8.507059e+37 }
 0x5e9   : > { %3542 = vmatmul.bf16.gmra.mxu2 %v3472_v54  ;;  %v5073_v37 = vmul.f32 -1.442695, %v7225_v18  ;;  %v3263_v59 = vadd.f32 %v5954_v30, %v3262_v60 }
 0x5ea   : > { %v5956_v4 = vpop.eup %5955 }
 0x5eb   : > { %v5958_v26 = vpop.eup %5957  ;;  %v3275_v36 = vmul.f32 %v5956_v4, %v3188_v0  ;;  %5959 = vpow2.f32 %v5073_v37  ;;  %v3267_v43 = vsel %vm3266_vm4, %v5954_v30, %v3263_v59  ;;  %vm3280_vm6 = vweird.f32 %v5956_v4 }
 0x5ec   : > { %v3189_v10 = vadd.f32 1.0, %v5958_v26  ;;  %v3272_v2 = vsel %vm3269_vm7, %v3271_v48, %v3267_v43  ;;  %vm3281_vm9 = vmor %vm3279_vm8, %vm3280_vm6 }
 0x5ed   : > { %v3276_v6 = vsub.f32 1.0, %v3275_v36  ;;  %v3443_v50 = vmul.f32 %v3272_v2, %v7201_v46 }
 0x5ee   : > { %5961 = vrcp.f32 %v3189_v10  ;;  %v3115_v24 = vpop.f32.mrf.mxu1  ;;  %vm3294_vm12 = vweird.f32 %v3189_v10  ;;  %v3298_v28 = vand.u32 2147483647, %v3189_v10 }
 0x5ef   : > { %v3277_v57 = vmul.f32 %v5956_v4, %v3276_v6  ;;  %v7232_v56 = vadd.f32 %v7168_v14, %v3115_v24 }
 0x5f0   : > { %vm3299_vm15 = vcmp.eq.f32.partialorder %v3298_v28, 8.507059e+37 }
 0x5f1   : > { %v3278_v58 = vadd.f32 %v5956_v4, %v3277_v57  ;;  %v5960_v3 = vpop.eup %5959  ;;  %v5074_v44 = vmul.f32 -1.442695, %v7232_v56 }
 0x5f2   : > { %v3190_v32 = vadd.f32 1.0, %v5960_v3 }
 0x5f3   : > { %v3282_v51 = vsel %vm3281_vm9, %v5956_v4, %v3278_v58  ;;  %5963 = vpow2.f32 %v5074_v44 }
 0x5f4   : > { %v5962_v13 = vpop.eup %5961  ;;  %v3287_v39 = vsel %vm3284_vm10, %v3286_v52, %v3282_v51  ;;  %5965 = vrcp.f32 %v3190_v32  ;;  %v3313_v38 = vand.u32 2147483647, %v3190_v32  ;;  %v3315_v54 = vand.u32 2147483648, %v3190_v32 }
 0x5f5   : > { %v3444_v7 = vmul.f32 %v3287_v39, %v7208_v47  ;;  %v3290_v63 = vmul.f32 %v5962_v13, %v3189_v10  ;;  %vm3295_vm11 = vweird.f32 %v5962_v13  ;;  %v3300_v47 = vand.u32 2147483648, %v3189_v10 }
 0x5f6   : > { %v3117_v30 = vpop.f32.mrf.mxu1  ;;  %vm7244_vm13 = vmor %vm3294_vm12, %vm3295_vm11  ;;  %vm3309_vm0 = vweird.f32 %v3190_v32  ;;  %v3316_v43 = vor.u32 1.1754944e-38, %v3315_v54  ;;  %vm3314_vm2 = vcmp.eq.f32.partialorder %v3313_v38, 8.507059e+37 }
 0x5f7   : > { %v3291_v22 = vsub.f32 1.0, %v3290_v63  ;;  %v3473_v27 = vpack.c.bf16 %v3444_v7, %v3443_v50  ;;  %v7238_v42 = vadd.f32 %v7168_v14, %v3117_v30  ;;  %v3301_v36 = vor.u32 1.1754944e-38, %v3300_v47 }
 0x5f9   : > { %v3292_v0 = vmul.f32 %v5962_v13, %v3291_v22  ;;  %3547 = vmatmul.bf16.gmra.mxu2 %v3473_v27  ;;  %v5964_v35 = vpop.eup %5963  ;;  %v5075_v1 = vmul.f32 -1.442695, %v7238_v42 }
 0x5fa   : > { %v5966_v62 = vpop.eup %5965  ;;  %v7241_v33 = vadd.f32 1.0, %v5964_v35 }
 0x5fb   : > { %v3293_v16 = vadd.f32 %v5962_v13, %v3292_v0  ;;  %v3305_v46 = vmul.f32 %v5966_v62, %v3190_v32  ;;  %5967 = vpow2.f32 %v5075_v1  ;;  %vm3310_vm14 = vweird.f32 %v5966_v62 }
 0x5fc   : > { %5969 = vrcp.f32 %v7241_v33  ;;  %vm3311_vm1 = vmor %vm3309_vm0, %vm3310_vm14  ;;  %vm3324_vm3 = vweird.f32 %v7241_v33 }
 0x5fd   : > { %v3306_v15 = vsub.f32 1.0, %v3305_v46  ;;  %v3297_v37 = vsel %vm7244_vm13, %v5962_v13, %v3293_v16 }
 0x5fe   : > { %v3120_v4 = vpop.f32.mrf.mxu1  ;;  %v3302_v20 = vsel %vm3299_vm15, %v3301_v36, %v3297_v37 }
 0x5ff   : > { %v3307_v26 = vmul.f32 %v5966_v62, %v3306_v15  ;;  %v7251_v59 = vadd.f32 %v7168_v14, %v3120_v4  ;;  %v3445_v58 = vmul.f32 %v3302_v20, %v7218_v55  ;;  %v3330_v55 = vand.u32 2147483648, %v7241_v33 }
 0x601   : > { %v5968_v61 = vpop.eup %5967  ;;  %v3308_v10 = vadd.f32 %v5966_v62, %v3307_v26  ;;  %v5076_v8 = vmul.f32 -1.442695, %v7251_v59  ;;  %v3331_v47 = vor.u32 1.1754944e-38, %v3330_v55 }
 0x602   : > { %v5970_v6 = vpop.eup %5969  ;;  %v3192_v57 = vadd.f32 1.0, %v5968_v61 }
 0x603   : > { %v3312_v45 = vsel %vm3311_vm1, %v5966_v62, %v3308_v10  ;;  %v3320_v24 = vmul.f32 %v5970_v6, %v7241_v33  ;;  %5971 = vpow2.f32 %v5076_v8  ;;  %vm3325_vm5 = vweird.f32 %v5970_v6 }
 0x604   : > { %v3317_v48 = vsel %vm3314_vm2, %v3316_v43, %v3312_v45  ;;  %5973 = vrcp.f32 %v3192_v57  ;;  %vm7267_vm4 = vmor %vm3324_vm3, %vm3325_vm5  ;;  %v3343_v0 = vand.u32 2147483647, %v3192_v57  ;;  %v3345_v35 = vand.u32 2147483648, %v3192_v57 }
 0x605   : > { %v3446_v3 = vmul.f32 %v3317_v48, %v7225_v18  ;;  %v3321_v2 = vsub.f32 1.0, %v3320_v24  ;;  %v3328_v18 = vand.u32 2147483647, %v7241_v33  ;;  %vm3339_vm8 = vweird.f32 %v3192_v57 }
 0x606   : > { %v3122_v52 = vpop.f32.mrf.mxu1  ;;  %v3346_v54 = vor.u32 1.1754944e-38, %v3345_v35  ;;  %vm3344_vm10 = vcmp.eq.f32.partialorder %v3343_v0, 8.507059e+37 }
 0x607   : > { %v3322_v44 = vmul.f32 %v5970_v6, %v3321_v2  ;;  %v7258_v51 = vadd.f32 %v7168_v14, %v3122_v52  ;;  %v3474_v32 = vpack.c.bf16 %v3446_v3, %v3445_v58  ;;  %vm3329_vm7 = vcmp.eq.f32.partialorder %v3328_v18, 8.507059e+37 }
 0x609   : > { %v5972_v13 = vpop.eup %5971  ;;  %v5077_v39 = vmul.f32 -1.442695, %v7258_v51  ;;  %3552 = vmatmul.bf16.gmra.mxu2 %v3474_v32  ;;  %v3323_v63 = vadd.f32 %v5970_v6, %v3322_v44 }
 0x60a   : > { %v5974_v50 = vpop.eup %5973  ;;  %v7261_v7 = vadd.f32 1.0, %v5972_v13 }
 0x60b   : > { %v3335_v22 = vmul.f32 %v5974_v50, %v3192_v57  ;;  %5975 = vpow2.f32 %v5077_v39  ;;  %v3327_v62 = vsel %vm7267_vm4, %v5970_v6, %v3323_v63  ;;  %vm3340_vm6 = vweird.f32 %v5974_v50 }
 0x60c   : > { %5977 = vrcp.f32 %v7261_v7  ;;  %v3332_v38 = vsel %vm3329_vm7, %v3331_v47, %v3327_v62  ;;  %vm3341_vm9 = vmor %vm3339_vm8, %vm3340_vm6  ;;  %vm3354_vm12 = vweird.f32 %v7261_v7 }
 0x60d   : > { %v3336_v30 = vsub.f32 1.0, %v3335_v22  ;;  %v3447_v61 = vmul.f32 %v3332_v38, %v7232_v56  ;;  %v3360_v56 = vand.u32 2147483648, %v7261_v7 }
 0x60e   : > { %v3125_v1 = vpop.f32.mrf.mxu1 }
 0x60f   : > { %v3337_v16 = vmul.f32 %v5974_v50, %v3336_v30  ;;  %v7274_v46 = vadd.f32 %v7168_v14, %v3125_v1  ;;  %v3361_v55 = vor.u32 1.1754944e-38, %v3360_v56 }
 0x611   : > { %v5976_v28 = vpop.eup %5975  ;;  %v3338_v33 = vadd.f32 %v5974_v50, %v3337_v16  ;;  %v5078_v15 = vmul.f32 -1.442695, %v7274_v46 }
 0x612   : > { %v5978_v60 = vpop.eup %5977  ;;  %v3194_v4 = vadd.f32 1.0, %v5976_v28 }
 0x613   : > { %v3342_v37 = vsel %vm3341_vm9, %v5974_v50, %v3338_v33  ;;  %v3350_v26 = vmul.f32 %v5978_v60, %v7261_v7  ;;  %5979 = vpow2.f32 %v5078_v15  ;;  %vm3355_vm11 = vweird.f32 %v5978_v60 }
 0x614   : > { %v3347_v36 = vsel %vm3344_vm10, %v3346_v54, %v3342_v37  ;;  %5981 = vrcp.f32 %v3194_v4  ;;  %vm7290_vm13 = vmor %vm3354_vm12, %vm3355_vm11  ;;  %v3373_v32 = vand.u32 2147483647, %v3194_v4  ;;  %v3375_v13 = vand.u32 2147483648, %v3194_v4 }
 0x615   : > { %v3448_v10 = vmul.f32 %v3347_v36, %v7238_v42  ;;  %v3351_v8 = vsub.f32 1.0, %v3350_v26  ;;  %v3358_v42 = vand.u32 2147483647, %v7261_v7  ;;  %vm3369_vm0 = vweird.f32 %v3194_v4 }
 0x616   : > { %v3127_v6 = vpop.f32.mrf.mxu1  ;;  %v3376_v35 = vor.u32 1.1754944e-38, %v3375_v13  ;;  %vm3374_vm2 = vcmp.eq.f32.partialorder %v3373_v32, 8.507059e+37 }
 0x617   : > { %v3352_v20 = vmul.f32 %v5978_v60, %v3351_v8  ;;  %v7281_v43 = vadd.f32 %v7168_v14, %v3127_v6  ;;  %v3475_v57 = vpack.c.bf16 %v3448_v10, %v3447_v61  ;;  %vm3359_vm15 = vcmp.eq.f32.partialorder %v3358_v42, 8.507059e+37 }
 0x619   : > { %v5980_v45 = vpop.eup %5979  ;;  %v5079_v24 = vmul.f32 -1.442695, %v7281_v43  ;;  %3557 = vmatmul.bf16.gmra.mxu2 %v3475_v57  ;;  %v3353_v3 = vadd.f32 %v5978_v60, %v3352_v20 }
 0x61a   : > { %v5982_v48 = vpop.eup %5981  ;;  %v7284_v58 = vadd.f32 1.0, %v5980_v45 }
 0x61b   : > { %v3365_v2 = vmul.f32 %v5982_v48, %v3194_v4  ;;  %5983 = vpow2.f32 %v5079_v24  ;;  %v3357_v50 = vsel %vm7290_vm13, %v5978_v60, %v3353_v3  ;;  %vm3370_vm14 = vweird.f32 %v5982_v48 }
 0x61c   : > { %5985 = vrcp.f32 %v7284_v58  ;;  %v3362_v0 = vsel %vm3359_vm15, %v3361_v55, %v3357_v50  ;;  %vm3371_vm1 = vmor %vm3369_vm0, %vm3370_vm14  ;;  %vm3384_vm3 = vweird.f32 %v7284_v58 }
 0x61d   : > { %v3366_v52 = vsub.f32 1.0, %v3365_v2  ;;  %v3449_v28 = vmul.f32 %v3362_v0, %v7251_v59  ;;  %v3390_v59 = vand.u32 2147483648, %v7284_v58 }
 0x61e   : > { %v3130_v39 = vpop.f32.mrf.mxu1 }
 0x61f   : > { %v3367_v63 = vmul.f32 %v5982_v48, %v3366_v52  ;;  %v7297_v22 = vadd.f32 %v7168_v14, %v3130_v39  ;;  %v3391_v24 = vor.u32 1.1754944e-38, %v3390_v59 }
 0x621   : > { %v5984_v18 = vpop.eup %5983  ;;  %v3368_v7 = vadd.f32 %v5982_v48, %v3367_v63  ;;  %v5080_v30 = vmul.f32 -1.442695, %v7297_v22 }
 0x622   : > { %v5986_v27 = vpop.eup %5985  ;;  %v3196_v1 = vadd.f32 1.0, %v5984_v18 }
 0x623   : > { %v3372_v62 = vsel %vm3371_vm1, %v5982_v48, %v3368_v7  ;;  %v3380_v16 = vmul.f32 %v5986_v27, %v7284_v58  ;;  %5987 = vpow2.f32 %v5080_v30  ;;  %vm3385_vm5 = vweird.f32 %v5986_v27 }
 0x624   : > { %v3377_v47 = vsel %vm3374_vm2, %v3376_v35, %v3372_v62  ;;  %5989 = vrcp.f32 %v3196_v1  ;;  %vm3386_vm4 = vmor %vm3384_vm3, %vm3385_vm5  ;;  %v3405_v6 = vand.u32 2147483648, %v3196_v1  ;;  %v3403_v45 = vand.u32 2147483647, %v3196_v1 }
 0x625   : > { %v3450_v33 = vmul.f32 %v3377_v47, %v7258_v51  ;;  %v3381_v15 = vsub.f32 1.0, %v3380_v16  ;;  %v3388_v51 = vand.u32 2147483647, %v7284_v58  ;;  %vm3399_vm8 = vweird.f32 %v3196_v1 }
 0x626   : > { %v3132_v60 = vpop.f32.mrf.mxu1  ;;  %v3406_v42 = vor.u32 1.1754944e-38, %v3405_v6  ;;  %vm3404_vm10 = vcmp.eq.f32.partialorder %v3403_v45, 8.507059e+37 }
 0x627   : > { %v3382_v38 = vmul.f32 %v5986_v27, %v3381_v15  ;;  %v7304_v54 = vadd.f32 %v7168_v14, %v3132_v60  ;;  %v3476_v4 = vpack.c.bf16 %v3450_v33, %v3449_v28  ;;  %vm3389_vm7 = vcmp.eq.f32.partialorder %v3388_v51, 8.507059e+37 }
 0x629   : > { %v5988_v37 = vpop.eup %5987  ;;  %v5081_v26 = vmul.f32 -1.442695, %v7304_v54  ;;  %3562 = vmatmul.bf16.gmra.mxu2 %v3476_v4  ;;  %v3383_v10 = vadd.f32 %v5986_v27, %v3382_v38 }
 0x62a   : > { %v5990_v36 = vpop.eup %5989  ;;  %v3197_v61 = vadd.f32 1.0, %v5988_v37 }
 0x62b   : > { %v3395_v8 = vmul.f32 %v5990_v36, %v3196_v1  ;;  %5991 = vpow2.f32 %v5081_v26  ;;  %v3387_v20 = vsel %vm3386_vm4, %v5986_v27, %v3383_v10  ;;  %vm3400_vm6 = vweird.f32 %v5990_v36 }
 0x62c   : > { %5993 = vrcp.f32 %v3197_v61  ;;  %v3392_v56 = vsel %vm3389_vm7, %v3391_v24, %v3387_v20  ;;  %vm3401_vm9 = vmor %vm3399_vm8, %vm3400_vm6  ;;  %v3420_v27 = vand.u32 2147483648, %v3197_v61  ;;  %vm3414_vm12 = vweird.f32 %v3197_v61 }
 0x62d   : > { %v3396_v14 = vsub.f32 1.0, %v3395_v8  ;;  %v3451_v13 = vmul.f32 %v3392_v56, %v7274_v46  ;;  %v3418_v0 = vand.u32 2147483647, %v3197_v61 }
 0x62e   : > { %v3421_v47 = vor.u32 1.1754944e-38, %v3420_v27 }
 0x62f   : > { %v3397_v57 = vmul.f32 %v5990_v36, %v3396_v14  ;;  %vm3419_vm15 = vcmp.eq.f32.partialorder %v3418_v0, 8.507059e+37 }
 0x631   : > { %v5992_v48 = vpop.eup %5991  ;;  %v3398_v3 = vadd.f32 %v5990_v36, %v3397_v57 }
 0x632   : > { %v5994_v2 = vpop.eup %5993  ;;  %v3198_v52 = vadd.f32 1.0, %v5992_v48 }
 0x633   : > { %v3402_v44 = vsel %vm3401_vm9, %v5990_v36, %v3398_v3  ;;  %v3410_v58 = vmul.f32 %v5994_v2, %v3197_v61  ;;  %vm3415_vm11 = vweird.f32 %v5994_v2 }
 0x634   : > { %v3407_v32 = vsel %vm3404_vm10, %v3406_v42, %v3402_v44  ;;  %5995 = vrcp.f32 %v3198_v52  ;;  %vm3416_vm13 = vmor %vm3414_vm12, %vm3415_vm11  ;;  %v3435_v1 = vand.u32 2147483648, %v3198_v52  ;;  %v3433_v46 = vand.u32 2147483647, %v3198_v52 }
 0x635   : > { %v3452_v39 = vmul.f32 %v3407_v32, %v7281_v43  ;;  %v3411_v50 = vsub.f32 1.0, %v3410_v58  ;;  %vm3429_vm0 = vweird.f32 %v3198_v52 }
 0x636   : > { %v3436_v33 = vor.u32 1.1754944e-38, %v3435_v1  ;;  %vm3434_vm2 = vcmp.eq.f32.partialorder %v3433_v46, 8.507059e+37  ;;  %v3594_v46 = vld [vmem:[#allocation5] sm:$0xff] }
 0x637   : > { %v3412_v63 = vmul.f32 %v5994_v2, %v3411_v50  ;;  %v3477_v55 = vpack.c.bf16 %v3452_v39, %v3451_v13 }
 0x639   : > { %3567 = vmatmul.bf16.gmra.mxu2 %v3477_v55  ;;  %v3413_v7 = vadd.f32 %v5994_v2, %v3412_v63 }
 0x63a   : > { %v5996_v18 = vpop.eup %5995 }
 0x63b   : > { %v3425_v30 = vmul.f32 %v5996_v18, %v3198_v52  ;;  %v3417_v62 = vsel %vm3416_vm13, %v5994_v2, %v3413_v7  ;;  %vm3430_vm14 = vweird.f32 %v5996_v18 }
 0x63c   : > { %v3422_v28 = vsel %vm3419_vm15, %v3421_v47, %v3417_v62  ;;  %vm3431_vm1 = vmor %vm3429_vm0, %vm3430_vm14 }
 0x63d   : > { %v3426_v35 = vsub.f32 1.0, %v3425_v30  ;;  %v3453_v38 = vmul.f32 %v3422_v28, %v7297_v22  ;;  %v5676_v22 = vld [vmem:[%s7445_s8 + $0x6] ss:$0 sm:$0xff] }
 0x63f   : > { %v3427_v16 = vmul.f32 %v5996_v18, %v3426_v35 }
 0x641   : > { %v3428_v43 = vadd.f32 %v5996_v18, %v3427_v16  ;;  %v3669_v16 = vpop.trf.xlu2 }
 0x643   : > { %v3432_v15 = vsel %vm3431_vm1, %v5996_v18, %v3428_v43 }
 0x644   : > { %v3437_v60 = vsel %vm3434_vm2, %v3436_v33, %v3432_v15 }
 0x645   : > { %v3454_v4 = vmul.f32 %v3437_v60, %v7304_v54  ;;  %v3596_v60 = vld [vmem:[#allocation5 + $0x18] sm:$0xff] }
 0x647   : > { %v3478_v37 = vpack.c.bf16 %v3454_v4, %v3453_v38 }
 0x649   : > { %3572 = vmatmul.bf16.gmra.mxu2 %v3478_v37  ;;  %v3670_v33 = vpop.trf.xlu2  ;;  %v3597_v37 = vld [vmem:[#allocation5 + $0x8] sm:$0xff] }
 0x651   : > { %v3671_v4 = vpop.trf.xlu2 }
 0x65c   : > { %v3538_v26 = vpop.f32.mrf.mxu2 }
 0x65d   : > { %v3539_v47 = vadd.f32 %v5676_v22, %v3538_v26 }
 0x664   : > { %v3540_v36 = vpop.f32.mrf.mxu2 }
 0x665   : > { %v3541_v62 = vadd.f32 %v5676_v22, %v3540_v36  ;;  %v3649_v36 = vld [vmem:[#allocation6 + $0x8] sm:$0xff] }
 0x667   : > { %v3579_v28 = vmul.f32 %v3541_v62, %v6430_v9 }
 0x66c   : > { %v3543_v61 = vpop.f32.mrf.mxu2 }
 0x66d   : > { %v3544_v1 = vadd.f32 %v5676_v22, %v3543_v61 }
 0x66f   : > { %v3580_v43 = vmul.f32 %v3544_v1, %v6434_v11 }
 0x674   : > { %v3545_v10 = vpop.f32.mrf.mxu2 }
 0x675   : > { %v3546_v35 = vadd.f32 %v5676_v22, %v3545_v10 }
 0x67c   : > { %v3548_v8 = vpop.f32.mrf.mxu2 }
 0x67d   : > { %v3549_v0 = vadd.f32 %v5676_v22, %v3548_v8  ;;  %v3650_v8 = vld [vmem:[#allocation6] sm:$0xff] }
 0x684   : > { %v3550_v59 = vpop.f32.mrf.mxu2 }
 0x685   : > { %v3551_v27 = vadd.f32 %v5676_v22, %v3550_v59 }
 0x68c   : > { %v3553_v51 = vpop.f32.mrf.mxu2 }
 0x68d   : > { %v3554_v30 = vadd.f32 %v5676_v22, %v3553_v51 }
 0x694   : > { %v3555_v14 = vpop.f32.mrf.mxu2 }
 0x69c   : > { %v3558_v6 = vpop.f32.mrf.mxu2 }
 0x69d   : > { %v3559_v18 = vadd.f32 %v5676_v22, %v3558_v6 }
 0x6a4   : > { %v3560_v20 = vpop.f32.mrf.mxu2 }
 0x6a5   : > { %v3561_v63 = vadd.f32 %v5676_v22, %v3560_v20 }
 0x6ac   : > { %v3563_v57 = vpop.f32.mrf.mxu2 }
 0x6ad   : > { %v3564_v39 = vadd.f32 %v5676_v22, %v3563_v57  ;;  %v3652_v57 = vld [vmem:[#allocation6 + $0x18] sm:$0xff] }
 0x6af   : > { %v3588_v7 = vmul.f32 %v3564_v39, %v6466_v29  ;;  %v3583_v29 = vmul.f32 %v3551_v27, %v6446_v17  ;;  %v3578_v17 = vmul.f32 %v3539_v47, %v6425_v41  ;;  %v3672_v41 = vpop.trf.xlu2 }
 0x6b4   : > { %v3565_v45 = vpop.f32.mrf.mxu2 }
 0x6b5   : > { %v3566_v32 = vadd.f32 %v5676_v22, %v3565_v45 }
 0x6b7   : > { %v3589_v55 = vmul.f32 %v3566_v32, %v6470_v31  ;;  %v3584_v31 = vmul.f32 %v3554_v30, %v6450_v19 }
 0x6bc   : > { %v3568_v24 = vpop.f32.mrf.mxu2 }
 0x6bd   : > { %v3569_v44 = vadd.f32 %v5676_v22, %v3568_v24 }
 0x6bf   : > { %v3590_v50 = vmul.f32 %v3569_v44, %v6474_v34 }
 0x6c4   : > { %v3570_v48 = vpop.f32.mrf.mxu2 }
 0x6c5   : > { %v3571_v42 = vadd.f32 %v5676_v22, %v3570_v48 }
 0x6c7   : > { %v3591_v13 = vmul.f32 %v3571_v42, %v6478_v40  ;;  %v3586_v40 = vmul.f32 %v3559_v18, %v6458_v23  ;;  %v3581_v23 = vmul.f32 %v3546_v35, %v6438_v12 }
 0x6cc   : > { %v3573_v3 = vpop.f32.mrf.mxu2 }
 0x6cd   : > { %v3574_v2 = vadd.f32 %v5676_v22, %v3573_v3 }
 0x6cf   : > { %v3592_v58 = vmul.f32 %v3574_v2, %v6482_v49  ;;  %v3587_v49 = vmul.f32 %v3561_v63, %v6462_v25  ;;  %v3582_v25 = vmul.f32 %v3549_v0, %v6442_v53  ;;  %v3595_v53 = vld [vmem:[#allocation5 + $0x10] sm:$0xff] }
 0x6d4   : > { %v3575_v54 = vpop.f32.mrf.mxu2 }
 0x6d5   : > { %v3576_v56 = vadd.f32 %v5676_v22, %v3575_v54 }
 0x6d7   : > { %v3593_v52 = vmul.f32 %v3576_v56, %v6493_v5  ;;  %v3556_v5 = vadd.f32 %v5676_v22, %v3555_v14  ;;  %v3651_v14 = vld [vmem:[#allocation6 + $0x10] sm:$0xff] }
 0x6d9   : > { %3685 = vmatpush.msra.mxu3 %v3593_v52  ;;  %v3585_v34 = vmul.f32 %v3556_v5, %v6454_v21  ;;  %v3631_v21 = vpop.f32.mrf.mxu3 }
 0x6da   : > { %v3641_v19 = vadd.f32 %v3631_v21, %v3594_v46 }
 0x6db   : > { %3686 = vmatpush.msra.mxu3 %v3592_v58 }
 0x6dc   : > { %3645 = vst [vmem:[#allocation5] sm:$0xff] %v3641_v19 }
 0x6dd   : > { %3687 = vmatpush.msra.mxu3 %v3591_v13 }
 0x6df   : > { %3688 = vmatpush.msra.mxu3 %v3590_v50 }
 0x6e1   : > { %3689 = vmatpush.msra.mxu3 %v3589_v55  ;;  %v3633_v12 = vpop.f32.mrf.mxu3 }
 0x6e2   : > { %v3642_v15 = vadd.f32 %v3633_v12, %v3595_v53 }
 0x6e3   : > { %3690 = vmatpush.msra.mxu3 %v3588_v7 }
 0x6e4   : > { %3646 = vst [vmem:[#allocation5 + $0x10] sm:$0xff] %v3642_v15 }
 0x6e5   : > { %3691 = vmatpush.msra.mxu3 %v3587_v49 }
 0x6e7   : > { %3692 = vmatpush.msra.mxu3 %v3586_v40 }
 0x6e9   : > { %3693 = vmatpush.msra.mxu3 %v3585_v34  ;;  %v3636_v38 = vpop.f32.mrf.mxu3 }
 0x6ea   : > { %v3643_v11 = vadd.f32 %v3636_v38, %v3596_v60 }
 0x6eb   : > { %3694 = vmatpush.msra.mxu3 %v3584_v31 }
 0x6ec   : > { %3647 = vst [vmem:[#allocation5 + $0x18] sm:$0xff] %v3643_v11 }
 0x6ed   : > { %3695 = vmatpush.msra.mxu3 %v3583_v29 }
 0x6ef   : > { %3696 = vmatpush.msra.mxu3 %v3582_v25 }
 0x6f1   : > { %3697 = vmatpush.msra.mxu3 %v3581_v23  ;;  %v3638_v9 = vpop.f32.mrf.mxu3 }
 0x6f2   : > { %v3644_v26 = vadd.f32 %v3638_v9, %v3597_v37 }
 0x6f3   : > { %3698 = vmatpush.msra.mxu3 %v3580_v43 }
 0x6f4   : > { %3648 = vst [vmem:[#allocation5 + $0x8] sm:$0xff] %v3644_v26 }
 0x6f5   : > { %3699 = vmatpush.msra.mxu3 %v3579_v28 }
 0x6f7   : > { %3700 = vmatpush.msra.mxu3 %v3578_v17 }
 0x6f8   : > { %3701 = vmatmul.f32.vlgmr.msra.gmra.mxu3 %v3669_v16 }
 0x700   : > { %3704 = vmatmul.f32.gmra.mxu3 %v3670_v33 }
 0x708   : > { %3707 = vmatmul.f32.gmra.mxu3 %v3671_v4 }
 0x710   : > { %3710 = vmatmul.f32.gmra.mxu3 %v3672_v41 }
 0x77b   : > { %v3702_v61 = vpop.f32.mrf.mxu3 }
 0x77c   : > { %v3714_v10 = vadd.f32 %v3702_v61, %v3649_v36 }
 0x77e   : > { %3718 = vst [vmem:[#allocation6 + $0x8] sm:$0xff] %v3714_v10 }
 0x783   : > { %v3705_v59 = vpop.f32.mrf.mxu3 }
 0x784   : > { %v3715_v51 = vadd.f32 %v3705_v59, %v3650_v8 }
 0x786   : > { %3719 = vst [vmem:[#allocation6] sm:$0xff] %v3715_v51 }
 0x78b   : > { %v3708_v6 = vpop.f32.mrf.mxu3 }
 0x78c   : > { %v3716_v20 = vadd.f32 %v3708_v6, %v3651_v14 }
 0x78e   : > { %3720 = vst [vmem:[#allocation6 + $0x10] sm:$0xff] %v3716_v20 }
 0x793   : > { %v3711_v45 = vpop.f32.mrf.mxu3 }
 0x794   : > { %v3717_v24 = vadd.f32 %v3711_v45, %v3652_v57 }
 0x796   : > { %3721 = vst [vmem:[#allocation6 + $0x18] sm:$0xff] %v3717_v24 }
 0x797 PF: > { %p5114_p9 = scmp.ne.s32.totalorder %s6158_s19, 1 }
 0x799   : > { %3725 = sbr.rel (%p5114_p9) target bundleno = 3098 (0xc1a), region = 68 }
 0x79e   : > { %v3730_v48 = vld [vmem:[%s7441_s4] sm:$0xff]  ;;  %v3731_v3 = vld [vmem:[%s7441_s4 + $0x8] sm:$0xff]  ;;  %v3732_v22 = vld [vmem:[%s7441_s4 + $0x10] sm:$0xff] }
 0x79f   : > { %v3733_v54 = vld [vmem:[%s7441_s4 + $0x18] sm:$0xff]  ;;  %v3734_v2 = vld [vmem:[#allocation6 + $0x8] sm:$0xff]  ;;  %v3735_v56 = vld [vmem:[#allocation6] sm:$0xff] }
 0x7a0   : > { %v3736_v42 = vld [vmem:[#allocation6 + $0x10] sm:$0xff]  ;;  %v3737_v52 = vld [vmem:[#allocation6 + $0x18] sm:$0xff]  ;;  %v3738_v44 = vadd.f32 %v3734_v2, %v3730_v48  ;;  %v3739_v58 = vadd.f32 %v3735_v56, %v3731_v3  ;;  %v5457_v18 = vld [vmem:[#allocation9 + $0x228] sm:$0xff] }
 0x7a1   : > { %v5459_v32 = vld [vmem:[#allocation9 + $0x238] sm:$0xff]  ;;  %v3740_v13 = vadd.f32 %v3736_v42, %v3732_v22  ;;  %v3741_v39 = vadd.f32 %v3737_v52, %v3733_v54  ;;  %v5458_v63 = vld [vmem:[#allocation9 + $0x230] sm:$0xff]  ;;  %v5465_v7 = vld [vmem:[#allocation9 + $0x268] sm:$0xff] }
 0x7a2   : > { %v5467_v50 = vld [vmem:[#allocation9 + $0x278] sm:$0xff]  ;;  %3742 = vst [vmem:[%s7447_s10] sm:$0xff] %v3738_v44  ;;  %3954 = vmatpush.bf16.msra.mxu2 %v5459_v32  ;;  %v5466_v55 = vld [vmem:[#allocation9 + $0x270] sm:$0xff]  ;;  %v5456_v5 = vld [vmem:[#allocation9 + $0x220] sm:$0xff] }
 0x7a3   : > { %3743 = vst [vmem:[%s7447_s10 + $0x8] sm:$0xff] %v3739_v58  ;;  %3973 = vmatpush.bf16.msra.mxu1 %v5467_v50  ;;  %v5464_v49 = vld [vmem:[#allocation9 + $0x260] sm:$0xff]  ;;  %v5455_v30 = vld [vmem:[#allocation9 + $0x218] sm:$0xff]  ;;  %v5454_v27 = vld [vmem:[#allocation9 + $0x210] sm:$0xff] }
 0x7a4   : > { %3744 = vst [vmem:[%s7447_s10 + $0x10] sm:$0xff] %v3740_v13  ;;  %v5463_v40 = vld [vmem:[#allocation9 + $0x258] sm:$0xff]  ;;  %v5462_v34 = vld [vmem:[#allocation9 + $0x250] sm:$0xff]  ;;  %v5453_v0 = vld [vmem:[#allocation9 + $0x208] sm:$0xff] }
 0x7a5   : > { %3745 = vst [vmem:[%s7447_s10 + $0x18] sm:$0xff] %v3741_v39  ;;  %v5461_v31 = vld [vmem:[#allocation9 + $0x248] sm:$0xff]  ;;  %v5452_v35 = vld [vmem:[#allocation9 + $0x200] sm:$0xff]  ;;  %v7358_v29 = vld [vmem:[#allocation2 + $0x10] sm:$0xff] }
 0x7a6   : > { %3955 = vmatpush.bf16.msra.mxu2 %v5458_v63  ;;  %v7360_v1 = vld [vmem:[#allocation2] sm:$0xff]  ;;  %v5475_v25 = vld [vmem:[#allocation9 + $0x2b8] sm:$0xff]  ;;  %v3747_v16 = vld [vmem:[#allocation5 + $0x10] sm:$0xff] }
 0x7a7   : > { %3974 = vmatpush.bf16.msra.mxu1 %v5466_v55  ;;  %v5460_v62 = vld [vmem:[#allocation9 + $0x240] sm:$0xff]  ;;  %v3802_v46 = vpack.c.bf16 %v7360_v1, %v7358_v29  ;;  %v5474_v47 = vld [vmem:[#allocation9 + $0x2b0] sm:$0xff]  ;;  %v5473_v43 = vld [vmem:[#allocation9 + $0x2a8] sm:$0xff] }
 0x7a8   : > { %v3746_v23 = vld [vmem:[#allocation5] sm:$0xff]  ;;  %v7364_v28 = vld [vmem:[#allocation2 + $0x18] sm:$0xff]  ;;  %v7366_v17 = vld [vmem:[#allocation2 + $0x8] sm:$0xff] }
 0x7a9   : > { %v3803_v21 = vpack.c.bf16 %v3747_v16, %v3746_v23  ;;  %v5472_v19 = vld [vmem:[#allocation9 + $0x2a0] sm:$0xff]  ;;  %v5471_v53 = vld [vmem:[#allocation9 + $0x298] sm:$0xff]  ;;  %v3749_v33 = vld [vmem:[#allocation5 + $0x8] sm:$0xff]  ;;  %v3805_v15 = vpack.c.bf16 %v7366_v17, %v7364_v28 }
 0x7aa   : > { %3956 = vmatpush.bf16.msra.mxu2 %v5457_v18  ;;  %v3748_v12 = vld [vmem:[#allocation5 + $0x18] sm:$0xff]  ;;  %v5470_v38 = vld [vmem:[#allocation9 + $0x290] sm:$0xff]  ;;  %v5469_v11 = vld [vmem:[#allocation9 + $0x288] sm:$0xff] }
 0x7ab   : > { %3975 = vmatpush.bf16.msra.mxu1 %v5465_v7  ;;  %v3806_v60 = vpack.c.bf16 %v3749_v33, %v3748_v12  ;;  %v5468_v4 = vld [vmem:[#allocation9 + $0x280] sm:$0xff]  ;;  %v3751_v9 = vld [vmem:[%s7442_s5 + $0x8] sm:$0xff]  ;;  %v3752_v41 = vld [vmem:[%s7442_s5 + $0x10] sm:$0xff] }
 0x7ac   : > { %v3750_v37 = vld [vmem:[%s7442_s5] sm:$0xff]  ;;  %v3753_v36 = vld [vmem:[%s7442_s5 + $0x18] sm:$0xff]  ;;  %v5482_v51 = vld [vmem:[#allocation9 + $0x2f0] sm:$0xff] }
 0x7ad   : > { %v3804_v26 = vpack.c.bf16 %v3751_v9, %v3750_v37  ;;  %v3807_v61 = vpack.c.bf16 %v3753_v36, %v3752_v41  ;;  %v5483_v59 = vld [vmem:[#allocation9 + $0x2f8] sm:$0xff]  ;;  %v5481_v6 = vld [vmem:[#allocation9 + $0x2e8] sm:$0xff]  ;;  %v5997_v57 = vld [vmem:[%s7445_s8 + $0x7] ss:$0 sm:$0xff] }
 0x7ae   : > { %3957 = vmatpush.bf16.msra.mxu2 %v5456_v5  ;;  %4159 = vmatpush.bf16.msra.mxu3 %v5483_v59  ;;  %v5480_v45 = vld [vmem:[#allocation9 + $0x2e0] sm:$0xff]  ;;  %v5479_v3 = vld [vmem:[#allocation9 + $0x2d8] sm:$0xff]  ;;  %v5478_v54 = vld [vmem:[#allocation9 + $0x2d0] sm:$0xff] }
 0x7af   : > { %3976 = vmatpush.bf16.msra.mxu1 %v5464_v49  ;;  %v5477_v58 = vld [vmem:[#allocation9 + $0x2c8] sm:$0xff]  ;;  %v5476_v13 = vld [vmem:[#allocation9 + $0x2c0] sm:$0xff] }
 0x7b2   : > { %3958 = vmatpush.bf16.msra.mxu2 %v5455_v30  ;;  %4160 = vmatpush.bf16.msra.mxu3 %v5482_v51 }
 0x7b3   : > { %3977 = vmatpush.bf16.msra.mxu1 %v5463_v40 }
 0x7b6   : > { %3959 = vmatpush.bf16.msra.mxu2 %v5454_v27  ;;  %4161 = vmatpush.bf16.msra.mxu3 %v5481_v6 }
 0x7b7   : > { %3978 = vmatpush.bf16.msra.mxu1 %v5462_v34 }
 0x7ba   : > { %3960 = vmatpush.bf16.msra.mxu2 %v5453_v0  ;;  %4162 = vmatpush.bf16.msra.mxu3 %v5480_v45 }
 0x7bb   : > { %3979 = vmatpush.bf16.msra.mxu1 %v5461_v31 }
 0x7be   : > { %3961 = vmatpush.bf16.msra.mxu2 %v5452_v35  ;;  %4163 = vmatpush.bf16.msra.mxu3 %v5479_v3 }
 0x7bf   : > { %3980 = vmatpush.bf16.msra.mxu1 %v5460_v62 }
 0x7c1   : > { %3962 = vmatmul.bf16.vlgmr.msra.gmra.mxu2 %v3802_v46 }
 0x7c2   : > { %3992 = vmatpush.bf16.msrb.mxu2 %v5475_v25  ;;  %3981 = vmatmul.bf16.vlgmr.msra.gmra.mxu1 %v3803_v21 }
 0x7c3   : > { %4164 = vmatpush.bf16.msra.mxu3 %v5478_v54 }
 0x7c6   : > { %3993 = vmatpush.bf16.msrb.mxu2 %v5474_v47 }
 0x7c7   : > { %4165 = vmatpush.bf16.msra.mxu3 %v5477_v58 }
 0x7ca   : > { %3994 = vmatpush.bf16.msrb.mxu2 %v5473_v43 }
 0x7cb   : > { %4166 = vmatpush.bf16.msra.mxu3 %v5476_v13 }
 0x7ce   : > { %3995 = vmatpush.bf16.msrb.mxu2 %v5472_v19 }
 0x7d1   : > { %3967 = vmatmul.bf16.gmra.mxu2 %v3805_v15 }
 0x7d2   : > { %3996 = vmatpush.bf16.msrb.mxu2 %v5471_v53  ;;  %3986 = vmatmul.bf16.gmra.mxu1 %v3806_v60  ;;  %v5491_v53 = vld [vmem:[#allocation9 + $0x338] sm:$0xff] }
 0x7d3   : > { %4250 = vmatpush.bf16.msra.mxu0 %v5491_v53 }
 0x7d6   : > { %3997 = vmatpush.bf16.msrb.mxu2 %v5470_v38  ;;  %v5490_v38 = vld [vmem:[#allocation9 + $0x330] sm:$0xff] }
 0x7d7   : > { %4251 = vmatpush.bf16.msra.mxu0 %v5490_v38 }
 0x7da   : > { %3998 = vmatpush.bf16.msrb.mxu2 %v5469_v11 }
 0x7de   : > { %3999 = vmatpush.bf16.msrb.mxu2 %v5468_v4 }
 0x7e1   : > { %4000 = vmatmul.bf16.vlgmr.msrb.gmra.mxu2 %v3804_v26 }
 0x7f1   : > { %4005 = vmatmul.bf16.gmra.mxu2 %v3807_v61  ;;  %v5489_v61 = vld [vmem:[#allocation9 + $0x328] sm:$0xff] }
 0x7f2   : > { %4252 = vmatpush.bf16.msra.mxu0 %v5489_v61 }
 0x83f   : > { %v3982_v20 = vpop.f32.mrf.mxu1 }
 0x844   : > { %v3963_v10 = vpop.f32.mrf.mxu2 }
 0x845   : > { %v3964_v48 = vadd.f32 %v5997_v57, %v3963_v10 }
 0x847   : > { %v3983_v22 = vadd.f32 %v3982_v20, %v3964_v48  ;;  %v3984_v2 = vpop.f32.mrf.mxu1 }
 0x84c   : > { %v3965_v8 = vpop.f32.mrf.mxu2 }
 0x84d   : > { %v3966_v52 = vadd.f32 %v5997_v57, %v3965_v8 }
 0x84f   : > { %v3985_v32 = vadd.f32 %v3984_v2, %v3966_v52  ;;  %v3987_v63 = vpop.f32.mrf.mxu1 }
 0x854   : > { %v3968_v14 = vpop.f32.mrf.mxu2 }
 0x855   : > { %v3969_v18 = vadd.f32 %v5997_v57, %v3968_v14 }
 0x857   : > { %v3988_v49 = vadd.f32 %v3987_v63, %v3969_v18  ;;  %v3989_v35 = vpop.f32.mrf.mxu1 }
 0x85c   : > { %v3970_v24 = vpop.f32.mrf.mxu2 }
 0x85d   : > { %v3971_v34 = vadd.f32 %v5997_v57, %v3970_v24  ;;  %v5488_v24 = vld [vmem:[#allocation9 + $0x320] sm:$0xff] }
 0x85e   : > { %4253 = vmatpush.bf16.msra.mxu0 %v5488_v24 }
 0x85f   : > { %v3990_v23 = vadd.f32 %v3989_v35, %v3971_v34  ;;  %v5487_v35 = vld [vmem:[#allocation9 + $0x318] sm:$0xff] }
 0x862   : > { %4254 = vmatpush.bf16.msra.mxu0 %v5487_v35 }
 0x864   : > { %v4001_v56 = vpop.f32.mrf.mxu2 }
 0x865   : > { %v7385_v42 = vadd.f32 %v4001_v56, %v3983_v22 }
 0x867   : > { %v5211_v44 = vmul.f32 -1.442695, %v7385_v42 }
 0x869   : > { %6004 = vpow2.f32 %v5211_v44 }
 0x86c   : > { %v4003_v39 = vpop.f32.mrf.mxu2 }
 0x86d   : > { %v7388_v50 = vadd.f32 %v4003_v39, %v3985_v32 }
 0x86f   : > { %v6005_v55 = vpop.eup %6004  ;;  %v5212_v7 = vmul.f32 -1.442695, %v7388_v50 }
 0x870   : > { %v4023_v5 = vadd.f32 1.0, %v6005_v55 }
 0x871   : > { %6006 = vpow2.f32 %v5212_v7 }
 0x872   : > { %6008 = vrcp.f32 %v4023_v5  ;;  %v4038_v11 = vand.u32 2147483648, %v4023_v5  ;;  %vm4032_vm3 = vweird.f32 %v4023_v5  ;;  %v4036_v4 = vand.u32 2147483647, %v4023_v5 }
 0x874   : > { %v4006_v30 = vpop.f32.mrf.mxu2  ;;  %v4039_v10 = vor.u32 1.1754944e-38, %v4038_v11  ;;  %vm4037_vm7 = vcmp.eq.f32.partialorder %v4036_v4, 8.507059e+37 }
 0x875   : > { %v7391_v40 = vadd.f32 %v4006_v30, %v3988_v49 }
 0x877   : > { %v6007_v27 = vpop.eup %6006  ;;  %v5213_v0 = vmul.f32 -1.442695, %v7391_v40 }
 0x878   : > { %v6009_v31 = vpop.eup %6008  ;;  %v4024_v25 = vadd.f32 1.0, %v6007_v27 }
 0x879   : > { %v4028_v62 = vmul.f32 %v6009_v31, %v4023_v5  ;;  %6010 = vpow2.f32 %v5213_v0  ;;  %vm4033_vm5 = vweird.f32 %v6009_v31 }
 0x87a   : > { %6012 = vrcp.f32 %v4024_v25  ;;  %vm4034_vm4 = vmor %vm4032_vm3, %vm4033_vm5  ;;  %v4053_v9 = vand.u32 2147483648, %v4024_v25  ;;  %v4051_v36 = vand.u32 2147483647, %v4024_v25  ;;  %vm4047_vm8 = vweird.f32 %v4024_v25 }
 0x87b   : > { %v4029_v16 = vsub.f32 1.0, %v4028_v62  ;;  %v5485_v62 = vld [vmem:[#allocation9 + $0x308] sm:$0xff] }
 0x87c   : > { %v4008_v46 = vpop.f32.mrf.mxu2  ;;  %v4054_v6 = vor.u32 1.1754944e-38, %v4053_v9  ;;  %vm4052_vm10 = vcmp.eq.f32.partialorder %v4051_v36, 8.507059e+37  ;;  %v5498_v9 = vld [vmem:[#allocation9 + $0x370] sm:$0xff] }
 0x87d   : > { %v4030_v21 = vmul.f32 %v6009_v31, %v4029_v16  ;;  %v7394_v47 = vadd.f32 %v4008_v46, %v3990_v23  ;;  %v5484_v23 = vld [vmem:[#allocation9 + $0x300] sm:$0xff]  ;;  %v5998_v46 = vld [vmem:[%s7445_s8 + $0x8] ss:$0 sm:$0xff]  ;;  %v5494_v36 = vld [vmem:[#allocation9 + $0x350] sm:$0xff] }
 0x87f   : > { %v6011_v43 = vpop.eup %6010  ;;  %v5214_v19 = vmul.f32 -1.442695, %v7394_v47  ;;  %v4031_v15 = vadd.f32 %v6009_v31, %v4030_v21 }
 0x880   : > { %v6013_v12 = vpop.eup %6012  ;;  %v4025_v33 = vadd.f32 1.0, %v6011_v43 }
 0x881   : > { %v4043_v60 = vmul.f32 %v6013_v12, %v4024_v25  ;;  %6014 = vpow2.f32 %v5214_v19  ;;  %v4035_v26 = vsel %vm4034_vm4, %v6009_v31, %v4031_v15  ;;  %vm4048_vm6 = vweird.f32 %v6013_v12  ;;  %v5486_v25 = vld [vmem:[#allocation9 + $0x310] sm:$0xff] }
 0x882   : > { %6016 = vrcp.f32 %v4025_v33  ;;  %v4040_v14 = vsel %vm4037_vm7, %v4039_v10, %v4035_v26  ;;  %vm4049_vm9 = vmor %vm4047_vm8, %vm4048_vm6  ;;  %v4068_v32 = vand.u32 2147483648, %v4025_v33  ;;  %vm4062_vm12 = vweird.f32 %v4025_v33  ;;  %4255 = vmatpush.bf16.msra.mxu0 %v5486_v25  ;;  %v5497_v26 = vld [vmem:[#allocation9 + $0x368] sm:$0xff] }
 0x883   : > { %v4044_v37 = vsub.f32 1.0, %v4043_v60  ;;  %v4087_v3 = vmul.f32 %v4040_v14, %v7385_v42  ;;  %v4066_v13 = vand.u32 2147483647, %v4025_v33  ;;  %v5493_v10 = vld [vmem:[#allocation9 + $0x348] sm:$0xff] }
 0x885   : > { %v4045_v41 = vmul.f32 %v6013_v12, %v4044_v37  ;;  %vm4067_vm15 = vcmp.eq.f32.partialorder %v4066_v13, 8.507059e+37  ;;  %v5499_v37 = vld [vmem:[#allocation9 + $0x378] sm:$0xff] }
 0x886   : > { %4256 = vmatpush.bf16.msra.mxu0 %v5485_v62  ;;  %4417 = vmatpush.bf16.msrb.mxu1 %v5499_v37 }
 0x887   : > { %v6015_v8 = vpop.eup %6014  ;;  %v4046_v59 = vadd.f32 %v6013_v12, %v4045_v41  ;;  %v5999_v41 = vld [vmem:[%s7445_s8 + $0x9] ss:$0 sm:$0xff] }
 0x888   : > { %v6017_v51 = vpop.eup %6016  ;;  %v4026_v20 = vadd.f32 1.0, %v6015_v8  ;;  %v5492_v8 = vld [vmem:[#allocation9 + $0x340] sm:$0xff] }
 0x889   : > { %v4050_v57 = vsel %vm4049_vm9, %v6013_v12, %v4046_v59  ;;  %v4058_v45 = vmul.f32 %v6017_v51, %v4025_v33  ;;  %vm4063_vm11 = vweird.f32 %v6017_v51 }
 0x88a   : > { %v4055_v48 = vsel %vm4052_vm10, %v4054_v6, %v4050_v57  ;;  %6018 = vrcp.f32 %v4026_v20  ;;  %vm4064_vm13 = vmor %vm4062_vm12, %vm4063_vm11  ;;  %v4083_v63 = vand.u32 2147483648, %v4026_v20  ;;  %v4081_v42 = vand.u32 2147483647, %v4026_v20  ;;  %4257 = vmatpush.bf16.msra.mxu0 %v5484_v23  ;;  %4418 = vmatpush.bf16.msrb.mxu1 %v5498_v9 }
 0x88b   : > { %v4088_v22 = vmul.f32 %v4055_v48, %v7388_v50  ;;  %v4059_v54 = vsub.f32 1.0, %v4058_v45  ;;  %v4069_v50 = vor.u32 1.1754944e-38, %v4068_v32  ;;  %vm4077_vm0 = vweird.f32 %v4026_v20 }
 0x88c   : > { %v4084_v49 = vor.u32 1.1754944e-38, %v4083_v63  ;;  %vm4082_vm2 = vcmp.eq.f32.partialorder %v4081_v42, 8.507059e+37 }
 0x88d   : > { %v4060_v2 = vmul.f32 %v6017_v51, %v4059_v54  ;;  %v4107_v56 = vpack.c.bf16 %v4088_v22, %v4087_v3 }
 0x88e   : > { %4419 = vmatpush.bf16.msrb.mxu1 %v5497_v26 }
 0x88f   : > { %4167 = vmatmul.bf16.vlgmr.msra.gmra.mxu3 %v4107_v56  ;;  %v4061_v44 = vadd.f32 %v6017_v51, %v4060_v2 }
 0x890   : > { %v6019_v52 = vpop.eup %6018 }
 0x891   : > { %v4073_v58 = vmul.f32 %v6019_v52, %v4026_v20  ;;  %v4065_v55 = vsel %vm4064_vm13, %v6017_v51, %v4061_v44  ;;  %vm4078_vm14 = vweird.f32 %v6019_v52 }
 0x892   : > { %v4070_v5 = vsel %vm4067_vm15, %v4069_v50, %v4065_v55  ;;  %vm4079_vm1 = vmor %vm4077_vm0, %vm4078_vm14 }
 0x893   : > { %v4074_v39 = vsub.f32 1.0, %v4073_v58  ;;  %v4089_v34 = vmul.f32 %v4070_v5, %v7391_v40 }
 0x895   : > { %v4075_v18 = vmul.f32 %v6019_v52, %v4074_v39 }
 0x897   : > { %v4076_v7 = vadd.f32 %v6019_v52, %v4075_v18 }
 0x899   : > { %v4080_v30 = vsel %vm4079_vm1, %v6019_v52, %v4076_v7 }
 0x89a   : > { %v4085_v27 = vsel %vm4082_vm2, %v4084_v49, %v4080_v30 }
 0x89b   : > { %v4090_v0 = vmul.f32 %v4085_v27, %v7394_v47 }
 0x89d   : > { %v4108_v31 = vpack.c.bf16 %v4090_v0, %v4089_v34 }
 0x89f   : > { %4172 = vmatmul.bf16.gmra.mxu3 %v4108_v31 }
 0x912   : > { %v4168_v16 = vpop.f32.mrf.mxu3 }
 0x913   : > { %v4169_v21 = vadd.f32 %v5998_v46, %v4168_v16 }
 0x915   : > { %v4178_v47 = vadd.f32 %v4169_v21, %v7358_v29  ;;  %v5496_v29 = vld [vmem:[#allocation9 + $0x360] sm:$0xff] }
 0x916   : > { %4420 = vmatpush.bf16.msrb.mxu1 %v5496_v29 }
 0x91a   : > { %v4170_v43 = vpop.f32.mrf.mxu3 }
 0x91b   : > { %v4171_v40 = vadd.f32 %v5998_v46, %v4170_v43 }
 0x91d   : > { %v4179_v19 = vadd.f32 %v4171_v40, %v7360_v1  ;;  %v5495_v1 = vld [vmem:[#allocation9 + $0x358] sm:$0xff] }
 0x91e   : > { %4421 = vmatpush.bf16.msrb.mxu1 %v5495_v1 }
 0x91f   : > { %v4198_v53 = vpack.c.bf16 %v4179_v19, %v4178_v47 }
 0x921   : > { %4258 = vmatmul.bf16.vlgmr.msra.gmra.mxu0 %v4198_v53 }
 0x922   : > { %v4173_v12 = vpop.f32.mrf.mxu3  ;;  %4422 = vmatpush.bf16.msrb.mxu1 %v5494_v36 }
 0x923   : > { %v4174_v33 = vadd.f32 %v5998_v46, %v4173_v12 }
 0x925   : > { %v4180_v38 = vadd.f32 %v4174_v33, %v7364_v28 }
 0x926   : > { %4423 = vmatpush.bf16.msrb.mxu1 %v5493_v10 }
 0x92a   : > { %v4175_v15 = vpop.f32.mrf.mxu3  ;;  %4424 = vmatpush.bf16.msrb.mxu1 %v5492_v8 }
 0x92b   : > { %v4176_v60 = vadd.f32 %v5998_v46, %v4175_v15 }
 0x92d   : > { %v4181_v11 = vadd.f32 %v4176_v60, %v7366_v17 }
 0x92f   : > { %v4199_v4 = vpack.c.bf16 %v4181_v11, %v4180_v38 }
 0x931   : > { %4263 = vmatmul.bf16.gmra.mxu0 %v4199_v4 }
 0x99e   : > { %v4259_v28 = vpop.f32.mrf.mxu0 }
 0x99f   : > { %v4260_v61 = vadd.f32 %v5999_v41, %v4259_v28 }
 0x9a1   : > { %v5279_v17 = vmul.f32 -1.442695, %v4260_v61 }
 0x9a3   : > { %6020 = vpow2.f32 %v5279_v17 }
 0x9a6   : > { %v4261_v59 = vpop.f32.mrf.mxu0 }
 0x9a7   : > { %v4262_v51 = vadd.f32 %v5999_v41, %v4261_v59  ;;  %v5507_v59 = vld [vmem:[#allocation9 + $0x3b8] sm:$0xff] }
 0x9a8   : > { %4534 = vmatpush.bf16.msrb.mxu3 %v5507_v59 }
 0x9a9   : > { %v6021_v14 = vpop.eup %6020  ;;  %v5280_v6 = vmul.f32 -1.442695, %v4262_v51 }
 0x9aa   : > { %v4281_v20 = vadd.f32 1.0, %v6021_v14 }
 0x9ab   : > { %6022 = vpow2.f32 %v5280_v6  ;;  %v5505_v6 = vld [vmem:[#allocation9 + $0x3a8] sm:$0xff] }
 0x9ac   : > { %6024 = vrcp.f32 %v4281_v20  ;;  %v4296_v18 = vand.u32 2147483648, %v4281_v20  ;;  %vm4290_vm3 = vweird.f32 %v4281_v20  ;;  %v4294_v42 = vand.u32 2147483647, %v4281_v20 }
 0x9ae   : > { %v4264_v57 = vpop.f32.mrf.mxu0  ;;  %v4297_v27 = vor.u32 1.1754944e-38, %v4296_v18  ;;  %vm4295_vm7 = vcmp.eq.f32.partialorder %v4294_v42, 8.507059e+37  ;;  %v5515_v42 = vld [vmem:[#allocation9 + $0x3f8] sm:$0xff] }
 0x9af   : > { %v7411_v45 = vadd.f32 %v5999_v41, %v4264_v57  ;;  %4634 = vmatpush.bf16.msrb.mxu0 %v5515_v42 }
 0x9b1   : > { %v6023_v24 = vpop.eup %6022  ;;  %v5281_v48 = vmul.f32 -1.442695, %v7411_v45 }
 0x9b2   : > { %v6025_v3 = vpop.eup %6024  ;;  %v4282_v22 = vadd.f32 1.0, %v6023_v24  ;;  %v5503_v24 = vld [vmem:[#allocation9 + $0x398] sm:$0xff] }
 0x9b3   : > { %v4286_v54 = vmul.f32 %v6025_v3, %v4281_v20  ;;  %6026 = vpow2.f32 %v5281_v48  ;;  %vm4291_vm5 = vweird.f32 %v6025_v3  ;;  %v5504_v20 = vld [vmem:[#allocation9 + $0x3a0] sm:$0xff]  ;;  %v4436_v48 = vlaneseq }
 0x9b4   : > { %6028 = vrcp.f32 %v4282_v22  ;;  %vm4292_vm4 = vmor %vm4290_vm3, %vm4291_vm5  ;;  %v4311_v7 = vand.u32 2147483648, %v4282_v22  ;;  %v4309_v30 = vand.u32 2147483647, %v4282_v22  ;;  %vm4305_vm8 = vweird.f32 %v4282_v22 }
 0x9b5   : > { %v4287_v2 = vsub.f32 1.0, %v4286_v54  ;;  %v4437_v54 = vshrl.u32 %v4436_v48, 7  ;;  %vm4443_vm3 = vcmask 261120  }
 0x9b6   : > { %v4266_v56 = vpop.f32.mrf.mxu0  ;;  %v4312_v25 = vor.u32 1.1754944e-38, %v4311_v7  ;;  %vm4310_vm10 = vcmp.eq.f32.partialorder %v4309_v30, 8.507059e+37  ;;  %v5513_v7 = vld [vmem:[#allocation9 + $0x3e8] sm:$0xff]  ;;  %v5510_v30 = vld [vmem:[#allocation9 + $0x3d0] sm:$0xff] }
 0x9b7   : > { %v4288_v52 = vmul.f32 %v6025_v3, %v4287_v2  ;;  %v7414_v44 = vadd.f32 %v5999_v41, %v4266_v56  ;;  %v6001_v2 = vld [vmem:[%s7443_s6] ss:$0 sm:$0xff]  ;;  %v5501_v56 = vld [vmem:[#allocation9 + $0x388] sm:$0xff] }
 0x9b8   : > { %vm4440_vm5 = vcmp.eq.s32.totalorder %v4437_v54, %v6001_v2 }
 0x9b9   : > { %v6027_v58 = vpop.eup %6026  ;;  %v5282_v32 = vmul.f32 -1.442695, %v7414_v44  ;;  %v4289_v63 = vadd.f32 %v6025_v3, %v4288_v52 }
 0x9ba   : > { %v6029_v13 = vpop.eup %6028  ;;  %v4283_v39 = vadd.f32 1.0, %v6027_v58 }
 0x9bb   : > { %v4301_v55 = vmul.f32 %v6029_v13, %v4282_v22  ;;  %6030 = vpow2.f32 %v5282_v32  ;;  %v4293_v5 = vsel %vm4292_vm4, %v6025_v3, %v4289_v63  ;;  %vm4306_vm6 = vweird.f32 %v6029_v13  ;;  %v5502_v3 = vld [vmem:[#allocation9 + $0x390] sm:$0xff]  ;;  %v5500_v63 = vld [vmem:[#allocation9 + $0x380] sm:$0xff] }
 0x9bc   : > { %6032 = vrcp.f32 %v4283_v39  ;;  %v4298_v35 = vsel %vm4295_vm7, %v4297_v27, %v4293_v5  ;;  %vm4307_vm9 = vmor %vm4305_vm8, %vm4306_vm6  ;;  %v4326_v15 = vand.u32 2147483648, %v4283_v39  ;;  %vm4320_vm12 = vweird.f32 %v4283_v39  ;;  %v5512_v5 = vld [vmem:[#allocation9 + $0x3e0] sm:$0xff]  ;;  %v5509_v27 = vld [vmem:[#allocation9 + $0x3c8] sm:$0xff] }
 0x9bd   : > { %v4302_v50 = vsub.f32 1.0, %v4301_v55  ;;  %v4345_v21 = vmul.f32 %v4298_v35, %v4260_v61  ;;  %v4324_v60 = vand.u32 2147483647, %v4283_v39 }
 0x9be   : > { %v4327_v26 = vor.u32 1.1754944e-38, %v4326_v15 }
 0x9bf   : > { %v4303_v49 = vmul.f32 %v6029_v13, %v4302_v50  ;;  %vm4325_vm15 = vcmp.eq.f32.partialorder %v4324_v60, 8.507059e+37  ;;  %v5514_v50 = vld [vmem:[#allocation9 + $0x3f0] sm:$0xff] }
 0x9c0   : > { %4635 = vmatpush.bf16.msrb.mxu0 %v5514_v50 }
 0x9c1   : > { %v6031_v34 = vpop.eup %6030  ;;  %v4304_v0 = vadd.f32 %v6029_v13, %v4303_v49  ;;  %v5511_v49 = vld [vmem:[#allocation9 + $0x3d8] sm:$0xff] }
 0x9c2   : > { %v6033_v31 = vpop.eup %6032  ;;  %v4284_v62 = vadd.f32 1.0, %v6031_v34  ;;  %v6002_v34 = vld [vmem:[%s7445_s8 + $0xb] ss:$0 sm:$0xff] }
 0x9c3   : > { %v4308_v23 = vsel %vm4307_vm9, %v6029_v13, %v4304_v0  ;;  %v4316_v16 = vmul.f32 %v6033_v31, %v4283_v39  ;;  %vm4321_vm11 = vweird.f32 %v6033_v31  ;;  %v6089_v13 = vmov 0.0   ;;  %v5508_v0 = vld [vmem:[#allocation9 + $0x3c0] sm:$0xff] }
 0x9c4   : > { %v4313_v46 = vsel %vm4310_vm10, %v4312_v25, %v4308_v23  ;;  %6034 = vrcp.f32 %v4284_v62  ;;  %vm4322_vm13 = vmor %vm4320_vm12, %vm4321_vm11  ;;  %v4341_v11 = vand.u32 2147483648, %v4284_v62  ;;  %v4339_v9 = vand.u32 2147483647, %v4284_v62  ;;  %4636 = vmatpush.bf16.msrb.mxu0 %v5513_v7 }
 0x9c5   : > { %v4346_v43 = vmul.f32 %v4313_v46, %v4262_v51  ;;  %v4317_v40 = vsub.f32 1.0, %v4316_v16  ;;  %vm4335_vm0 = vweird.f32 %v4284_v62  ;;  %v5506_v51 = vld [vmem:[#allocation9 + $0x3b0] sm:$0xff]  ;;  %v5315_v39 = vsel %vm4440_vm5, 1.0, %v6089_v13 }
 0x9c6   : > { %v4342_v41 = vor.u32 1.1754944e-38, %v4341_v11  ;;  %vm4340_vm2 = vcmp.eq.f32.partialorder %v4339_v9, 8.507059e+37  ;;  %4535 = vmatpush.bf16.msrb.mxu3 %v5506_v51  ;;  %v6003_v11 = vld [vmem:[%s7445_s8 + $0xc] ss:$0 sm:$0xff] }
 0x9c7   : > { %v4318_v47 = vmul.f32 %v6033_v31, %v4317_v40  ;;  %v4365_v19 = vpack.c.bf16 %v4346_v43, %v4345_v21 }
 0x9c8   : > { %4637 = vmatpush.bf16.msrb.mxu0 %v5512_v5 }
 0x9c9   : > { %4425 = vmatmul.bf16.vlgmr.msrb.gmra.mxu1 %v4365_v19  ;;  %v4319_v12 = vadd.f32 %v6033_v31, %v4318_v47 }
 0x9ca   : > { %v6035_v53 = vpop.eup %6034  ;;  %4536 = vmatpush.bf16.msrb.mxu3 %v5505_v6 }
 0x9cb   : > { %v4331_v33 = vmul.f32 %v6035_v53, %v4284_v62  ;;  %v4323_v4 = vsel %vm4322_vm13, %v6033_v31, %v4319_v12  ;;  %vm4336_vm14 = vweird.f32 %v6035_v53 }
 0x9cc   : > { %v4328_v1 = vsel %vm4325_vm15, %v4327_v26, %v4323_v4  ;;  %vm4337_vm1 = vmor %vm4335_vm0, %vm4336_vm14  ;;  %4638 = vmatpush.bf16.msrb.mxu0 %v5511_v49 }
 0x9cd   : > { %v4332_v38 = vsub.f32 1.0, %v4331_v33  ;;  %v4347_v61 = vmul.f32 %v4328_v1, %v7411_v45  ;;  %v6000_v45 = vld [vmem:[%s7445_s8 + $0xa] ss:$0 sm:$0xff] }
 0x9ce   : > { %4537 = vmatpush.bf16.msrb.mxu3 %v5504_v20 }
 0x9cf   : > { %v4333_v37 = vmul.f32 %v6035_v53, %v4332_v38 }
 0x9d0   : > { %4639 = vmatpush.bf16.msrb.mxu0 %v5510_v30 }
 0x9d1   : > { %v4334_v29 = vadd.f32 %v6035_v53, %v4333_v37 }
 0x9d2   : > { %4538 = vmatpush.bf16.msrb.mxu3 %v5503_v24 }
 0x9d3   : > { %v4338_v36 = vsel %vm4337_vm1, %v6035_v53, %v4334_v29 }
 0x9d4   : > { %v4343_v28 = vsel %vm4340_vm2, %v4342_v41, %v4338_v36  ;;  %4640 = vmatpush.bf16.msrb.mxu0 %v5509_v27 }
 0x9d5   : > { %v4348_v17 = vmul.f32 %v4343_v28, %v7414_v44 }
 0x9d6   : > { %4539 = vmatpush.bf16.msrb.mxu3 %v5502_v3 }
 0x9d7   : > { %v4366_v10 = vpack.c.bf16 %v4348_v17, %v4347_v61 }
 0x9d8   : > { %4641 = vmatpush.bf16.msrb.mxu0 %v5508_v0 }
 0x9d9   : > { %4430 = vmatmul.bf16.gmra.mxu1 %v4366_v10 }
 0x9da   : > { %4540 = vmatpush.bf16.msrb.mxu3 %v5501_v56 }
 0x9de   : > { %4541 = vmatpush.bf16.msrb.mxu3 %v5500_v63 }
 0xa46   : > { %v4426_v8 = vpop.f32.mrf.mxu1 }
 0xa47   : > { %v4427_v32 = vadd.f32 %v6000_v45, %v4426_v8 }
 0xa4e   : > { %v4428_v14 = vpop.f32.mrf.mxu1 }
 0xa4f   : > { %v4429_v58 = vadd.f32 %v6000_v45, %v4428_v14 }
 0xa56   : > { %v4431_v57 = vpop.f32.mrf.mxu1 }
 0xa57   : > { %v4432_v44 = vadd.f32 %v6000_v45, %v4431_v57 }
 0xa5e   : > { %v4433_v22 = vpop.f32.mrf.mxu1 }
 0xa5f   : > { %v4434_v52 = vadd.f32 %v6000_v45, %v4433_v22 }
 0xa61   : > { %4459 = vmatpush.msra.mxu2 %v4434_v52 }
 0xa63   : > { %4460 = vmatpush.msra.mxu2 %v4432_v44 }
 0xa65   : > { %4461 = vmatpush.msra.mxu2 %v4429_v58 }
 0xa67   : > { %4462 = vmatpush.msra.mxu2 %v4427_v32 }
 0xa68   : > { %5316 = vmatmul.msk.f32.vlgmr.msra.gmra.mxu2 %vm4443_vm3, %v5315_v39 }
 0xaeb   : > { %v4464_v55 = vpop.f32.mrf.mxu2 }
 0xaec   : > { %v4483_v18 = vpack.c.bf16 %v4464_v55, %v4464_v55 }
 0xaee   : > { %4542 = vmatmul.bf16.vlgmr.msrb.gmra.mxu3 %v4483_v18 }
 0xb71   : > { %v4543_v31 = vpop.f32.mrf.mxu3 }
 0xb72   : > { %v4544_v35 = vadd.f32 %v6002_v34, %v4543_v31 }
 0xb74   : > { %v5349_v25 = vmul.f32 -1.442695, %v4544_v35 }
 0xb76   : > { %6036 = vpow2.f32 %v5349_v25 }
 0xb79   : > { %v4545_v62 = vpop.f32.mrf.mxu3 }
 0xb7c   : > { %v6037_v23 = vpop.eup %6036 }
 0xb7d   : > { %v4550_v16 = vadd.f32 1.0, %v6037_v23 }
 0xb7f   : > { %6038 = vrcp.f32 %v4550_v16  ;;  %v4562_v40 = vand.u32 2147483648, %v4550_v16  ;;  %v4560_v19 = vand.u32 2147483647, %v4550_v16  ;;  %vm4556_vm6 = vweird.f32 %v4550_v16 }
 0xb81   : > { %v4563_v12 = vor.u32 1.1754944e-38, %v4562_v40  ;;  %vm4561_vm8 = vcmp.eq.f32.partialorder %v4560_v19, 8.507059e+37 }
 0xb85   : > { %v6039_v46 = vpop.eup %6038 }
 0xb86   : > { %v4552_v21 = vmul.f32 %v6039_v46, %v4550_v16  ;;  %vm4557_vm4 = vweird.f32 %v6039_v46 }
 0xb87   : > { %vm4558_vm7 = vmor %vm4556_vm6, %vm4557_vm4 }
 0xb88   : > { %v4553_v43 = vsub.f32 1.0, %v4552_v21 }
 0xb8a   : > { %v4554_v47 = vmul.f32 %v6039_v46, %v4553_v43 }
 0xb8c   : > { %v4555_v53 = vadd.f32 %v6039_v46, %v4554_v47 }
 0xb8e   : > { %v4559_v33 = vsel %vm4558_vm7, %v6039_v46, %v4555_v53 }
 0xb8f   : > { %v4564_v15 = vsel %vm4561_vm8, %v4563_v12, %v4559_v33 }
 0xb90   : > { %v4566_v60 = vmul.f32 %v4564_v15, %v4544_v35 }
 0xb92   : > { %v4583_v38 = vpack.c.bf16 %v4566_v60, %v4566_v60 }
 0xb94   : > { %4642 = vmatmul.bf16.vlgmr.msrb.gmra.mxu0 %v4583_v38 }
 0xc11   : > { %v4643_v4 = vpop.f32.mrf.mxu0 }
 0xc12   : > { %v4644_v37 = vadd.f32 %v6003_v11, %v4643_v4 }
 0xc14   : > { %4647 = vst [vmem:[%s7446_s9] sm:$0xf] %v4644_v37 }
 0xc19   : > { %v4645_v9 = vpop.f32.mrf.mxu0 }
 0xc1a PF: > { %s23_s15 = sadd.s32 1, %s6080_s15  }
 0xc1b   : > { %p20_p10 = scmp.ge.s32.totalorder %s23_s15, 4  }
 0xc1d   :  { %22 = sbr.rel (!%p20_p10) target bundleno = 3 (0x3), region = 106 }
 0xc22   :  { %4665 = vsyncpa [#allocation10], 1 }
 0xc23   :  { %4667 = vsyncpa [#allocation10 + $0x1], 1 }

</bundles_post_ra>
